<compile_context>
chip_gen: v7x
topology: tpu7x:2x2x1
jax: 0.10.0
libtpu: 0.0.40
codegen_flags: <defaults>
</compile_context>

<pallas_src>
import jax
import jax.numpy as jnp
from jax import lax
from jax.experimental import pallas as pl
from jax.experimental.pallas import tpu as pltpu

# ----------------------------- configuration -------------------------------
BATCH = 2          # batch_size
SEQ_LEN = 8        # sequence length
VOCAB = 32         # vocab_size
EMB = 16           # embedd_config['embedd_dim']
HID = 32           # embedd_config['hidden_dim_l0']  (LSTM hidden, per direction)
L1 = 16            # embedd_config['hidden_dim_l1']
L2 = 4             # embedd_config['hidden_dim_l2']  (attention hops)


# --------------------------------- kernel -----------------------------------
def self_attention_kernel(
    seq_ref,                            # (T*B, 1) int32, time-major token ids
    emb_ref,                            # (VOCAB, EMB)
    w_ih_f_ref, whh_f_ref, b_f_ref,     # fwd LSTM: (E,4H), (4,H,H) per-gate, (1,4H)
    w_ih_b_ref, whh_b_ref, b_b_ref,     # bwd LSTM: same shapes
    w_s1_ref, b_s1_ref,                 # (2H, L1), (1, L1)
    w_s2_ref, b_s2_ref,                 # (L1, L2), (1, L2)
    y_ref,                              # out: (B, 2H)
):
    T, B = SEQ_LEN, BATCH
    TB = T * B

    # ---- fused embedding gather: one-hot @ table (MXU, no dynamic indexing) ----
    ids = seq_ref[...]                                            # (T*B, 1) int32
    vocab_iota = lax.broadcasted_iota(jnp.int32, (TB, VOCAB), 1)  # (T*B, V)
    onehot = (vocab_iota == ids).astype(jnp.float32)              # (T*B, V)
    x = jnp.dot(onehot, emb_ref[...], preferred_element_type=jnp.float32)  # (T*B, E)

    # ---- hoisted LSTM input projections (one batched matmul per direction) ----
    gx_f = jnp.dot(x, w_ih_f_ref[...], preferred_element_type=jnp.float32) + b_f_ref[...]
    gx_b = jnp.dot(x, w_ih_b_ref[...], preferred_element_type=jnp.float32) + b_b_ref[...]
    # split per gate (i, f, g, o) once, off the critical path -> (T*B, H) tiles
    gxf = tuple(gx_f[:, k * HID:(k + 1) * HID] for k in range(4))
    gxb = tuple(gx_b[:, k * HID:(k + 1) * HID] for k in range(4))

    def lstm_cell(gx_t, h, c, whh_ref):
        # gx_t: 4 x (B, H) precomputed x-projections (bias already folded in).
        # Only h @ w_hh remains on the serial chain, as 4 independent
        # lane-0-aligned (B,H)@(H,H) matmuls that pipeline in the MXU.
        gi = gx_t[0] + jnp.dot(h, whh_ref[0], preferred_element_type=jnp.float32)
        gf = gx_t[1] + jnp.dot(h, whh_ref[1], preferred_element_type=jnp.float32)
        gg = gx_t[2] + jnp.dot(h, whh_ref[2], preferred_element_type=jnp.float32)
        go = gx_t[3] + jnp.dot(h, whh_ref[3], preferred_element_type=jnp.float32)
        c_new = jax.nn.sigmoid(gf) * c + jax.nn.sigmoid(gi) * jnp.tanh(gg)
        h_new = jax.nn.sigmoid(go) * jnp.tanh(c_new)
        return h_new, c_new

    # ---- fused fwd/bwd bi-LSTM: fully unrolled, register-carried state ----
    zeros = jnp.zeros((B, HID), jnp.float32)
    h_f, c_f, h_b, c_b = zeros, zeros, zeros, zeros
    outs_f = [None] * T
    outs_b = [None] * T
    for t in range(T):                          # T is a compile-time constant
        rt = T - 1 - t
        h_f, c_f = lstm_cell(tuple(g[t * B:(t + 1) * B] for g in gxf),
                             h_f, c_f, whh_f_ref)
        h_b, c_b = lstm_cell(tuple(g[rt * B:(rt + 1) * B] for g in gxb),
                             h_b, c_b, whh_b_ref)
        outs_f[t] = h_f
        outs_b[rt] = h_b

    # lstm output, time-major flat: row t*B + b -> [h_fwd | h_bwd]   (T*B, 2H)
    out_flat = jnp.concatenate(
        [jnp.concatenate(outs_f, axis=0), jnp.concatenate(outs_b, axis=0)], axis=-1)

    # ---- structured self-attention, batched over all (t, b) rows ----
    s1 = jnp.tanh(jnp.dot(out_flat, w_s1_ref[...], preferred_element_type=jnp.float32)
                  + b_s1_ref[...])                                            # (T*B, L1)
    s2 = (jnp.dot(s1, w_s2_ref[...], preferred_element_type=jnp.float32)
          + b_s2_ref[...])                                                    # (T*B, L2)

    # softmax over time for each (batch, hop): static per-step sublane slices
    s2_t = [s2[t * B:(t + 1) * B, :] for t in range(T)]   # T x (B, L2)
    m = s2_t[0]
    for t in range(1, T):
        m = jnp.maximum(m, s2_t[t])
    e_t = [jnp.exp(s - m) for s in s2_t]
    denom = e_t[0]
    for t in range(1, T):
        denom = denom + e_t[t]
    inv_denom_scaled = (1.0 / L2) / denom                 # (B, L2): softmax + hop-mean

    # hidden = mean over hops of (att @ output)
    #        = sum_t (mean_hop att[:, :, t]) * output[t]
    hid_f = jnp.zeros((B, HID), jnp.float32)
    hid_b = jnp.zeros((B, HID), jnp.float32)
    for t in range(T):
        w_t = jnp.sum(e_t[t] * inv_denom_scaled, axis=1, keepdims=True)   # (B, 1)
        hid_f = hid_f + w_t * outs_f[t]
        hid_b = hid_b + w_t * outs_b[t]

    y_ref[...] = jnp.concatenate([hid_f, hid_b], axis=-1)    # (B, 2H)


# ------------------------------- wrapper -------------------------------------
def _per_gate(w_hh):
    # (H, 4H) -> (4, H, H) with [k] == w_hh[:, k*H:(k+1)*H]
    return jnp.transpose(w_hh.reshape(HID, 4, HID), (1, 0, 2))


@jax.jit
def self_attention_forward(seq, params):
    # time-major flat token ids: row t*B + b == seq[b, t]  (tiny int op, fuses under jit)
    seq_tm = jnp.transpose(seq).reshape(SEQ_LEN * BATCH, 1).astype(jnp.int32)
    inputs = (
        seq_tm, params["emb"],
        params["w_ih_f"], _per_gate(params["w_hh_f"]), params["b_f"],
        params["w_ih_b"], _per_gate(params["w_hh_b"]), params["b_b"],
        params["w_s1"], params["b_s1"], params["w_s2"], params["b_s2"],
    )
    vmem = pl.BlockSpec(memory_space=pltpu.MemorySpace.VMEM)
    return pl.pallas_call(
        self_attention_kernel,
        out_shape=jax.ShapeDtypeStruct((BATCH, 2 * HID), jnp.float32),
        in_specs=[vmem] * len(inputs),
        out_specs=vmem,
    )(*inputs)


# ---------------------------- reference (plain JAX) --------------------------
def reference_forward(seq, params):
    x = jnp.transpose(params["emb"][seq], (1, 0, 2)).astype(jnp.float32)  # (T,B,E)
    z = jnp.zeros((seq.shape[0], HID), jnp.float32)

    def make_cell(w_ih, w_hh, b):
        def cell(carry, x_t):
            h, c = carry
            g = x_t @ w_ih + h @ w_hh + b
            i = jax.nn.sigmoid(g[:, :HID])
            f = jax.nn.sigmoid(g[:, HID:2 * HID])
            gg = jnp.tanh(g[:, 2 * HID:3 * HID])
            o = jax.nn.sigmoid(g[:, 3 * HID:])
            c = f * c + i * gg
            h = o * jnp.tanh(c)
            return (h, c), h
        return cell

    _, out_f = lax.scan(make_cell(params["w_ih_f"], params["w_hh_f"], params["b_f"]),
                        (z, z), x)
    _, out_b_rev = lax.scan(make_cell(params["w_ih_b"], params["w_hh_b"], params["b_b"]),
                            (z, z), x[::-1])
    output = jnp.concatenate([out_f, out_b_rev[::-1]], axis=-1)   # (T, B, 2H)
    output = jnp.transpose(output, (1, 0, 2))                     # (B, T, 2H)

    s1 = jnp.tanh(output @ params["w_s1"] + params["b_s1"])
    s2 = s1 @ params["w_s2"] + params["b_s2"]                     # (B, T, L2)
    att = jax.nn.softmax(jnp.transpose(s2, (0, 2, 1)), axis=2)    # (B, L2, T)
    hidden = jnp.einsum("blt,bth->blh", att, output).mean(axis=1)  # (B, 2H)
    return hidden


# ------------------------------- param init ----------------------------------
def init_params(key):
    ks = jax.random.split(key, 12)
    n = lambda k, shape, s=0.1: jax.random.normal(k, shape, jnp.float32) * s
    return {
        "emb":    n(ks[0], (VOCAB, EMB), 0.5),
        # LSTM weights pre-transposed: (in, 4H); biases = b_ih + b_hh fused.
        "w_ih_f": n(ks[1], (EMB, 4 * HID)),
        "w_hh_f": n(ks[2], (HID, 4 * HID)),
        "b_f":    n(ks[3], (1, 4 * HID), 0.05),
        "w_ih_b": n(ks[4], (EMB, 4 * HID)),
        "w_hh_b": n(ks[5], (HID, 4 * HID)),
        "b_b":    n(ks[6], (1, 4 * HID), 0.05),
        # attention projections (pre-transposed)
        "w_s1":   n(ks[7], (2 * HID, L1)),
        "b_s1":   n(ks[8], (1, L1), 0.05),
        "w_s2":   n(ks[9], (L1, L2)),
        "b_s2":   n(ks[10], (1, L2), 0.05),
    }


# ----------------------------------- main ------------------------------------
if __name__ == "__main__":
    key = jax.random.PRNGKey(0)
    k_seq, k_params = jax.random.split(key)
    params = init_params(k_params)
    seq = jax.random.randint(k_seq, (BATCH, SEQ_LEN), 0, VOCAB, dtype=jnp.int32)

    y = jax.block_until_ready(self_attention_forward(seq, params))
    y_ref = jax.block_until_ready(reference_forward(seq, params))

    assert y.shape == (BATCH, 2 * HID), y.shape
    assert jnp.all(jnp.isfinite(y)), "non-finite output"
    assert jnp.allclose(y, y_ref, atol=2e-3, rtol=2e-3), (y, y_ref)
    print("KERNEL_OK")
</pallas_src>

<mosaic_0001>
module attributes {stable_mosaic.version = 11 : i64} {
  func.func @self_attention_kernel(%arg0: memref<16x1xi32, #tpu.memory_space<vmem>>, %arg1: memref<32x16xf32, #tpu.memory_space<vmem>>, %arg2: memref<16x128xf32, #tpu.memory_space<vmem>>, %arg3: memref<4x32x32xf32, #tpu.memory_space<vmem>>, %arg4: memref<1x128xf32, #tpu.memory_space<vmem>>, %arg5: memref<16x128xf32, #tpu.memory_space<vmem>>, %arg6: memref<4x32x32xf32, #tpu.memory_space<vmem>>, %arg7: memref<1x128xf32, #tpu.memory_space<vmem>>, %arg8: memref<64x16xf32, #tpu.memory_space<vmem>>, %arg9: memref<1x16xf32, #tpu.memory_space<vmem>>, %arg10: memref<16x4xf32, #tpu.memory_space<vmem>>, %arg11: memref<1x4xf32, #tpu.memory_space<vmem>>, %arg12: memref<2x64xf32, #tpu.memory_space<vmem>>) attributes {dimension_semantics = [], scalar_prefetch = 0 : i64, scratch_operands = 0 : i64, tpu.core_type = #tpu.core_type<tc>} {
    %c0 = arith.constant 0 : index
    %c0_0 = arith.constant 0 : index
    %0 = vector.load %arg0[%c0, %c0_0] : memref<16x1xi32, #tpu.memory_space<vmem>>, vector<16x1xi32>
    %1 = tpu.iota {dimensions = array<i32: 1>} : vector<16x32xi32>
    %2 = vector.broadcast %0 : vector<16x1xi32> to vector<16x32xi32>
    %3 = arith.cmpi eq, %1, %2 : vector<16x32xi32>
    %4 = arith.extui %3 : vector<16x32xi1> to vector<16x32xi32>
    %5 = arith.sitofp %4 : vector<16x32xi32> to vector<16x32xf32>
    %c0_1 = arith.constant 0 : index
    %c0_2 = arith.constant 0 : index
    %6 = vector.load %arg1[%c0_1, %c0_2] : memref<32x16xf32, #tpu.memory_space<vmem>>, vector<32x16xf32>
    %cst = arith.constant dense<0.000000e+00> : vector<16x16xf32>
    %7 = tpu.matmul %5, %6, %cst {dimension_numbers = #tpu.dot_dimension_numbers<[1], [0], [0], [1], [0, 0, 1, 1], [], []>} : vector<16x32xf32>, vector<32x16xf32>, vector<16x16xf32> -> vector<16x16xf32>
    %c0_3 = arith.constant 0 : index
    %c0_4 = arith.constant 0 : index
    %8 = vector.load %arg2[%c0_3, %c0_4] : memref<16x128xf32, #tpu.memory_space<vmem>>, vector<16x128xf32>
    %cst_5 = arith.constant dense<0.000000e+00> : vector<16x128xf32>
    %9 = tpu.matmul %7, %8, %cst_5 {dimension_numbers = #tpu.dot_dimension_numbers<[1], [0], [0], [1], [0, 0, 1, 1], [], []>} : vector<16x16xf32>, vector<16x128xf32>, vector<16x128xf32> -> vector<16x128xf32>
    %c0_6 = arith.constant 0 : index
    %c0_7 = arith.constant 0 : index
    %10 = vector.load %arg4[%c0_6, %c0_7] : memref<1x128xf32, #tpu.memory_space<vmem>>, vector<1x128xf32>
    %11 = vector.broadcast %10 : vector<1x128xf32> to vector<16x128xf32>
    %12 = arith.addf %9, %11 : vector<16x128xf32>
    %c0_8 = arith.constant 0 : index
    %c0_9 = arith.constant 0 : index
    %13 = vector.load %arg5[%c0_8, %c0_9] : memref<16x128xf32, #tpu.memory_space<vmem>>, vector<16x128xf32>
    %cst_10 = arith.constant dense<0.000000e+00> : vector<16x128xf32>
    %14 = tpu.matmul %7, %13, %cst_10 {dimension_numbers = #tpu.dot_dimension_numbers<[1], [0], [0], [1], [0, 0, 1, 1], [], []>} : vector<16x16xf32>, vector<16x128xf32>, vector<16x128xf32> -> vector<16x128xf32>
    %c0_11 = arith.constant 0 : index
    %c0_12 = arith.constant 0 : index
    %15 = vector.load %arg7[%c0_11, %c0_12] : memref<1x128xf32, #tpu.memory_space<vmem>>, vector<1x128xf32>
    %16 = vector.broadcast %15 : vector<1x128xf32> to vector<16x128xf32>
    %17 = arith.addf %14, %16 : vector<16x128xf32>
    %18 = vector.extract_strided_slice %12 {offsets = [0, 0], sizes = [16, 32], strides = [1, 1]} : vector<16x128xf32> to vector<16x32xf32>
    %19 = vector.extract_strided_slice %12 {offsets = [0, 32], sizes = [16, 32], strides = [1, 1]} : vector<16x128xf32> to vector<16x32xf32>
    %20 = vector.extract_strided_slice %12 {offsets = [0, 64], sizes = [16, 32], strides = [1, 1]} : vector<16x128xf32> to vector<16x32xf32>
    %21 = vector.extract_strided_slice %12 {offsets = [0, 96], sizes = [16, 32], strides = [1, 1]} : vector<16x128xf32> to vector<16x32xf32>
    %22 = vector.extract_strided_slice %17 {offsets = [0, 0], sizes = [16, 32], strides = [1, 1]} : vector<16x128xf32> to vector<16x32xf32>
    %23 = vector.extract_strided_slice %17 {offsets = [0, 32], sizes = [16, 32], strides = [1, 1]} : vector<16x128xf32> to vector<16x32xf32>
    %24 = vector.extract_strided_slice %17 {offsets = [0, 64], sizes = [16, 32], strides = [1, 1]} : vector<16x128xf32> to vector<16x32xf32>
    %25 = vector.extract_strided_slice %17 {offsets = [0, 96], sizes = [16, 32], strides = [1, 1]} : vector<16x128xf32> to vector<16x32xf32>
    %cst_13 = arith.constant 0.000000e+00 : f32
    %26 = vector.broadcast %cst_13 : f32 to vector<2x32xf32>
    %27 = vector.extract_strided_slice %18 {offsets = [0, 0], sizes = [2, 32], strides = [1, 1]} : vector<16x32xf32> to vector<2x32xf32>
    %28 = vector.extract_strided_slice %19 {offsets = [0, 0], sizes = [2, 32], strides = [1, 1]} : vector<16x32xf32> to vector<2x32xf32>
    %29 = vector.extract_strided_slice %20 {offsets = [0, 0], sizes = [2, 32], strides = [1, 1]} : vector<16x32xf32> to vector<2x32xf32>
    %30 = vector.extract_strided_slice %21 {offsets = [0, 0], sizes = [2, 32], strides = [1, 1]} : vector<16x32xf32> to vector<2x32xf32>
    %c0_14 = arith.constant 0 : index
    %c0_15 = arith.constant 0 : index
    %c0_16 = arith.constant 0 : index
    %31 = vector.load %arg3[%c0_14, %c0_15, %c0_16] : memref<4x32x32xf32, #tpu.memory_space<vmem>>, vector<1x32x32xf32>
    %32 = vector.shape_cast %31 : vector<1x32x32xf32> to vector<32x32xf32>
    %cst_17 = arith.constant dense<0.000000e+00> : vector<2x32xf32>
    %33 = tpu.matmul %26, %32, %cst_17 {dimension_numbers = #tpu.dot_dimension_numbers<[1], [0], [0], [1], [0, 0, 1, 1], [], []>} : vector<2x32xf32>, vector<32x32xf32>, vector<2x32xf32> -> vector<2x32xf32>
    %34 = arith.addf %27, %33 : vector<2x32xf32>
    %c1 = arith.constant 1 : index
    %c0_18 = arith.constant 0 : index
    %c0_19 = arith.constant 0 : index
    %35 = vector.load %arg3[%c1, %c0_18, %c0_19] : memref<4x32x32xf32, #tpu.memory_space<vmem>>, vector<1x32x32xf32>
    %36 = vector.shape_cast %35 : vector<1x32x32xf32> to vector<32x32xf32>
    %cst_20 = arith.constant dense<0.000000e+00> : vector<2x32xf32>
    %37 = tpu.matmul %26, %36, %cst_20 {dimension_numbers = #tpu.dot_dimension_numbers<[1], [0], [0], [1], [0, 0, 1, 1], [], []>} : vector<2x32xf32>, vector<32x32xf32>, vector<2x32xf32> -> vector<2x32xf32>
    %38 = arith.addf %28, %37 : vector<2x32xf32>
    %c2 = arith.constant 2 : index
    %c0_21 = arith.constant 0 : index
    %c0_22 = arith.constant 0 : index
    %39 = vector.load %arg3[%c2, %c0_21, %c0_22] : memref<4x32x32xf32, #tpu.memory_space<vmem>>, vector<1x32x32xf32>
    %40 = vector.shape_cast %39 : vector<1x32x32xf32> to vector<32x32xf32>
    %cst_23 = arith.constant dense<0.000000e+00> : vector<2x32xf32>
    %41 = tpu.matmul %26, %40, %cst_23 {dimension_numbers = #tpu.dot_dimension_numbers<[1], [0], [0], [1], [0, 0, 1, 1], [], []>} : vector<2x32xf32>, vector<32x32xf32>, vector<2x32xf32> -> vector<2x32xf32>
    %42 = arith.addf %29, %41 : vector<2x32xf32>
    %c3 = arith.constant 3 : index
    %c0_24 = arith.constant 0 : index
    %c0_25 = arith.constant 0 : index
    %43 = vector.load %arg3[%c3, %c0_24, %c0_25] : memref<4x32x32xf32, #tpu.memory_space<vmem>>, vector<1x32x32xf32>
    %44 = vector.shape_cast %43 : vector<1x32x32xf32> to vector<32x32xf32>
    %cst_26 = arith.constant dense<0.000000e+00> : vector<2x32xf32>
    %45 = tpu.matmul %26, %44, %cst_26 {dimension_numbers = #tpu.dot_dimension_numbers<[1], [0], [0], [1], [0, 0, 1, 1], [], []>} : vector<2x32xf32>, vector<32x32xf32>, vector<2x32xf32> -> vector<2x32xf32>
    %46 = arith.addf %30, %45 : vector<2x32xf32>
    %47 = arith.negf %38 : vector<2x32xf32>
    %48 = math.exp %47 : vector<2x32xf32>
    %cst_27 = arith.constant 1.000000e+00 : f32
    %49 = vector.broadcast %cst_27 : f32 to vector<2x32xf32>
    %50 = arith.addf %49, %48 : vector<2x32xf32>
    %51 = arith.divf %49, %50 : vector<2x32xf32>
    %52 = arith.mulf %51, %26 : vector<2x32xf32>
    %53 = arith.negf %34 : vector<2x32xf32>
    %54 = math.exp %53 : vector<2x32xf32>
    %cst_28 = arith.constant 1.000000e+00 : f32
    %55 = vector.broadcast %cst_28 : f32 to vector<2x32xf32>
    %56 = arith.addf %55, %54 : vector<2x32xf32>
    %57 = arith.divf %55, %56 : vector<2x32xf32>
    %58 = math.tanh %42 : vector<2x32xf32>
    %59 = arith.mulf %57, %58 : vector<2x32xf32>
    %60 = arith.addf %52, %59 : vector<2x32xf32>
    %61 = arith.negf %46 : vector<2x32xf32>
    %62 = math.exp %61 : vector<2x32xf32>
    %cst_29 = arith.constant 1.000000e+00 : f32
    %63 = vector.broadcast %cst_29 : f32 to vector<2x32xf32>
    %64 = arith.addf %63, %62 : vector<2x32xf32>
    %65 = arith.divf %63, %64 : vector<2x32xf32>
    %66 = math.tanh %60 : vector<2x32xf32>
    %67 = arith.mulf %65, %66 : vector<2x32xf32>
    %68 = vector.extract_strided_slice %22 {offsets = [14, 0], sizes = [2, 32], strides = [1, 1]} : vector<16x32xf32> to vector<2x32xf32>
    %69 = vector.extract_strided_slice %23 {offsets = [14, 0], sizes = [2, 32], strides = [1, 1]} : vector<16x32xf32> to vector<2x32xf32>
    %70 = vector.extract_strided_slice %24 {offsets = [14, 0], sizes = [2, 32], strides = [1, 1]} : vector<16x32xf32> to vector<2x32xf32>
    %71 = vector.extract_strided_slice %25 {offsets = [14, 0], sizes = [2, 32], strides = [1, 1]} : vector<16x32xf32> to vector<2x32xf32>
    %c0_30 = arith.constant 0 : index
    %c0_31 = arith.constant 0 : index
    %c0_32 = arith.constant 0 : index
    %72 = vector.load %arg6[%c0_30, %c0_31, %c0_32] : memref<4x32x32xf32, #tpu.memory_space<vmem>>, vector<1x32x32xf32>
    %73 = vector.shape_cast %72 : vector<1x32x32xf32> to vector<32x32xf32>
    %cst_33 = arith.constant dense<0.000000e+00> : vector<2x32xf32>
    %74 = tpu.matmul %26, %73, %cst_33 {dimension_numbers = #tpu.dot_dimension_numbers<[1], [0], [0], [1], [0, 0, 1, 1], [], []>} : vector<2x32xf32>, vector<32x32xf32>, vector<2x32xf32> -> vector<2x32xf32>
    %75 = arith.addf %68, %74 : vector<2x32xf32>
    %c1_34 = arith.constant 1 : index
    %c0_35 = arith.constant 0 : index
    %c0_36 = arith.constant 0 : index
    %76 = vector.load %arg6[%c1_34, %c0_35, %c0_36] : memref<4x32x32xf32, #tpu.memory_space<vmem>>, vector<1x32x32xf32>
    %77 = vector.shape_cast %76 : vector<1x32x32xf32> to vector<32x32xf32>
    %cst_37 = arith.constant dense<0.000000e+00> : vector<2x32xf32>
    %78 = tpu.matmul %26, %77, %cst_37 {dimension_numbers = #tpu.dot_dimension_numbers<[1], [0], [0], [1], [0, 0, 1, 1], [], []>} : vector<2x32xf32>, vector<32x32xf32>, vector<2x32xf32> -> vector<2x32xf32>
    %79 = arith.addf %69, %78 : vector<2x32xf32>
    %c2_38 = arith.constant 2 : index
    %c0_39 = arith.constant 0 : index
    %c0_40 = arith.constant 0 : index
    %80 = vector.load %arg6[%c2_38, %c0_39, %c0_40] : memref<4x32x32xf32, #tpu.memory_space<vmem>>, vector<1x32x32xf32>
    %81 = vector.shape_cast %80 : vector<1x32x32xf32> to vector<32x32xf32>
    %cst_41 = arith.constant dense<0.000000e+00> : vector<2x32xf32>
    %82 = tpu.matmul %26, %81, %cst_41 {dimension_numbers = #tpu.dot_dimension_numbers<[1], [0], [0], [1], [0, 0, 1, 1], [], []>} : vector<2x32xf32>, vector<32x32xf32>, vector<2x32xf32> -> vector<2x32xf32>
    %83 = arith.addf %70, %82 : vector<2x32xf32>
    %c3_42 = arith.constant 3 : index
    %c0_43 = arith.constant 0 : index
    %c0_44 = arith.constant 0 : index
    %84 = vector.load %arg6[%c3_42, %c0_43, %c0_44] : memref<4x32x32xf32, #tpu.memory_space<vmem>>, vector<1x32x32xf32>
    %85 = vector.shape_cast %84 : vector<1x32x32xf32> to vector<32x32xf32>
    %cst_45 = arith.constant dense<0.000000e+00> : vector<2x32xf32>
    %86 = tpu.matmul %26, %85, %cst_45 {dimension_numbers = #tpu.dot_dimension_numbers<[1], [0], [0], [1], [0, 0, 1, 1], [], []>} : vector<2x32xf32>, vector<32x32xf32>, vector<2x32xf32> -> vector<2x32xf32>
    %87 = arith.addf %71, %86 : vector<2x32xf32>
    %88 = arith.negf %79 : vector<2x32xf32>
    %89 = math.exp %88 : vector<2x32xf32>
    %cst_46 = arith.constant 1.000000e+00 : f32
    %90 = vector.broadcast %cst_46 : f32 to vector<2x32xf32>
    %91 = arith.addf %90, %89 : vector<2x32xf32>
    %92 = arith.divf %90, %91 : vector<2x32xf32>
    %93 = arith.mulf %92, %26 : vector<2x32xf32>
    %94 = arith.negf %75 : vector<2x32xf32>
    %95 = math.exp %94 : vector<2x32xf32>
    %cst_47 = arith.constant 1.000000e+00 : f32
    %96 = vector.broadcast %cst_47 : f32 to vector<2x32xf32>
    %97 = arith.addf %96, %95 : vector<2x32xf32>
    %98 = arith.divf %96, %97 : vector<2x32xf32>
    %99 = math.tanh %83 : vector<2x32xf32>
    %100 = arith.mulf %98, %99 : vector<2x32xf32>
    %101 = arith.addf %93, %100 : vector<2x32xf32>
    %102 = arith.negf %87 : vector<2x32xf32>
    %103 = math.exp %102 : vector<2x32xf32>
    %cst_48 = arith.constant 1.000000e+00 : f32
    %104 = vector.broadcast %cst_48 : f32 to vector<2x32xf32>
    %105 = arith.addf %104, %103 : vector<2x32xf32>
    %106 = arith.divf %104, %105 : vector<2x32xf32>
    %107 = math.tanh %101 : vector<2x32xf32>
    %108 = arith.mulf %106, %107 : vector<2x32xf32>
    %109 = vector.extract_strided_slice %18 {offsets = [2, 0], sizes = [2, 32], strides = [1, 1]} : vector<16x32xf32> to vector<2x32xf32>
    %110 = vector.extract_strided_slice %19 {offsets = [2, 0], sizes = [2, 32], strides = [1, 1]} : vector<16x32xf32> to vector<2x32xf32>
    %111 = vector.extract_strided_slice %20 {offsets = [2, 0], sizes = [2, 32], strides = [1, 1]} : vector<16x32xf32> to vector<2x32xf32>
    %112 = vector.extract_strided_slice %21 {offsets = [2, 0], sizes = [2, 32], strides = [1, 1]} : vector<16x32xf32> to vector<2x32xf32>
    %c0_49 = arith.constant 0 : index
    %c0_50 = arith.constant 0 : index
    %c0_51 = arith.constant 0 : index
    %113 = vector.load %arg3[%c0_49, %c0_50, %c0_51] : memref<4x32x32xf32, #tpu.memory_space<vmem>>, vector<1x32x32xf32>
    %114 = vector.shape_cast %113 : vector<1x32x32xf32> to vector<32x32xf32>
    %cst_52 = arith.constant dense<0.000000e+00> : vector<2x32xf32>
    %115 = tpu.matmul %67, %114, %cst_52 {dimension_numbers = #tpu.dot_dimension_numbers<[1], [0], [0], [1], [0, 0, 1, 1], [], []>} : vector<2x32xf32>, vector<32x32xf32>, vector<2x32xf32> -> vector<2x32xf32>
    %116 = arith.addf %109, %115 : vector<2x32xf32>
    %c1_53 = arith.constant 1 : index
    %c0_54 = arith.constant 0 : index
    %c0_55 = arith.constant 0 : index
    %117 = vector.load %arg3[%c1_53, %c0_54, %c0_55] : memref<4x32x32xf32, #tpu.memory_space<vmem>>, vector<1x32x32xf32>
    %118 = vector.shape_cast %117 : vector<1x32x32xf32> to vector<32x32xf32>
    %cst_56 = arith.constant dense<0.000000e+00> : vector<2x32xf32>
    %119 = tpu.matmul %67, %118, %cst_56 {dimension_numbers = #tpu.dot_dimension_numbers<[1], [0], [0], [1], [0, 0, 1, 1], [], []>} : vector<2x32xf32>, vector<32x32xf32>, vector<2x32xf32> -> vector<2x32xf32>
    %120 = arith.addf %110, %119 : vector<2x32xf32>
    %c2_57 = arith.constant 2 : index
    %c0_58 = arith.constant 0 : index
    %c0_59 = arith.constant 0 : index
    %121 = vector.load %arg3[%c2_57, %c0_58, %c0_59] : memref<4x32x32xf32, #tpu.memory_space<vmem>>, vector<1x32x32xf32>
    %122 = vector.shape_cast %121 : vector<1x32x32xf32> to vector<32x32xf32>
    %cst_60 = arith.constant dense<0.000000e+00> : vector<2x32xf32>
    %123 = tpu.matmul %67, %122, %cst_60 {dimension_numbers = #tpu.dot_dimension_numbers<[1], [0], [0], [1], [0, 0, 1, 1], [], []>} : vector<2x32xf32>, vector<32x32xf32>, vector<2x32xf32> -> vector<2x32xf32>
    %124 = arith.addf %111, %123 : vector<2x32xf32>
    %c3_61 = arith.constant 3 : index
    %c0_62 = arith.constant 0 : index
    %c0_63 = arith.constant 0 : index
    %125 = vector.load %arg3[%c3_61, %c0_62, %c0_63] : memref<4x32x32xf32, #tpu.memory_space<vmem>>, vector<1x32x32xf32>
    %126 = vector.shape_cast %125 : vector<1x32x32xf32> to vector<32x32xf32>
    %cst_64 = arith.constant dense<0.000000e+00> : vector<2x32xf32>
    %127 = tpu.matmul %67, %126, %cst_64 {dimension_numbers = #tpu.dot_dimension_numbers<[1], [0], [0], [1], [0, 0, 1, 1], [], []>} : vector<2x32xf32>, vector<32x32xf32>, vector<2x32xf32> -> vector<2x32xf32>
    %128 = arith.addf %112, %127 : vector<2x32xf32>
    %129 = arith.negf %120 : vector<2x32xf32>
    %130 = math.exp %129 : vector<2x32xf32>
    %cst_65 = arith.constant 1.000000e+00 : f32
    %131 = vector.broadcast %cst_65 : f32 to vector<2x32xf32>
    %132 = arith.addf %131, %130 : vector<2x32xf32>
    %133 = arith.divf %131, %132 : vector<2x32xf32>
    %134 = arith.mulf %133, %60 : vector<2x32xf32>
    %135 = arith.negf %116 : vector<2x32xf32>
    %136 = math.exp %135 : vector<2x32xf32>
    %cst_66 = arith.constant 1.000000e+00 : f32
    %137 = vector.broadcast %cst_66 : f32 to vector<2x32xf32>
    %138 = arith.addf %137, %136 : vector<2x32xf32>
    %139 = arith.divf %137, %138 : vector<2x32xf32>
    %140 = math.tanh %124 : vector<2x32xf32>
    %141 = arith.mulf %139, %140 : vector<2x32xf32>
    %142 = arith.addf %134, %141 : vector<2x32xf32>
    %143 = arith.negf %128 : vector<2x32xf32>
    %144 = math.exp %143 : vector<2x32xf32>
    %cst_67 = arith.constant 1.000000e+00 : f32
    %145 = vector.broadcast %cst_67 : f32 to vector<2x32xf32>
    %146 = arith.addf %145, %144 : vector<2x32xf32>
    %147 = arith.divf %145, %146 : vector<2x32xf32>
    %148 = math.tanh %142 : vector<2x32xf32>
    %149 = arith.mulf %147, %148 : vector<2x32xf32>
    %150 = vector.extract_strided_slice %22 {offsets = [12, 0], sizes = [2, 32], strides = [1, 1]} : vector<16x32xf32> to vector<2x32xf32>
    %151 = vector.extract_strided_slice %23 {offsets = [12, 0], sizes = [2, 32], strides = [1, 1]} : vector<16x32xf32> to vector<2x32xf32>
    %152 = vector.extract_strided_slice %24 {offsets = [12, 0], sizes = [2, 32], strides = [1, 1]} : vector<16x32xf32> to vector<2x32xf32>
    %153 = vector.extract_strided_slice %25 {offsets = [12, 0], sizes = [2, 32], strides = [1, 1]} : vector<16x32xf32> to vector<2x32xf32>
    %c0_68 = arith.constant 0 : index
    %c0_69 = arith.constant 0 : index
    %c0_70 = arith.constant 0 : index
    %154 = vector.load %arg6[%c0_68, %c0_69, %c0_70] : memref<4x32x32xf32, #tpu.memory_space<vmem>>, vector<1x32x32xf32>
    %155 = vector.shape_cast %154 : vector<1x32x32xf32> to vector<32x32xf32>
    %cst_71 = arith.constant dense<0.000000e+00> : vector<2x32xf32>
    %156 = tpu.matmul %108, %155, %cst_71 {dimension_numbers = #tpu.dot_dimension_numbers<[1], [0], [0], [1], [0, 0, 1, 1], [], []>} : vector<2x32xf32>, vector<32x32xf32>, vector<2x32xf32> -> vector<2x32xf32>
    %157 = arith.addf %150, %156 : vector<2x32xf32>
    %c1_72 = arith.constant 1 : index
    %c0_73 = arith.constant 0 : index
    %c0_74 = arith.constant 0 : index
    %158 = vector.load %arg6[%c1_72, %c0_73, %c0_74] : memref<4x32x32xf32, #tpu.memory_space<vmem>>, vector<1x32x32xf32>
    %159 = vector.shape_cast %158 : vector<1x32x32xf32> to vector<32x32xf32>
    %cst_75 = arith.constant dense<0.000000e+00> : vector<2x32xf32>
    %160 = tpu.matmul %108, %159, %cst_75 {dimension_numbers = #tpu.dot_dimension_numbers<[1], [0], [0], [1], [0, 0, 1, 1], [], []>} : vector<2x32xf32>, vector<32x32xf32>, vector<2x32xf32> -> vector<2x32xf32>
    %161 = arith.addf %151, %160 : vector<2x32xf32>
    %c2_76 = arith.constant 2 : index
    %c0_77 = arith.constant 0 : index
    %c0_78 = arith.constant 0 : index
    %162 = vector.load %arg6[%c2_76, %c0_77, %c0_78] : memref<4x32x32xf32, #tpu.memory_space<vmem>>, vector<1x32x32xf32>
    %163 = vector.shape_cast %162 : vector<1x32x32xf32> to vector<32x32xf32>
    %cst_79 = arith.constant dense<0.000000e+00> : vector<2x32xf32>
    %164 = tpu.matmul %108, %163, %cst_79 {dimension_numbers = #tpu.dot_dimension_numbers<[1], [0], [0], [1], [0, 0, 1, 1], [], []>} : vector<2x32xf32>, vector<32x32xf32>, vector<2x32xf32> -> vector<2x32xf32>
    %165 = arith.addf %152, %164 : vector<2x32xf32>
    %c3_80 = arith.constant 3 : index
    %c0_81 = arith.constant 0 : index
    %c0_82 = arith.constant 0 : index
    %166 = vector.load %arg6[%c3_80, %c0_81, %c0_82] : memref<4x32x32xf32, #tpu.memory_space<vmem>>, vector<1x32x32xf32>
    %167 = vector.shape_cast %166 : vector<1x32x32xf32> to vector<32x32xf32>
    %cst_83 = arith.constant dense<0.000000e+00> : vector<2x32xf32>
    %168 = tpu.matmul %108, %167, %cst_83 {dimension_numbers = #tpu.dot_dimension_numbers<[1], [0], [0], [1], [0, 0, 1, 1], [], []>} : vector<2x32xf32>, vector<32x32xf32>, vector<2x32xf32> -> vector<2x32xf32>
    %169 = arith.addf %153, %168 : vector<2x32xf32>
    %170 = arith.negf %161 : vector<2x32xf32>
    %171 = math.exp %170 : vector<2x32xf32>
    %cst_84 = arith.constant 1.000000e+00 : f32
    %172 = vector.broadcast %cst_84 : f32 to vector<2x32xf32>
    %173 = arith.addf %172, %171 : vector<2x32xf32>
    %174 = arith.divf %172, %173 : vector<2x32xf32>
    %175 = arith.mulf %174, %101 : vector<2x32xf32>
    %176 = arith.negf %157 : vector<2x32xf32>
    %177 = math.exp %176 : vector<2x32xf32>
    %cst_85 = arith.constant 1.000000e+00 : f32
    %178 = vector.broadcast %cst_85 : f32 to vector<2x32xf32>
    %179 = arith.addf %178, %177 : vector<2x32xf32>
    %180 = arith.divf %178, %179 : vector<2x32xf32>
    %181 = math.tanh %165 : vector<2x32xf32>
    %182 = arith.mulf %180, %181 : vector<2x32xf32>
    %183 = arith.addf %175, %182 : vector<2x32xf32>
    %184 = arith.negf %169 : vector<2x32xf32>
    %185 = math.exp %184 : vector<2x32xf32>
    %cst_86 = arith.constant 1.000000e+00 : f32
    %186 = vector.broadcast %cst_86 : f32 to vector<2x32xf32>
    %187 = arith.addf %186, %185 : vector<2x32xf32>
    %188 = arith.divf %186, %187 : vector<2x32xf32>
    %189 = math.tanh %183 : vector<2x32xf32>
    %190 = arith.mulf %188, %189 : vector<2x32xf32>
    %191 = vector.extract_strided_slice %18 {offsets = [4, 0], sizes = [2, 32], strides = [1, 1]} : vector<16x32xf32> to vector<2x32xf32>
    %192 = vector.extract_strided_slice %19 {offsets = [4, 0], sizes = [2, 32], strides = [1, 1]} : vector<16x32xf32> to vector<2x32xf32>
    %193 = vector.extract_strided_slice %20 {offsets = [4, 0], sizes = [2, 32], strides = [1, 1]} : vector<16x32xf32> to vector<2x32xf32>
    %194 = vector.extract_strided_slice %21 {offsets = [4, 0], sizes = [2, 32], strides = [1, 1]} : vector<16x32xf32> to vector<2x32xf32>
    %c0_87 = arith.constant 0 : index
    %c0_88 = arith.constant 0 : index
    %c0_89 = arith.constant 0 : index
    %195 = vector.load %arg3[%c0_87, %c0_88, %c0_89] : memref<4x32x32xf32, #tpu.memory_space<vmem>>, vector<1x32x32xf32>
    %196 = vector.shape_cast %195 : vector<1x32x32xf32> to vector<32x32xf32>
    %cst_90 = arith.constant dense<0.000000e+00> : vector<2x32xf32>
    %197 = tpu.matmul %149, %196, %cst_90 {dimension_numbers = #tpu.dot_dimension_numbers<[1], [0], [0], [1], [0, 0, 1, 1], [], []>} : vector<2x32xf32>, vector<32x32xf32>, vector<2x32xf32> -> vector<2x32xf32>
    %198 = arith.addf %191, %197 : vector<2x32xf32>
    %c1_91 = arith.constant 1 : index
    %c0_92 = arith.constant 0 : index
    %c0_93 = arith.constant 0 : index
    %199 = vector.load %arg3[%c1_91, %c0_92, %c0_93] : memref<4x32x32xf32, #tpu.memory_space<vmem>>, vector<1x32x32xf32>
    %200 = vector.shape_cast %199 : vector<1x32x32xf32> to vector<32x32xf32>
    %cst_94 = arith.constant dense<0.000000e+00> : vector<2x32xf32>
    %201 = tpu.matmul %149, %200, %cst_94 {dimension_numbers = #tpu.dot_dimension_numbers<[1], [0], [0], [1], [0, 0, 1, 1], [], []>} : vector<2x32xf32>, vector<32x32xf32>, vector<2x32xf32> -> vector<2x32xf32>
    %202 = arith.addf %192, %201 : vector<2x32xf32>
    %c2_95 = arith.constant 2 : index
    %c0_96 = arith.constant 0 : index
    %c0_97 = arith.constant 0 : index
    %203 = vector.load %arg3[%c2_95, %c0_96, %c0_97] : memref<4x32x32xf32, #tpu.memory_space<vmem>>, vector<1x32x32xf32>
    %204 = vector.shape_cast %203 : vector<1x32x32xf32> to vector<32x32xf32>
    %cst_98 = arith.constant dense<0.000000e+00> : vector<2x32xf32>
    %205 = tpu.matmul %149, %204, %cst_98 {dimension_numbers = #tpu.dot_dimension_numbers<[1], [0], [0], [1], [0, 0, 1, 1], [], []>} : vector<2x32xf32>, vector<32x32xf32>, vector<2x32xf32> -> vector<2x32xf32>
    %206 = arith.addf %193, %205 : vector<2x32xf32>
    %c3_99 = arith.constant 3 : index
    %c0_100 = arith.constant 0 : index
    %c0_101 = arith.constant 0 : index
    %207 = vector.load %arg3[%c3_99, %c0_100, %c0_101] : memref<4x32x32xf32, #tpu.memory_space<vmem>>, vector<1x32x32xf32>
    %208 = vector.shape_cast %207 : vector<1x32x32xf32> to vector<32x32xf32>
    %cst_102 = arith.constant dense<0.000000e+00> : vector<2x32xf32>
    %209 = tpu.matmul %149, %208, %cst_102 {dimension_numbers = #tpu.dot_dimension_numbers<[1], [0], [0], [1], [0, 0, 1, 1], [], []>} : vector<2x32xf32>, vector<32x32xf32>, vector<2x32xf32> -> vector<2x32xf32>
    %210 = arith.addf %194, %209 : vector<2x32xf32>
    %211 = arith.negf %202 : vector<2x32xf32>
    %212 = math.exp %211 : vector<2x32xf32>
    %cst_103 = arith.constant 1.000000e+00 : f32
    %213 = vector.broadcast %cst_103 : f32 to vector<2x32xf32>
    %214 = arith.addf %213, %212 : vector<2x32xf32>
    %215 = arith.divf %213, %214 : vector<2x32xf32>
    %216 = arith.mulf %215, %142 : vector<2x32xf32>
    %217 = arith.negf %198 : vector<2x32xf32>
    %218 = math.exp %217 : vector<2x32xf32>
    %cst_104 = arith.constant 1.000000e+00 : f32
    %219 = vector.broadcast %cst_104 : f32 to vector<2x32xf32>
    %220 = arith.addf %219, %218 : vector<2x32xf32>
    %221 = arith.divf %219, %220 : vector<2x32xf32>
    %222 = math.tanh %206 : vector<2x32xf32>
    %223 = arith.mulf %221, %222 : vector<2x32xf32>
    %224 = arith.addf %216, %223 : vector<2x32xf32>
    %225 = arith.negf %210 : vector<2x32xf32>
    %226 = math.exp %225 : vector<2x32xf32>
    %cst_105 = arith.constant 1.000000e+00 : f32
    %227 = vector.broadcast %cst_105 : f32 to vector<2x32xf32>
    %228 = arith.addf %227, %226 : vector<2x32xf32>
    %229 = arith.divf %227, %228 : vector<2x32xf32>
    %230 = math.tanh %224 : vector<2x32xf32>
    %231 = arith.mulf %229, %230 : vector<2x32xf32>
    %232 = vector.extract_strided_slice %22 {offsets = [10, 0], sizes = [2, 32], strides = [1, 1]} : vector<16x32xf32> to vector<2x32xf32>
    %233 = vector.extract_strided_slice %23 {offsets = [10, 0], sizes = [2, 32], strides = [1, 1]} : vector<16x32xf32> to vector<2x32xf32>
    %234 = vector.extract_strided_slice %24 {offsets = [10, 0], sizes = [2, 32], strides = [1, 1]} : vector<16x32xf32> to vector<2x32xf32>
    %235 = vector.extract_strided_slice %25 {offsets = [10, 0], sizes = [2, 32], strides = [1, 1]} : vector<16x32xf32> to vector<2x32xf32>
    %c0_106 = arith.constant 0 : index
    %c0_107 = arith.constant 0 : index
    %c0_108 = arith.constant 0 : index
    %236 = vector.load %arg6[%c0_106, %c0_107, %c0_108] : memref<4x32x32xf32, #tpu.memory_space<vmem>>, vector<1x32x32xf32>
    %237 = vector.shape_cast %236 : vector<1x32x32xf32> to vector<32x32xf32>
    %cst_109 = arith.constant dense<0.000000e+00> : vector<2x32xf32>
    %238 = tpu.matmul %190, %237, %cst_109 {dimension_numbers = #tpu.dot_dimension_numbers<[1], [0], [0], [1], [0, 0, 1, 1], [], []>} : vector<2x32xf32>, vector<32x32xf32>, vector<2x32xf32> -> vector<2x32xf32>
    %239 = arith.addf %232, %238 : vector<2x32xf32>
    %c1_110 = arith.constant 1 : index
    %c0_111 = arith.constant 0 : index
    %c0_112 = arith.constant 0 : index
    %240 = vector.load %arg6[%c1_110, %c0_111, %c0_112] : memref<4x32x32xf32, #tpu.memory_space<vmem>>, vector<1x32x32xf32>
    %241 = vector.shape_cast %240 : vector<1x32x32xf32> to vector<32x32xf32>
    %cst_113 = arith.constant dense<0.000000e+00> : vector<2x32xf32>
    %242 = tpu.matmul %190, %241, %cst_113 {dimension_numbers = #tpu.dot_dimension_numbers<[1], [0], [0], [1], [0, 0, 1, 1], [], []>} : vector<2x32xf32>, vector<32x32xf32>, vector<2x32xf32> -> vector<2x32xf32>
    %243 = arith.addf %233, %242 : vector<2x32xf32>
    %c2_114 = arith.constant 2 : index
    %c0_115 = arith.constant 0 : index
    %c0_116 = arith.constant 0 : index
    %244 = vector.load %arg6[%c2_114, %c0_115, %c0_116] : memref<4x32x32xf32, #tpu.memory_space<vmem>>, vector<1x32x32xf32>
    %245 = vector.shape_cast %244 : vector<1x32x32xf32> to vector<32x32xf32>
    %cst_117 = arith.constant dense<0.000000e+00> : vector<2x32xf32>
    %246 = tpu.matmul %190, %245, %cst_117 {dimension_numbers = #tpu.dot_dimension_numbers<[1], [0], [0], [1], [0, 0, 1, 1], [], []>} : vector<2x32xf32>, vector<32x32xf32>, vector<2x32xf32> -> vector<2x32xf32>
    %247 = arith.addf %234, %246 : vector<2x32xf32>
    %c3_118 = arith.constant 3 : index
    %c0_119 = arith.constant 0 : index
    %c0_120 = arith.constant 0 : index
    %248 = vector.load %arg6[%c3_118, %c0_119, %c0_120] : memref<4x32x32xf32, #tpu.memory_space<vmem>>, vector<1x32x32xf32>
    %249 = vector.shape_cast %248 : vector<1x32x32xf32> to vector<32x32xf32>
    %cst_121 = arith.constant dense<0.000000e+00> : vector<2x32xf32>
    %250 = tpu.matmul %190, %249, %cst_121 {dimension_numbers = #tpu.dot_dimension_numbers<[1], [0], [0], [1], [0, 0, 1, 1], [], []>} : vector<2x32xf32>, vector<32x32xf32>, vector<2x32xf32> -> vector<2x32xf32>
    %251 = arith.addf %235, %250 : vector<2x32xf32>
    %252 = arith.negf %243 : vector<2x32xf32>
    %253 = math.exp %252 : vector<2x32xf32>
    %cst_122 = arith.constant 1.000000e+00 : f32
    %254 = vector.broadcast %cst_122 : f32 to vector<2x32xf32>
    %255 = arith.addf %254, %253 : vector<2x32xf32>
    %256 = arith.divf %254, %255 : vector<2x32xf32>
    %257 = arith.mulf %256, %183 : vector<2x32xf32>
    %258 = arith.negf %239 : vector<2x32xf32>
    %259 = math.exp %258 : vector<2x32xf32>
    %cst_123 = arith.constant 1.000000e+00 : f32
    %260 = vector.broadcast %cst_123 : f32 to vector<2x32xf32>
    %261 = arith.addf %260, %259 : vector<2x32xf32>
    %262 = arith.divf %260, %261 : vector<2x32xf32>
    %263 = math.tanh %247 : vector<2x32xf32>
    %264 = arith.mulf %262, %263 : vector<2x32xf32>
    %265 = arith.addf %257, %264 : vector<2x32xf32>
    %266 = arith.negf %251 : vector<2x32xf32>
    %267 = math.exp %266 : vector<2x32xf32>
    %cst_124 = arith.constant 1.000000e+00 : f32
    %268 = vector.broadcast %cst_124 : f32 to vector<2x32xf32>
    %269 = arith.addf %268, %267 : vector<2x32xf32>
    %270 = arith.divf %268, %269 : vector<2x32xf32>
    %271 = math.tanh %265 : vector<2x32xf32>
    %272 = arith.mulf %270, %271 : vector<2x32xf32>
    %273 = vector.extract_strided_slice %18 {offsets = [6, 0], sizes = [2, 32], strides = [1, 1]} : vector<16x32xf32> to vector<2x32xf32>
    %274 = vector.extract_strided_slice %19 {offsets = [6, 0], sizes = [2, 32], strides = [1, 1]} : vector<16x32xf32> to vector<2x32xf32>
    %275 = vector.extract_strided_slice %20 {offsets = [6, 0], sizes = [2, 32], strides = [1, 1]} : vector<16x32xf32> to vector<2x32xf32>
    %276 = vector.extract_strided_slice %21 {offsets = [6, 0], sizes = [2, 32], strides = [1, 1]} : vector<16x32xf32> to vector<2x32xf32>
    %c0_125 = arith.constant 0 : index
    %c0_126 = arith.constant 0 : index
    %c0_127 = arith.constant 0 : index
    %277 = vector.load %arg3[%c0_125, %c0_126, %c0_127] : memref<4x32x32xf32, #tpu.memory_space<vmem>>, vector<1x32x32xf32>
    %278 = vector.shape_cast %277 : vector<1x32x32xf32> to vector<32x32xf32>
    %cst_128 = arith.constant dense<0.000000e+00> : vector<2x32xf32>
    %279 = tpu.matmul %231, %278, %cst_128 {dimension_numbers = #tpu.dot_dimension_numbers<[1], [0], [0], [1], [0, 0, 1, 1], [], []>} : vector<2x32xf32>, vector<32x32xf32>, vector<2x32xf32> -> vector<2x32xf32>
    %280 = arith.addf %273, %279 : vector<2x32xf32>
    %c1_129 = arith.constant 1 : index
    %c0_130 = arith.constant 0 : index
    %c0_131 = arith.constant 0 : index
    %281 = vector.load %arg3[%c1_129, %c0_130, %c0_131] : memref<4x32x32xf32, #tpu.memory_space<vmem>>, vector<1x32x32xf32>
    %282 = vector.shape_cast %281 : vector<1x32x32xf32> to vector<32x32xf32>
    %cst_132 = arith.constant dense<0.000000e+00> : vector<2x32xf32>
    %283 = tpu.matmul %231, %282, %cst_132 {dimension_numbers = #tpu.dot_dimension_numbers<[1], [0], [0], [1], [0, 0, 1, 1], [], []>} : vector<2x32xf32>, vector<32x32xf32>, vector<2x32xf32> -> vector<2x32xf32>
    %284 = arith.addf %274, %283 : vector<2x32xf32>
    %c2_133 = arith.constant 2 : index
    %c0_134 = arith.constant 0 : index
    %c0_135 = arith.constant 0 : index
    %285 = vector.load %arg3[%c2_133, %c0_134, %c0_135] : memref<4x32x32xf32, #tpu.memory_space<vmem>>, vector<1x32x32xf32>
    %286 = vector.shape_cast %285 : vector<1x32x32xf32> to vector<32x32xf32>
    %cst_136 = arith.constant dense<0.000000e+00> : vector<2x32xf32>
    %287 = tpu.matmul %231, %286, %cst_136 {dimension_numbers = #tpu.dot_dimension_numbers<[1], [0], [0], [1], [0, 0, 1, 1], [], []>} : vector<2x32xf32>, vector<32x32xf32>, vector<2x32xf32> -> vector<2x32xf32>
    %288 = arith.addf %275, %287 : vector<2x32xf32>
    %c3_137 = arith.constant 3 : index
    %c0_138 = arith.constant 0 : index
    %c0_139 = arith.constant 0 : index
    %289 = vector.load %arg3[%c3_137, %c0_138, %c0_139] : memref<4x32x32xf32, #tpu.memory_space<vmem>>, vector<1x32x32xf32>
    %290 = vector.shape_cast %289 : vector<1x32x32xf32> to vector<32x32xf32>
    %cst_140 = arith.constant dense<0.000000e+00> : vector<2x32xf32>
    %291 = tpu.matmul %231, %290, %cst_140 {dimension_numbers = #tpu.dot_dimension_numbers<[1], [0], [0], [1], [0, 0, 1, 1], [], []>} : vector<2x32xf32>, vector<32x32xf32>, vector<2x32xf32> -> vector<2x32xf32>
    %292 = arith.addf %276, %291 : vector<2x32xf32>
    %293 = arith.negf %284 : vector<2x32xf32>
    %294 = math.exp %293 : vector<2x32xf32>
    %cst_141 = arith.constant 1.000000e+00 : f32
    %295 = vector.broadcast %cst_141 : f32 to vector<2x32xf32>
    %296 = arith.addf %295, %294 : vector<2x32xf32>
    %297 = arith.divf %295, %296 : vector<2x32xf32>
    %298 = arith.mulf %297, %224 : vector<2x32xf32>
    %299 = arith.negf %280 : vector<2x32xf32>
    %300 = math.exp %299 : vector<2x32xf32>
    %cst_142 = arith.constant 1.000000e+00 : f32
    %301 = vector.broadcast %cst_142 : f32 to vector<2x32xf32>
    %302 = arith.addf %301, %300 : vector<2x32xf32>
    %303 = arith.divf %301, %302 : vector<2x32xf32>
    %304 = math.tanh %288 : vector<2x32xf32>
    %305 = arith.mulf %303, %304 : vector<2x32xf32>
    %306 = arith.addf %298, %305 : vector<2x32xf32>
    %307 = arith.negf %292 : vector<2x32xf32>
    %308 = math.exp %307 : vector<2x32xf32>
    %cst_143 = arith.constant 1.000000e+00 : f32
    %309 = vector.broadcast %cst_143 : f32 to vector<2x32xf32>
    %310 = arith.addf %309, %308 : vector<2x32xf32>
    %311 = arith.divf %309, %310 : vector<2x32xf32>
    %312 = math.tanh %306 : vector<2x32xf32>
    %313 = arith.mulf %311, %312 : vector<2x32xf32>
    %314 = vector.extract_strided_slice %22 {offsets = [8, 0], sizes = [2, 32], strides = [1, 1]} : vector<16x32xf32> to vector<2x32xf32>
    %315 = vector.extract_strided_slice %23 {offsets = [8, 0], sizes = [2, 32], strides = [1, 1]} : vector<16x32xf32> to vector<2x32xf32>
    %316 = vector.extract_strided_slice %24 {offsets = [8, 0], sizes = [2, 32], strides = [1, 1]} : vector<16x32xf32> to vector<2x32xf32>
    %317 = vector.extract_strided_slice %25 {offsets = [8, 0], sizes = [2, 32], strides = [1, 1]} : vector<16x32xf32> to vector<2x32xf32>
    %c0_144 = arith.constant 0 : index
    %c0_145 = arith.constant 0 : index
    %c0_146 = arith.constant 0 : index
    %318 = vector.load %arg6[%c0_144, %c0_145, %c0_146] : memref<4x32x32xf32, #tpu.memory_space<vmem>>, vector<1x32x32xf32>
    %319 = vector.shape_cast %318 : vector<1x32x32xf32> to vector<32x32xf32>
    %cst_147 = arith.constant dense<0.000000e+00> : vector<2x32xf32>
    %320 = tpu.matmul %272, %319, %cst_147 {dimension_numbers = #tpu.dot_dimension_numbers<[1], [0], [0], [1], [0, 0, 1, 1], [], []>} : vector<2x32xf32>, vector<32x32xf32>, vector<2x32xf32> -> vector<2x32xf32>
    %321 = arith.addf %314, %320 : vector<2x32xf32>
    %c1_148 = arith.constant 1 : index
    %c0_149 = arith.constant 0 : index
    %c0_150 = arith.constant 0 : index
    %322 = vector.load %arg6[%c1_148, %c0_149, %c0_150] : memref<4x32x32xf32, #tpu.memory_space<vmem>>, vector<1x32x32xf32>
    %323 = vector.shape_cast %322 : vector<1x32x32xf32> to vector<32x32xf32>
    %cst_151 = arith.constant dense<0.000000e+00> : vector<2x32xf32>
    %324 = tpu.matmul %272, %323, %cst_151 {dimension_numbers = #tpu.dot_dimension_numbers<[1], [0], [0], [1], [0, 0, 1, 1], [], []>} : vector<2x32xf32>, vector<32x32xf32>, vector<2x32xf32> -> vector<2x32xf32>
    %325 = arith.addf %315, %324 : vector<2x32xf32>
    %c2_152 = arith.constant 2 : index
    %c0_153 = arith.constant 0 : index
    %c0_154 = arith.constant 0 : index
    %326 = vector.load %arg6[%c2_152, %c0_153, %c0_154] : memref<4x32x32xf32, #tpu.memory_space<vmem>>, vector<1x32x32xf32>
    %327 = vector.shape_cast %326 : vector<1x32x32xf32> to vector<32x32xf32>
    %cst_155 = arith.constant dense<0.000000e+00> : vector<2x32xf32>
    %328 = tpu.matmul %272, %327, %cst_155 {dimension_numbers = #tpu.dot_dimension_numbers<[1], [0], [0], [1], [0, 0, 1, 1], [], []>} : vector<2x32xf32>, vector<32x32xf32>, vector<2x32xf32> -> vector<2x32xf32>
    %329 = arith.addf %316, %328 : vector<2x32xf32>
    %c3_156 = arith.constant 3 : index
    %c0_157 = arith.constant 0 : index
    %c0_158 = arith.constant 0 : index
    %330 = vector.load %arg6[%c3_156, %c0_157, %c0_158] : memref<4x32x32xf32, #tpu.memory_space<vmem>>, vector<1x32x32xf32>
    %331 = vector.shape_cast %330 : vector<1x32x32xf32> to vector<32x32xf32>
    %cst_159 = arith.constant dense<0.000000e+00> : vector<2x32xf32>
    %332 = tpu.matmul %272, %331, %cst_159 {dimension_numbers = #tpu.dot_dimension_numbers<[1], [0], [0], [1], [0, 0, 1, 1], [], []>} : vector<2x32xf32>, vector<32x32xf32>, vector<2x32xf32> -> vector<2x32xf32>
    %333 = arith.addf %317, %332 : vector<2x32xf32>
    %334 = arith.negf %325 : vector<2x32xf32>
    %335 = math.exp %334 : vector<2x32xf32>
    %cst_160 = arith.constant 1.000000e+00 : f32
    %336 = vector.broadcast %cst_160 : f32 to vector<2x32xf32>
    %337 = arith.addf %336, %335 : vector<2x32xf32>
    %338 = arith.divf %336, %337 : vector<2x32xf32>
    %339 = arith.mulf %338, %265 : vector<2x32xf32>
    %340 = arith.negf %321 : vector<2x32xf32>
    %341 = math.exp %340 : vector<2x32xf32>
    %cst_161 = arith.constant 1.000000e+00 : f32
    %342 = vector.broadcast %cst_161 : f32 to vector<2x32xf32>
    %343 = arith.addf %342, %341 : vector<2x32xf32>
    %344 = arith.divf %342, %343 : vector<2x32xf32>
    %345 = math.tanh %329 : vector<2x32xf32>
    %346 = arith.mulf %344, %345 : vector<2x32xf32>
    %347 = arith.addf %339, %346 : vector<2x32xf32>
    %348 = arith.negf %333 : vector<2x32xf32>
    %349 = math.exp %348 : vector<2x32xf32>
    %cst_162 = arith.constant 1.000000e+00 : f32
    %350 = vector.broadcast %cst_162 : f32 to vector<2x32xf32>
    %351 = arith.addf %350, %349 : vector<2x32xf32>
    %352 = arith.divf %350, %351 : vector<2x32xf32>
    %353 = math.tanh %347 : vector<2x32xf32>
    %354 = arith.mulf %352, %353 : vector<2x32xf32>
    %355 = vector.extract_strided_slice %18 {offsets = [8, 0], sizes = [2, 32], strides = [1, 1]} : vector<16x32xf32> to vector<2x32xf32>
    %356 = vector.extract_strided_slice %19 {offsets = [8, 0], sizes = [2, 32], strides = [1, 1]} : vector<16x32xf32> to vector<2x32xf32>
    %357 = vector.extract_strided_slice %20 {offsets = [8, 0], sizes = [2, 32], strides = [1, 1]} : vector<16x32xf32> to vector<2x32xf32>
    %358 = vector.extract_strided_slice %21 {offsets = [8, 0], sizes = [2, 32], strides = [1, 1]} : vector<16x32xf32> to vector<2x32xf32>
    %c0_163 = arith.constant 0 : index
    %c0_164 = arith.constant 0 : index
    %c0_165 = arith.constant 0 : index
    %359 = vector.load %arg3[%c0_163, %c0_164, %c0_165] : memref<4x32x32xf32, #tpu.memory_space<vmem>>, vector<1x32x32xf32>
    %360 = vector.shape_cast %359 : vector<1x32x32xf32> to vector<32x32xf32>
    %cst_166 = arith.constant dense<0.000000e+00> : vector<2x32xf32>
    %361 = tpu.matmul %313, %360, %cst_166 {dimension_numbers = #tpu.dot_dimension_numbers<[1], [0], [0], [1], [0, 0, 1, 1], [], []>} : vector<2x32xf32>, vector<32x32xf32>, vector<2x32xf32> -> vector<2x32xf32>
    %362 = arith.addf %355, %361 : vector<2x32xf32>
    %c1_167 = arith.constant 1 : index
    %c0_168 = arith.constant 0 : index
    %c0_169 = arith.constant 0 : index
    %363 = vector.load %arg3[%c1_167, %c0_168, %c0_169] : memref<4x32x32xf32, #tpu.memory_space<vmem>>, vector<1x32x32xf32>
    %364 = vector.shape_cast %363 : vector<1x32x32xf32> to vector<32x32xf32>
    %cst_170 = arith.constant dense<0.000000e+00> : vector<2x32xf32>
    %365 = tpu.matmul %313, %364, %cst_170 {dimension_numbers = #tpu.dot_dimension_numbers<[1], [0], [0], [1], [0, 0, 1, 1], [], []>} : vector<2x32xf32>, vector<32x32xf32>, vector<2x32xf32> -> vector<2x32xf32>
    %366 = arith.addf %356, %365 : vector<2x32xf32>
    %c2_171 = arith.constant 2 : index
    %c0_172 = arith.constant 0 : index
    %c0_173 = arith.constant 0 : index
    %367 = vector.load %arg3[%c2_171, %c0_172, %c0_173] : memref<4x32x32xf32, #tpu.memory_space<vmem>>, vector<1x32x32xf32>
    %368 = vector.shape_cast %367 : vector<1x32x32xf32> to vector<32x32xf32>
    %cst_174 = arith.constant dense<0.000000e+00> : vector<2x32xf32>
    %369 = tpu.matmul %313, %368, %cst_174 {dimension_numbers = #tpu.dot_dimension_numbers<[1], [0], [0], [1], [0, 0, 1, 1], [], []>} : vector<2x32xf32>, vector<32x32xf32>, vector<2x32xf32> -> vector<2x32xf32>
    %370 = arith.addf %357, %369 : vector<2x32xf32>
    %c3_175 = arith.constant 3 : index
    %c0_176 = arith.constant 0 : index
    %c0_177 = arith.constant 0 : index
    %371 = vector.load %arg3[%c3_175, %c0_176, %c0_177] : memref<4x32x32xf32, #tpu.memory_space<vmem>>, vector<1x32x32xf32>
    %372 = vector.shape_cast %371 : vector<1x32x32xf32> to vector<32x32xf32>
    %cst_178 = arith.constant dense<0.000000e+00> : vector<2x32xf32>
    %373 = tpu.matmul %313, %372, %cst_178 {dimension_numbers = #tpu.dot_dimension_numbers<[1], [0], [0], [1], [0, 0, 1, 1], [], []>} : vector<2x32xf32>, vector<32x32xf32>, vector<2x32xf32> -> vector<2x32xf32>
    %374 = arith.addf %358, %373 : vector<2x32xf32>
    %375 = arith.negf %366 : vector<2x32xf32>
    %376 = math.exp %375 : vector<2x32xf32>
    %cst_179 = arith.constant 1.000000e+00 : f32
    %377 = vector.broadcast %cst_179 : f32 to vector<2x32xf32>
    %378 = arith.addf %377, %376 : vector<2x32xf32>
    %379 = arith.divf %377, %378 : vector<2x32xf32>
    %380 = arith.mulf %379, %306 : vector<2x32xf32>
    %381 = arith.negf %362 : vector<2x32xf32>
    %382 = math.exp %381 : vector<2x32xf32>
    %cst_180 = arith.constant 1.000000e+00 : f32
    %383 = vector.broadcast %cst_180 : f32 to vector<2x32xf32>
    %384 = arith.addf %383, %382 : vector<2x32xf32>
    %385 = arith.divf %383, %384 : vector<2x32xf32>
    %386 = math.tanh %370 : vector<2x32xf32>
    %387 = arith.mulf %385, %386 : vector<2x32xf32>
    %388 = arith.addf %380, %387 : vector<2x32xf32>
    %389 = arith.negf %374 : vector<2x32xf32>
    %390 = math.exp %389 : vector<2x32xf32>
    %cst_181 = arith.constant 1.000000e+00 : f32
    %391 = vector.broadcast %cst_181 : f32 to vector<2x32xf32>
    %392 = arith.addf %391, %390 : vector<2x32xf32>
    %393 = arith.divf %391, %392 : vector<2x32xf32>
    %394 = math.tanh %388 : vector<2x32xf32>
    %395 = arith.mulf %393, %394 : vector<2x32xf32>
    %396 = vector.extract_strided_slice %22 {offsets = [6, 0], sizes = [2, 32], strides = [1, 1]} : vector<16x32xf32> to vector<2x32xf32>
    %397 = vector.extract_strided_slice %23 {offsets = [6, 0], sizes = [2, 32], strides = [1, 1]} : vector<16x32xf32> to vector<2x32xf32>
    %398 = vector.extract_strided_slice %24 {offsets = [6, 0], sizes = [2, 32], strides = [1, 1]} : vector<16x32xf32> to vector<2x32xf32>
    %399 = vector.extract_strided_slice %25 {offsets = [6, 0], sizes = [2, 32], strides = [1, 1]} : vector<16x32xf32> to vector<2x32xf32>
    %c0_182 = arith.constant 0 : index
    %c0_183 = arith.constant 0 : index
    %c0_184 = arith.constant 0 : index
    %400 = vector.load %arg6[%c0_182, %c0_183, %c0_184] : memref<4x32x32xf32, #tpu.memory_space<vmem>>, vector<1x32x32xf32>
    %401 = vector.shape_cast %400 : vector<1x32x32xf32> to vector<32x32xf32>
    %cst_185 = arith.constant dense<0.000000e+00> : vector<2x32xf32>
    %402 = tpu.matmul %354, %401, %cst_185 {dimension_numbers = #tpu.dot_dimension_numbers<[1], [0], [0], [1], [0, 0, 1, 1], [], []>} : vector<2x32xf32>, vector<32x32xf32>, vector<2x32xf32> -> vector<2x32xf32>
    %403 = arith.addf %396, %402 : vector<2x32xf32>
    %c1_186 = arith.constant 1 : index
    %c0_187 = arith.constant 0 : index
    %c0_188 = arith.constant 0 : index
    %404 = vector.load %arg6[%c1_186, %c0_187, %c0_188] : memref<4x32x32xf32, #tpu.memory_space<vmem>>, vector<1x32x32xf32>
    %405 = vector.shape_cast %404 : vector<1x32x32xf32> to vector<32x32xf32>
    %cst_189 = arith.constant dense<0.000000e+00> : vector<2x32xf32>
    %406 = tpu.matmul %354, %405, %cst_189 {dimension_numbers = #tpu.dot_dimension_numbers<[1], [0], [0], [1], [0, 0, 1, 1], [], []>} : vector<2x32xf32>, vector<32x32xf32>, vector<2x32xf32> -> vector<2x32xf32>
    %407 = arith.addf %397, %406 : vector<2x32xf32>
    %c2_190 = arith.constant 2 : index
    %c0_191 = arith.constant 0 : index
    %c0_192 = arith.constant 0 : index
    %408 = vector.load %arg6[%c2_190, %c0_191, %c0_192] : memref<4x32x32xf32, #tpu.memory_space<vmem>>, vector<1x32x32xf32>
    %409 = vector.shape_cast %408 : vector<1x32x32xf32> to vector<32x32xf32>
    %cst_193 = arith.constant dense<0.000000e+00> : vector<2x32xf32>
    %410 = tpu.matmul %354, %409, %cst_193 {dimension_numbers = #tpu.dot_dimension_numbers<[1], [0], [0], [1], [0, 0, 1, 1], [], []>} : vector<2x32xf32>, vector<32x32xf32>, vector<2x32xf32> -> vector<2x32xf32>
    %411 = arith.addf %398, %410 : vector<2x32xf32>
    %c3_194 = arith.constant 3 : index
    %c0_195 = arith.constant 0 : index
    %c0_196 = arith.constant 0 : index
    %412 = vector.load %arg6[%c3_194, %c0_195, %c0_196] : memref<4x32x32xf32, #tpu.memory_space<vmem>>, vector<1x32x32xf32>
    %413 = vector.shape_cast %412 : vector<1x32x32xf32> to vector<32x32xf32>
    %cst_197 = arith.constant dense<0.000000e+00> : vector<2x32xf32>
    %414 = tpu.matmul %354, %413, %cst_197 {dimension_numbers = #tpu.dot_dimension_numbers<[1], [0], [0], [1], [0, 0, 1, 1], [], []>} : vector<2x32xf32>, vector<32x32xf32>, vector<2x32xf32> -> vector<2x32xf32>
    %415 = arith.addf %399, %414 : vector<2x32xf32>
    %416 = arith.negf %407 : vector<2x32xf32>
    %417 = math.exp %416 : vector<2x32xf32>
    %cst_198 = arith.constant 1.000000e+00 : f32
    %418 = vector.broadcast %cst_198 : f32 to vector<2x32xf32>
    %419 = arith.addf %418, %417 : vector<2x32xf32>
    %420 = arith.divf %418, %419 : vector<2x32xf32>
    %421 = arith.mulf %420, %347 : vector<2x32xf32>
    %422 = arith.negf %403 : vector<2x32xf32>
    %423 = math.exp %422 : vector<2x32xf32>
    %cst_199 = arith.constant 1.000000e+00 : f32
    %424 = vector.broadcast %cst_199 : f32 to vector<2x32xf32>
    %425 = arith.addf %424, %423 : vector<2x32xf32>
    %426 = arith.divf %424, %425 : vector<2x32xf32>
    %427 = math.tanh %411 : vector<2x32xf32>
    %428 = arith.mulf %426, %427 : vector<2x32xf32>
    %429 = arith.addf %421, %428 : vector<2x32xf32>
    %430 = arith.negf %415 : vector<2x32xf32>
    %431 = math.exp %430 : vector<2x32xf32>
    %cst_200 = arith.constant 1.000000e+00 : f32
    %432 = vector.broadcast %cst_200 : f32 to vector<2x32xf32>
    %433 = arith.addf %432, %431 : vector<2x32xf32>
    %434 = arith.divf %432, %433 : vector<2x32xf32>
    %435 = math.tanh %429 : vector<2x32xf32>
    %436 = arith.mulf %434, %435 : vector<2x32xf32>
    %437 = vector.extract_strided_slice %18 {offsets = [10, 0], sizes = [2, 32], strides = [1, 1]} : vector<16x32xf32> to vector<2x32xf32>
    %438 = vector.extract_strided_slice %19 {offsets = [10, 0], sizes = [2, 32], strides = [1, 1]} : vector<16x32xf32> to vector<2x32xf32>
    %439 = vector.extract_strided_slice %20 {offsets = [10, 0], sizes = [2, 32], strides = [1, 1]} : vector<16x32xf32> to vector<2x32xf32>
    %440 = vector.extract_strided_slice %21 {offsets = [10, 0], sizes = [2, 32], strides = [1, 1]} : vector<16x32xf32> to vector<2x32xf32>
    %c0_201 = arith.constant 0 : index
    %c0_202 = arith.constant 0 : index
    %c0_203 = arith.constant 0 : index
    %441 = vector.load %arg3[%c0_201, %c0_202, %c0_203] : memref<4x32x32xf32, #tpu.memory_space<vmem>>, vector<1x32x32xf32>
    %442 = vector.shape_cast %441 : vector<1x32x32xf32> to vector<32x32xf32>
    %cst_204 = arith.constant dense<0.000000e+00> : vector<2x32xf32>
    %443 = tpu.matmul %395, %442, %cst_204 {dimension_numbers = #tpu.dot_dimension_numbers<[1], [0], [0], [1], [0, 0, 1, 1], [], []>} : vector<2x32xf32>, vector<32x32xf32>, vector<2x32xf32> -> vector<2x32xf32>
    %444 = arith.addf %437, %443 : vector<2x32xf32>
    %c1_205 = arith.constant 1 : index
    %c0_206 = arith.constant 0 : index
    %c0_207 = arith.constant 0 : index
    %445 = vector.load %arg3[%c1_205, %c0_206, %c0_207] : memref<4x32x32xf32, #tpu.memory_space<vmem>>, vector<1x32x32xf32>
    %446 = vector.shape_cast %445 : vector<1x32x32xf32> to vector<32x32xf32>
    %cst_208 = arith.constant dense<0.000000e+00> : vector<2x32xf32>
    %447 = tpu.matmul %395, %446, %cst_208 {dimension_numbers = #tpu.dot_dimension_numbers<[1], [0], [0], [1], [0, 0, 1, 1], [], []>} : vector<2x32xf32>, vector<32x32xf32>, vector<2x32xf32> -> vector<2x32xf32>
    %448 = arith.addf %438, %447 : vector<2x32xf32>
    %c2_209 = arith.constant 2 : index
    %c0_210 = arith.constant 0 : index
    %c0_211 = arith.constant 0 : index
    %449 = vector.load %arg3[%c2_209, %c0_210, %c0_211] : memref<4x32x32xf32, #tpu.memory_space<vmem>>, vector<1x32x32xf32>
    %450 = vector.shape_cast %449 : vector<1x32x32xf32> to vector<32x32xf32>
    %cst_212 = arith.constant dense<0.000000e+00> : vector<2x32xf32>
    %451 = tpu.matmul %395, %450, %cst_212 {dimension_numbers = #tpu.dot_dimension_numbers<[1], [0], [0], [1], [0, 0, 1, 1], [], []>} : vector<2x32xf32>, vector<32x32xf32>, vector<2x32xf32> -> vector<2x32xf32>
    %452 = arith.addf %439, %451 : vector<2x32xf32>
    %c3_213 = arith.constant 3 : index
    %c0_214 = arith.constant 0 : index
    %c0_215 = arith.constant 0 : index
    %453 = vector.load %arg3[%c3_213, %c0_214, %c0_215] : memref<4x32x32xf32, #tpu.memory_space<vmem>>, vector<1x32x32xf32>
    %454 = vector.shape_cast %453 : vector<1x32x32xf32> to vector<32x32xf32>
    %cst_216 = arith.constant dense<0.000000e+00> : vector<2x32xf32>
    %455 = tpu.matmul %395, %454, %cst_216 {dimension_numbers = #tpu.dot_dimension_numbers<[1], [0], [0], [1], [0, 0, 1, 1], [], []>} : vector<2x32xf32>, vector<32x32xf32>, vector<2x32xf32> -> vector<2x32xf32>
    %456 = arith.addf %440, %455 : vector<2x32xf32>
    %457 = arith.negf %448 : vector<2x32xf32>
    %458 = math.exp %457 : vector<2x32xf32>
    %cst_217 = arith.constant 1.000000e+00 : f32
    %459 = vector.broadcast %cst_217 : f32 to vector<2x32xf32>
    %460 = arith.addf %459, %458 : vector<2x32xf32>
    %461 = arith.divf %459, %460 : vector<2x32xf32>
    %462 = arith.mulf %461, %388 : vector<2x32xf32>
    %463 = arith.negf %444 : vector<2x32xf32>
    %464 = math.exp %463 : vector<2x32xf32>
    %cst_218 = arith.constant 1.000000e+00 : f32
    %465 = vector.broadcast %cst_218 : f32 to vector<2x32xf32>
    %466 = arith.addf %465, %464 : vector<2x32xf32>
    %467 = arith.divf %465, %466 : vector<2x32xf32>
    %468 = math.tanh %452 : vector<2x32xf32>
    %469 = arith.mulf %467, %468 : vector<2x32xf32>
    %470 = arith.addf %462, %469 : vector<2x32xf32>
    %471 = arith.negf %456 : vector<2x32xf32>
    %472 = math.exp %471 : vector<2x32xf32>
    %cst_219 = arith.constant 1.000000e+00 : f32
    %473 = vector.broadcast %cst_219 : f32 to vector<2x32xf32>
    %474 = arith.addf %473, %472 : vector<2x32xf32>
    %475 = arith.divf %473, %474 : vector<2x32xf32>
    %476 = math.tanh %470 : vector<2x32xf32>
    %477 = arith.mulf %475, %476 : vector<2x32xf32>
    %478 = vector.extract_strided_slice %22 {offsets = [4, 0], sizes = [2, 32], strides = [1, 1]} : vector<16x32xf32> to vector<2x32xf32>
    %479 = vector.extract_strided_slice %23 {offsets = [4, 0], sizes = [2, 32], strides = [1, 1]} : vector<16x32xf32> to vector<2x32xf32>
    %480 = vector.extract_strided_slice %24 {offsets = [4, 0], sizes = [2, 32], strides = [1, 1]} : vector<16x32xf32> to vector<2x32xf32>
    %481 = vector.extract_strided_slice %25 {offsets = [4, 0], sizes = [2, 32], strides = [1, 1]} : vector<16x32xf32> to vector<2x32xf32>
    %c0_220 = arith.constant 0 : index
    %c0_221 = arith.constant 0 : index
    %c0_222 = arith.constant 0 : index
    %482 = vector.load %arg6[%c0_220, %c0_221, %c0_222] : memref<4x32x32xf32, #tpu.memory_space<vmem>>, vector<1x32x32xf32>
    %483 = vector.shape_cast %482 : vector<1x32x32xf32> to vector<32x32xf32>
    %cst_223 = arith.constant dense<0.000000e+00> : vector<2x32xf32>
    %484 = tpu.matmul %436, %483, %cst_223 {dimension_numbers = #tpu.dot_dimension_numbers<[1], [0], [0], [1], [0, 0, 1, 1], [], []>} : vector<2x32xf32>, vector<32x32xf32>, vector<2x32xf32> -> vector<2x32xf32>
    %485 = arith.addf %478, %484 : vector<2x32xf32>
    %c1_224 = arith.constant 1 : index
    %c0_225 = arith.constant 0 : index
    %c0_226 = arith.constant 0 : index
    %486 = vector.load %arg6[%c1_224, %c0_225, %c0_226] : memref<4x32x32xf32, #tpu.memory_space<vmem>>, vector<1x32x32xf32>
    %487 = vector.shape_cast %486 : vector<1x32x32xf32> to vector<32x32xf32>
    %cst_227 = arith.constant dense<0.000000e+00> : vector<2x32xf32>
    %488 = tpu.matmul %436, %487, %cst_227 {dimension_numbers = #tpu.dot_dimension_numbers<[1], [0], [0], [1], [0, 0, 1, 1], [], []>} : vector<2x32xf32>, vector<32x32xf32>, vector<2x32xf32> -> vector<2x32xf32>
    %489 = arith.addf %479, %488 : vector<2x32xf32>
    %c2_228 = arith.constant 2 : index
    %c0_229 = arith.constant 0 : index
    %c0_230 = arith.constant 0 : index
    %490 = vector.load %arg6[%c2_228, %c0_229, %c0_230] : memref<4x32x32xf32, #tpu.memory_space<vmem>>, vector<1x32x32xf32>
    %491 = vector.shape_cast %490 : vector<1x32x32xf32> to vector<32x32xf32>
    %cst_231 = arith.constant dense<0.000000e+00> : vector<2x32xf32>
    %492 = tpu.matmul %436, %491, %cst_231 {dimension_numbers = #tpu.dot_dimension_numbers<[1], [0], [0], [1], [0, 0, 1, 1], [], []>} : vector<2x32xf32>, vector<32x32xf32>, vector<2x32xf32> -> vector<2x32xf32>
    %493 = arith.addf %480, %492 : vector<2x32xf32>
    %c3_232 = arith.constant 3 : index
    %c0_233 = arith.constant 0 : index
    %c0_234 = arith.constant 0 : index
    %494 = vector.load %arg6[%c3_232, %c0_233, %c0_234] : memref<4x32x32xf32, #tpu.memory_space<vmem>>, vector<1x32x32xf32>
    %495 = vector.shape_cast %494 : vector<1x32x32xf32> to vector<32x32xf32>
    %cst_235 = arith.constant dense<0.000000e+00> : vector<2x32xf32>
    %496 = tpu.matmul %436, %495, %cst_235 {dimension_numbers = #tpu.dot_dimension_numbers<[1], [0], [0], [1], [0, 0, 1, 1], [], []>} : vector<2x32xf32>, vector<32x32xf32>, vector<2x32xf32> -> vector<2x32xf32>
    %497 = arith.addf %481, %496 : vector<2x32xf32>
    %498 = arith.negf %489 : vector<2x32xf32>
    %499 = math.exp %498 : vector<2x32xf32>
    %cst_236 = arith.constant 1.000000e+00 : f32
    %500 = vector.broadcast %cst_236 : f32 to vector<2x32xf32>
    %501 = arith.addf %500, %499 : vector<2x32xf32>
    %502 = arith.divf %500, %501 : vector<2x32xf32>
    %503 = arith.mulf %502, %429 : vector<2x32xf32>
    %504 = arith.negf %485 : vector<2x32xf32>
    %505 = math.exp %504 : vector<2x32xf32>
    %cst_237 = arith.constant 1.000000e+00 : f32
    %506 = vector.broadcast %cst_237 : f32 to vector<2x32xf32>
    %507 = arith.addf %506, %505 : vector<2x32xf32>
    %508 = arith.divf %506, %507 : vector<2x32xf32>
    %509 = math.tanh %493 : vector<2x32xf32>
    %510 = arith.mulf %508, %509 : vector<2x32xf32>
    %511 = arith.addf %503, %510 : vector<2x32xf32>
    %512 = arith.negf %497 : vector<2x32xf32>
    %513 = math.exp %512 : vector<2x32xf32>
    %cst_238 = arith.constant 1.000000e+00 : f32
    %514 = vector.broadcast %cst_238 : f32 to vector<2x32xf32>
    %515 = arith.addf %514, %513 : vector<2x32xf32>
    %516 = arith.divf %514, %515 : vector<2x32xf32>
    %517 = math.tanh %511 : vector<2x32xf32>
    %518 = arith.mulf %516, %517 : vector<2x32xf32>
    %519 = vector.extract_strided_slice %18 {offsets = [12, 0], sizes = [2, 32], strides = [1, 1]} : vector<16x32xf32> to vector<2x32xf32>
    %520 = vector.extract_strided_slice %19 {offsets = [12, 0], sizes = [2, 32], strides = [1, 1]} : vector<16x32xf32> to vector<2x32xf32>
    %521 = vector.extract_strided_slice %20 {offsets = [12, 0], sizes = [2, 32], strides = [1, 1]} : vector<16x32xf32> to vector<2x32xf32>
    %522 = vector.extract_strided_slice %21 {offsets = [12, 0], sizes = [2, 32], strides = [1, 1]} : vector<16x32xf32> to vector<2x32xf32>
    %c0_239 = arith.constant 0 : index
    %c0_240 = arith.constant 0 : index
    %c0_241 = arith.constant 0 : index
    %523 = vector.load %arg3[%c0_239, %c0_240, %c0_241] : memref<4x32x32xf32, #tpu.memory_space<vmem>>, vector<1x32x32xf32>
    %524 = vector.shape_cast %523 : vector<1x32x32xf32> to vector<32x32xf32>
    %cst_242 = arith.constant dense<0.000000e+00> : vector<2x32xf32>
    %525 = tpu.matmul %477, %524, %cst_242 {dimension_numbers = #tpu.dot_dimension_numbers<[1], [0], [0], [1], [0, 0, 1, 1], [], []>} : vector<2x32xf32>, vector<32x32xf32>, vector<2x32xf32> -> vector<2x32xf32>
    %526 = arith.addf %519, %525 : vector<2x32xf32>
    %c1_243 = arith.constant 1 : index
    %c0_244 = arith.constant 0 : index
    %c0_245 = arith.constant 0 : index
    %527 = vector.load %arg3[%c1_243, %c0_244, %c0_245] : memref<4x32x32xf32, #tpu.memory_space<vmem>>, vector<1x32x32xf32>
    %528 = vector.shape_cast %527 : vector<1x32x32xf32> to vector<32x32xf32>
    %cst_246 = arith.constant dense<0.000000e+00> : vector<2x32xf32>
    %529 = tpu.matmul %477, %528, %cst_246 {dimension_numbers = #tpu.dot_dimension_numbers<[1], [0], [0], [1], [0, 0, 1, 1], [], []>} : vector<2x32xf32>, vector<32x32xf32>, vector<2x32xf32> -> vector<2x32xf32>
    %530 = arith.addf %520, %529 : vector<2x32xf32>
    %c2_247 = arith.constant 2 : index
    %c0_248 = arith.constant 0 : index
    %c0_249 = arith.constant 0 : index
    %531 = vector.load %arg3[%c2_247, %c0_248, %c0_249] : memref<4x32x32xf32, #tpu.memory_space<vmem>>, vector<1x32x32xf32>
    %532 = vector.shape_cast %531 : vector<1x32x32xf32> to vector<32x32xf32>
    %cst_250 = arith.constant dense<0.000000e+00> : vector<2x32xf32>
    %533 = tpu.matmul %477, %532, %cst_250 {dimension_numbers = #tpu.dot_dimension_numbers<[1], [0], [0], [1], [0, 0, 1, 1], [], []>} : vector<2x32xf32>, vector<32x32xf32>, vector<2x32xf32> -> vector<2x32xf32>
    %534 = arith.addf %521, %533 : vector<2x32xf32>
    %c3_251 = arith.constant 3 : index
    %c0_252 = arith.constant 0 : index
    %c0_253 = arith.constant 0 : index
    %535 = vector.load %arg3[%c3_251, %c0_252, %c0_253] : memref<4x32x32xf32, #tpu.memory_space<vmem>>, vector<1x32x32xf32>
    %536 = vector.shape_cast %535 : vector<1x32x32xf32> to vector<32x32xf32>
    %cst_254 = arith.constant dense<0.000000e+00> : vector<2x32xf32>
    %537 = tpu.matmul %477, %536, %cst_254 {dimension_numbers = #tpu.dot_dimension_numbers<[1], [0], [0], [1], [0, 0, 1, 1], [], []>} : vector<2x32xf32>, vector<32x32xf32>, vector<2x32xf32> -> vector<2x32xf32>
    %538 = arith.addf %522, %537 : vector<2x32xf32>
    %539 = arith.negf %530 : vector<2x32xf32>
    %540 = math.exp %539 : vector<2x32xf32>
    %cst_255 = arith.constant 1.000000e+00 : f32
    %541 = vector.broadcast %cst_255 : f32 to vector<2x32xf32>
    %542 = arith.addf %541, %540 : vector<2x32xf32>
    %543 = arith.divf %541, %542 : vector<2x32xf32>
    %544 = arith.mulf %543, %470 : vector<2x32xf32>
    %545 = arith.negf %526 : vector<2x32xf32>
    %546 = math.exp %545 : vector<2x32xf32>
    %cst_256 = arith.constant 1.000000e+00 : f32
    %547 = vector.broadcast %cst_256 : f32 to vector<2x32xf32>
    %548 = arith.addf %547, %546 : vector<2x32xf32>
    %549 = arith.divf %547, %548 : vector<2x32xf32>
    %550 = math.tanh %534 : vector<2x32xf32>
    %551 = arith.mulf %549, %550 : vector<2x32xf32>
    %552 = arith.addf %544, %551 : vector<2x32xf32>
    %553 = arith.negf %538 : vector<2x32xf32>
    %554 = math.exp %553 : vector<2x32xf32>
    %cst_257 = arith.constant 1.000000e+00 : f32
    %555 = vector.broadcast %cst_257 : f32 to vector<2x32xf32>
    %556 = arith.addf %555, %554 : vector<2x32xf32>
    %557 = arith.divf %555, %556 : vector<2x32xf32>
    %558 = math.tanh %552 : vector<2x32xf32>
    %559 = arith.mulf %557, %558 : vector<2x32xf32>
    %560 = vector.extract_strided_slice %22 {offsets = [2, 0], sizes = [2, 32], strides = [1, 1]} : vector<16x32xf32> to vector<2x32xf32>
    %561 = vector.extract_strided_slice %23 {offsets = [2, 0], sizes = [2, 32], strides = [1, 1]} : vector<16x32xf32> to vector<2x32xf32>
    %562 = vector.extract_strided_slice %24 {offsets = [2, 0], sizes = [2, 32], strides = [1, 1]} : vector<16x32xf32> to vector<2x32xf32>
    %563 = vector.extract_strided_slice %25 {offsets = [2, 0], sizes = [2, 32], strides = [1, 1]} : vector<16x32xf32> to vector<2x32xf32>
    %c0_258 = arith.constant 0 : index
    %c0_259 = arith.constant 0 : index
    %c0_260 = arith.constant 0 : index
    %564 = vector.load %arg6[%c0_258, %c0_259, %c0_260] : memref<4x32x32xf32, #tpu.memory_space<vmem>>, vector<1x32x32xf32>
    %565 = vector.shape_cast %564 : vector<1x32x32xf32> to vector<32x32xf32>
    %cst_261 = arith.constant dense<0.000000e+00> : vector<2x32xf32>
    %566 = tpu.matmul %518, %565, %cst_261 {dimension_numbers = #tpu.dot_dimension_numbers<[1], [0], [0], [1], [0, 0, 1, 1], [], []>} : vector<2x32xf32>, vector<32x32xf32>, vector<2x32xf32> -> vector<2x32xf32>
    %567 = arith.addf %560, %566 : vector<2x32xf32>
    %c1_262 = arith.constant 1 : index
    %c0_263 = arith.constant 0 : index
    %c0_264 = arith.constant 0 : index
    %568 = vector.load %arg6[%c1_262, %c0_263, %c0_264] : memref<4x32x32xf32, #tpu.memory_space<vmem>>, vector<1x32x32xf32>
    %569 = vector.shape_cast %568 : vector<1x32x32xf32> to vector<32x32xf32>
    %cst_265 = arith.constant dense<0.000000e+00> : vector<2x32xf32>
    %570 = tpu.matmul %518, %569, %cst_265 {dimension_numbers = #tpu.dot_dimension_numbers<[1], [0], [0], [1], [0, 0, 1, 1], [], []>} : vector<2x32xf32>, vector<32x32xf32>, vector<2x32xf32> -> vector<2x32xf32>
    %571 = arith.addf %561, %570 : vector<2x32xf32>
    %c2_266 = arith.constant 2 : index
    %c0_267 = arith.constant 0 : index
    %c0_268 = arith.constant 0 : index
    %572 = vector.load %arg6[%c2_266, %c0_267, %c0_268] : memref<4x32x32xf32, #tpu.memory_space<vmem>>, vector<1x32x32xf32>
    %573 = vector.shape_cast %572 : vector<1x32x32xf32> to vector<32x32xf32>
    %cst_269 = arith.constant dense<0.000000e+00> : vector<2x32xf32>
    %574 = tpu.matmul %518, %573, %cst_269 {dimension_numbers = #tpu.dot_dimension_numbers<[1], [0], [0], [1], [0, 0, 1, 1], [], []>} : vector<2x32xf32>, vector<32x32xf32>, vector<2x32xf32> -> vector<2x32xf32>
    %575 = arith.addf %562, %574 : vector<2x32xf32>
    %c3_270 = arith.constant 3 : index
    %c0_271 = arith.constant 0 : index
    %c0_272 = arith.constant 0 : index
    %576 = vector.load %arg6[%c3_270, %c0_271, %c0_272] : memref<4x32x32xf32, #tpu.memory_space<vmem>>, vector<1x32x32xf32>
    %577 = vector.shape_cast %576 : vector<1x32x32xf32> to vector<32x32xf32>
    %cst_273 = arith.constant dense<0.000000e+00> : vector<2x32xf32>
    %578 = tpu.matmul %518, %577, %cst_273 {dimension_numbers = #tpu.dot_dimension_numbers<[1], [0], [0], [1], [0, 0, 1, 1], [], []>} : vector<2x32xf32>, vector<32x32xf32>, vector<2x32xf32> -> vector<2x32xf32>
    %579 = arith.addf %563, %578 : vector<2x32xf32>
    %580 = arith.negf %571 : vector<2x32xf32>
    %581 = math.exp %580 : vector<2x32xf32>
    %cst_274 = arith.constant 1.000000e+00 : f32
    %582 = vector.broadcast %cst_274 : f32 to vector<2x32xf32>
    %583 = arith.addf %582, %581 : vector<2x32xf32>
    %584 = arith.divf %582, %583 : vector<2x32xf32>
    %585 = arith.mulf %584, %511 : vector<2x32xf32>
    %586 = arith.negf %567 : vector<2x32xf32>
    %587 = math.exp %586 : vector<2x32xf32>
    %cst_275 = arith.constant 1.000000e+00 : f32
    %588 = vector.broadcast %cst_275 : f32 to vector<2x32xf32>
    %589 = arith.addf %588, %587 : vector<2x32xf32>
    %590 = arith.divf %588, %589 : vector<2x32xf32>
    %591 = math.tanh %575 : vector<2x32xf32>
    %592 = arith.mulf %590, %591 : vector<2x32xf32>
    %593 = arith.addf %585, %592 : vector<2x32xf32>
    %594 = arith.negf %579 : vector<2x32xf32>
    %595 = math.exp %594 : vector<2x32xf32>
    %cst_276 = arith.constant 1.000000e+00 : f32
    %596 = vector.broadcast %cst_276 : f32 to vector<2x32xf32>
    %597 = arith.addf %596, %595 : vector<2x32xf32>
    %598 = arith.divf %596, %597 : vector<2x32xf32>
    %599 = math.tanh %593 : vector<2x32xf32>
    %600 = arith.mulf %598, %599 : vector<2x32xf32>
    %601 = vector.extract_strided_slice %18 {offsets = [14, 0], sizes = [2, 32], strides = [1, 1]} : vector<16x32xf32> to vector<2x32xf32>
    %602 = vector.extract_strided_slice %19 {offsets = [14, 0], sizes = [2, 32], strides = [1, 1]} : vector<16x32xf32> to vector<2x32xf32>
    %603 = vector.extract_strided_slice %20 {offsets = [14, 0], sizes = [2, 32], strides = [1, 1]} : vector<16x32xf32> to vector<2x32xf32>
    %604 = vector.extract_strided_slice %21 {offsets = [14, 0], sizes = [2, 32], strides = [1, 1]} : vector<16x32xf32> to vector<2x32xf32>
    %c0_277 = arith.constant 0 : index
    %c0_278 = arith.constant 0 : index
    %c0_279 = arith.constant 0 : index
    %605 = vector.load %arg3[%c0_277, %c0_278, %c0_279] : memref<4x32x32xf32, #tpu.memory_space<vmem>>, vector<1x32x32xf32>
    %606 = vector.shape_cast %605 : vector<1x32x32xf32> to vector<32x32xf32>
    %cst_280 = arith.constant dense<0.000000e+00> : vector<2x32xf32>
    %607 = tpu.matmul %559, %606, %cst_280 {dimension_numbers = #tpu.dot_dimension_numbers<[1], [0], [0], [1], [0, 0, 1, 1], [], []>} : vector<2x32xf32>, vector<32x32xf32>, vector<2x32xf32> -> vector<2x32xf32>
    %608 = arith.addf %601, %607 : vector<2x32xf32>
    %c1_281 = arith.constant 1 : index
    %c0_282 = arith.constant 0 : index
    %c0_283 = arith.constant 0 : index
    %609 = vector.load %arg3[%c1_281, %c0_282, %c0_283] : memref<4x32x32xf32, #tpu.memory_space<vmem>>, vector<1x32x32xf32>
    %610 = vector.shape_cast %609 : vector<1x32x32xf32> to vector<32x32xf32>
    %cst_284 = arith.constant dense<0.000000e+00> : vector<2x32xf32>
    %611 = tpu.matmul %559, %610, %cst_284 {dimension_numbers = #tpu.dot_dimension_numbers<[1], [0], [0], [1], [0, 0, 1, 1], [], []>} : vector<2x32xf32>, vector<32x32xf32>, vector<2x32xf32> -> vector<2x32xf32>
    %612 = arith.addf %602, %611 : vector<2x32xf32>
    %c2_285 = arith.constant 2 : index
    %c0_286 = arith.constant 0 : index
    %c0_287 = arith.constant 0 : index
    %613 = vector.load %arg3[%c2_285, %c0_286, %c0_287] : memref<4x32x32xf32, #tpu.memory_space<vmem>>, vector<1x32x32xf32>
    %614 = vector.shape_cast %613 : vector<1x32x32xf32> to vector<32x32xf32>
    %cst_288 = arith.constant dense<0.000000e+00> : vector<2x32xf32>
    %615 = tpu.matmul %559, %614, %cst_288 {dimension_numbers = #tpu.dot_dimension_numbers<[1], [0], [0], [1], [0, 0, 1, 1], [], []>} : vector<2x32xf32>, vector<32x32xf32>, vector<2x32xf32> -> vector<2x32xf32>
    %616 = arith.addf %603, %615 : vector<2x32xf32>
    %c3_289 = arith.constant 3 : index
    %c0_290 = arith.constant 0 : index
    %c0_291 = arith.constant 0 : index
    %617 = vector.load %arg3[%c3_289, %c0_290, %c0_291] : memref<4x32x32xf32, #tpu.memory_space<vmem>>, vector<1x32x32xf32>
    %618 = vector.shape_cast %617 : vector<1x32x32xf32> to vector<32x32xf32>
    %cst_292 = arith.constant dense<0.000000e+00> : vector<2x32xf32>
    %619 = tpu.matmul %559, %618, %cst_292 {dimension_numbers = #tpu.dot_dimension_numbers<[1], [0], [0], [1], [0, 0, 1, 1], [], []>} : vector<2x32xf32>, vector<32x32xf32>, vector<2x32xf32> -> vector<2x32xf32>
    %620 = arith.addf %604, %619 : vector<2x32xf32>
    %621 = arith.negf %612 : vector<2x32xf32>
    %622 = math.exp %621 : vector<2x32xf32>
    %cst_293 = arith.constant 1.000000e+00 : f32
    %623 = vector.broadcast %cst_293 : f32 to vector<2x32xf32>
    %624 = arith.addf %623, %622 : vector<2x32xf32>
    %625 = arith.divf %623, %624 : vector<2x32xf32>
    %626 = arith.mulf %625, %552 : vector<2x32xf32>
    %627 = arith.negf %608 : vector<2x32xf32>
    %628 = math.exp %627 : vector<2x32xf32>
    %cst_294 = arith.constant 1.000000e+00 : f32
    %629 = vector.broadcast %cst_294 : f32 to vector<2x32xf32>
    %630 = arith.addf %629, %628 : vector<2x32xf32>
    %631 = arith.divf %629, %630 : vector<2x32xf32>
    %632 = math.tanh %616 : vector<2x32xf32>
    %633 = arith.mulf %631, %632 : vector<2x32xf32>
    %634 = arith.addf %626, %633 : vector<2x32xf32>
    %635 = arith.negf %620 : vector<2x32xf32>
    %636 = math.exp %635 : vector<2x32xf32>
    %cst_295 = arith.constant 1.000000e+00 : f32
    %637 = vector.broadcast %cst_295 : f32 to vector<2x32xf32>
    %638 = arith.addf %637, %636 : vector<2x32xf32>
    %639 = arith.divf %637, %638 : vector<2x32xf32>
    %640 = math.tanh %634 : vector<2x32xf32>
    %641 = arith.mulf %639, %640 : vector<2x32xf32>
    %642 = vector.extract_strided_slice %22 {offsets = [0, 0], sizes = [2, 32], strides = [1, 1]} : vector<16x32xf32> to vector<2x32xf32>
    %643 = vector.extract_strided_slice %23 {offsets = [0, 0], sizes = [2, 32], strides = [1, 1]} : vector<16x32xf32> to vector<2x32xf32>
    %644 = vector.extract_strided_slice %24 {offsets = [0, 0], sizes = [2, 32], strides = [1, 1]} : vector<16x32xf32> to vector<2x32xf32>
    %645 = vector.extract_strided_slice %25 {offsets = [0, 0], sizes = [2, 32], strides = [1, 1]} : vector<16x32xf32> to vector<2x32xf32>
    %c0_296 = arith.constant 0 : index
    %c0_297 = arith.constant 0 : index
    %c0_298 = arith.constant 0 : index
    %646 = vector.load %arg6[%c0_296, %c0_297, %c0_298] : memref<4x32x32xf32, #tpu.memory_space<vmem>>, vector<1x32x32xf32>
    %647 = vector.shape_cast %646 : vector<1x32x32xf32> to vector<32x32xf32>
    %cst_299 = arith.constant dense<0.000000e+00> : vector<2x32xf32>
    %648 = tpu.matmul %600, %647, %cst_299 {dimension_numbers = #tpu.dot_dimension_numbers<[1], [0], [0], [1], [0, 0, 1, 1], [], []>} : vector<2x32xf32>, vector<32x32xf32>, vector<2x32xf32> -> vector<2x32xf32>
    %649 = arith.addf %642, %648 : vector<2x32xf32>
    %c1_300 = arith.constant 1 : index
    %c0_301 = arith.constant 0 : index
    %c0_302 = arith.constant 0 : index
    %650 = vector.load %arg6[%c1_300, %c0_301, %c0_302] : memref<4x32x32xf32, #tpu.memory_space<vmem>>, vector<1x32x32xf32>
    %651 = vector.shape_cast %650 : vector<1x32x32xf32> to vector<32x32xf32>
    %cst_303 = arith.constant dense<0.000000e+00> : vector<2x32xf32>
    %652 = tpu.matmul %600, %651, %cst_303 {dimension_numbers = #tpu.dot_dimension_numbers<[1], [0], [0], [1], [0, 0, 1, 1], [], []>} : vector<2x32xf32>, vector<32x32xf32>, vector<2x32xf32> -> vector<2x32xf32>
    %653 = arith.addf %643, %652 : vector<2x32xf32>
    %c2_304 = arith.constant 2 : index
    %c0_305 = arith.constant 0 : index
    %c0_306 = arith.constant 0 : index
    %654 = vector.load %arg6[%c2_304, %c0_305, %c0_306] : memref<4x32x32xf32, #tpu.memory_space<vmem>>, vector<1x32x32xf32>
    %655 = vector.shape_cast %654 : vector<1x32x32xf32> to vector<32x32xf32>
    %cst_307 = arith.constant dense<0.000000e+00> : vector<2x32xf32>
    %656 = tpu.matmul %600, %655, %cst_307 {dimension_numbers = #tpu.dot_dimension_numbers<[1], [0], [0], [1], [0, 0, 1, 1], [], []>} : vector<2x32xf32>, vector<32x32xf32>, vector<2x32xf32> -> vector<2x32xf32>
    %657 = arith.addf %644, %656 : vector<2x32xf32>
    %c3_308 = arith.constant 3 : index
    %c0_309 = arith.constant 0 : index
    %c0_310 = arith.constant 0 : index
    %658 = vector.load %arg6[%c3_308, %c0_309, %c0_310] : memref<4x32x32xf32, #tpu.memory_space<vmem>>, vector<1x32x32xf32>
    %659 = vector.shape_cast %658 : vector<1x32x32xf32> to vector<32x32xf32>
    %cst_311 = arith.constant dense<0.000000e+00> : vector<2x32xf32>
    %660 = tpu.matmul %600, %659, %cst_311 {dimension_numbers = #tpu.dot_dimension_numbers<[1], [0], [0], [1], [0, 0, 1, 1], [], []>} : vector<2x32xf32>, vector<32x32xf32>, vector<2x32xf32> -> vector<2x32xf32>
    %661 = arith.addf %645, %660 : vector<2x32xf32>
    %662 = arith.negf %653 : vector<2x32xf32>
    %663 = math.exp %662 : vector<2x32xf32>
    %cst_312 = arith.constant 1.000000e+00 : f32
    %664 = vector.broadcast %cst_312 : f32 to vector<2x32xf32>
    %665 = arith.addf %664, %663 : vector<2x32xf32>
    %666 = arith.divf %664, %665 : vector<2x32xf32>
    %667 = arith.mulf %666, %593 : vector<2x32xf32>
    %668 = arith.negf %649 : vector<2x32xf32>
    %669 = math.exp %668 : vector<2x32xf32>
    %cst_313 = arith.constant 1.000000e+00 : f32
    %670 = vector.broadcast %cst_313 : f32 to vector<2x32xf32>
    %671 = arith.addf %670, %669 : vector<2x32xf32>
    %672 = arith.divf %670, %671 : vector<2x32xf32>
    %673 = math.tanh %657 : vector<2x32xf32>
    %674 = arith.mulf %672, %673 : vector<2x32xf32>
    %675 = arith.addf %667, %674 : vector<2x32xf32>
    %676 = arith.negf %661 : vector<2x32xf32>
    %677 = math.exp %676 : vector<2x32xf32>
    %cst_314 = arith.constant 1.000000e+00 : f32
    %678 = vector.broadcast %cst_314 : f32 to vector<2x32xf32>
    %679 = arith.addf %678, %677 : vector<2x32xf32>
    %680 = arith.divf %678, %679 : vector<2x32xf32>
    %681 = math.tanh %675 : vector<2x32xf32>
    %682 = arith.mulf %680, %681 : vector<2x32xf32>
    %683 = tpu.concatenate %67, %149, %231, %313, %395, %477, %559, %641 in 0 : vector<2x32xf32>, vector<2x32xf32>, vector<2x32xf32>, vector<2x32xf32>, vector<2x32xf32>, vector<2x32xf32>, vector<2x32xf32>, vector<2x32xf32> -> vector<16x32xf32>
    %684 = tpu.concatenate %682, %600, %518, %436, %354, %272, %190, %108 in 0 : vector<2x32xf32>, vector<2x32xf32>, vector<2x32xf32>, vector<2x32xf32>, vector<2x32xf32>, vector<2x32xf32>, vector<2x32xf32>, vector<2x32xf32> -> vector<16x32xf32>
    %685 = tpu.concatenate %683, %684 in 1 : vector<16x32xf32>, vector<16x32xf32> -> vector<16x64xf32>
    %c0_315 = arith.constant 0 : index
    %c0_316 = arith.constant 0 : index
    %686 = vector.load %arg8[%c0_315, %c0_316] : memref<64x16xf32, #tpu.memory_space<vmem>>, vector<64x16xf32>
    %cst_317 = arith.constant dense<0.000000e+00> : vector<16x16xf32>
    %687 = tpu.matmul %685, %686, %cst_317 {dimension_numbers = #tpu.dot_dimension_numbers<[1], [0], [0], [1], [0, 0, 1, 1], [], []>} : vector<16x64xf32>, vector<64x16xf32>, vector<16x16xf32> -> vector<16x16xf32>
    %c0_318 = arith.constant 0 : index
    %c0_319 = arith.constant 0 : index
    %688 = vector.load %arg9[%c0_318, %c0_319] : memref<1x16xf32, #tpu.memory_space<vmem>>, vector<1x16xf32>
    %689 = vector.broadcast %688 : vector<1x16xf32> to vector<16x16xf32>
    %690 = arith.addf %687, %689 : vector<16x16xf32>
    %691 = math.tanh %690 : vector<16x16xf32>
    %c0_320 = arith.constant 0 : index
    %c0_321 = arith.constant 0 : index
    %692 = vector.load %arg10[%c0_320, %c0_321] : memref<16x4xf32, #tpu.memory_space<vmem>>, vector<16x4xf32>
    %cst_322 = arith.constant dense<0.000000e+00> : vector<16x4xf32>
    %693 = tpu.matmul %691, %692, %cst_322 {dimension_numbers = #tpu.dot_dimension_numbers<[1], [0], [0], [1], [0, 0, 1, 1], [], []>} : vector<16x16xf32>, vector<16x4xf32>, vector<16x4xf32> -> vector<16x4xf32>
    %c0_323 = arith.constant 0 : index
    %c0_324 = arith.constant 0 : index
    %694 = vector.load %arg11[%c0_323, %c0_324] : memref<1x4xf32, #tpu.memory_space<vmem>>, vector<1x4xf32>
    %695 = vector.broadcast %694 : vector<1x4xf32> to vector<16x4xf32>
    %696 = arith.addf %693, %695 : vector<16x4xf32>
    %697 = vector.extract_strided_slice %696 {offsets = [0, 0], sizes = [2, 4], strides = [1, 1]} : vector<16x4xf32> to vector<2x4xf32>
    %698 = vector.extract_strided_slice %696 {offsets = [2, 0], sizes = [2, 4], strides = [1, 1]} : vector<16x4xf32> to vector<2x4xf32>
    %699 = vector.extract_strided_slice %696 {offsets = [4, 0], sizes = [2, 4], strides = [1, 1]} : vector<16x4xf32> to vector<2x4xf32>
    %700 = vector.extract_strided_slice %696 {offsets = [6, 0], sizes = [2, 4], strides = [1, 1]} : vector<16x4xf32> to vector<2x4xf32>
    %701 = vector.extract_strided_slice %696 {offsets = [8, 0], sizes = [2, 4], strides = [1, 1]} : vector<16x4xf32> to vector<2x4xf32>
    %702 = vector.extract_strided_slice %696 {offsets = [10, 0], sizes = [2, 4], strides = [1, 1]} : vector<16x4xf32> to vector<2x4xf32>
    %703 = vector.extract_strided_slice %696 {offsets = [12, 0], sizes = [2, 4], strides = [1, 1]} : vector<16x4xf32> to vector<2x4xf32>
    %704 = vector.extract_strided_slice %696 {offsets = [14, 0], sizes = [2, 4], strides = [1, 1]} : vector<16x4xf32> to vector<2x4xf32>
    %705 = arith.maximumf %697, %698 : vector<2x4xf32>
    %706 = arith.maximumf %705, %699 : vector<2x4xf32>
    %707 = arith.maximumf %706, %700 : vector<2x4xf32>
    %708 = arith.maximumf %707, %701 : vector<2x4xf32>
    %709 = arith.maximumf %708, %702 : vector<2x4xf32>
    %710 = arith.maximumf %709, %703 : vector<2x4xf32>
    %711 = arith.maximumf %710, %704 : vector<2x4xf32>
    %712 = arith.subf %697, %711 : vector<2x4xf32>
    %713 = math.exp %712 : vector<2x4xf32>
    %714 = arith.subf %698, %711 : vector<2x4xf32>
    %715 = math.exp %714 : vector<2x4xf32>
    %716 = arith.subf %699, %711 : vector<2x4xf32>
    %717 = math.exp %716 : vector<2x4xf32>
    %718 = arith.subf %700, %711 : vector<2x4xf32>
    %719 = math.exp %718 : vector<2x4xf32>
    %720 = arith.subf %701, %711 : vector<2x4xf32>
    %721 = math.exp %720 : vector<2x4xf32>
    %722 = arith.subf %702, %711 : vector<2x4xf32>
    %723 = math.exp %722 : vector<2x4xf32>
    %724 = arith.subf %703, %711 : vector<2x4xf32>
    %725 = math.exp %724 : vector<2x4xf32>
    %726 = arith.subf %704, %711 : vector<2x4xf32>
    %727 = math.exp %726 : vector<2x4xf32>
    %728 = arith.addf %713, %715 : vector<2x4xf32>
    %729 = arith.addf %728, %717 : vector<2x4xf32>
    %730 = arith.addf %729, %719 : vector<2x4xf32>
    %731 = arith.addf %730, %721 : vector<2x4xf32>
    %732 = arith.addf %731, %723 : vector<2x4xf32>
    %733 = arith.addf %732, %725 : vector<2x4xf32>
    %734 = arith.addf %733, %727 : vector<2x4xf32>
    %cst_325 = arith.constant 2.500000e-01 : f32
    %735 = vector.broadcast %cst_325 : f32 to vector<2x4xf32>
    %736 = arith.divf %735, %734 : vector<2x4xf32>
    %cst_326 = arith.constant 0.000000e+00 : f32
    %737 = vector.broadcast %cst_326 : f32 to vector<2x32xf32>
    %cst_327 = arith.constant 0.000000e+00 : f32
    %738 = vector.broadcast %cst_327 : f32 to vector<2x32xf32>
    %739 = arith.mulf %713, %736 : vector<2x4xf32>
    %cst_328 = arith.constant dense<0.000000e+00> : vector<2xf32>
    %740 = vector.multi_reduction <add>, %739, %cst_328 [1] : vector<2x4xf32> to vector<2xf32>
    %741 = vector.shape_cast %740 : vector<2xf32> to vector<2x1xf32>
    %742 = vector.broadcast %741 : vector<2x1xf32> to vector<2x32xf32>
    %743 = arith.mulf %742, %67 : vector<2x32xf32>
    %744 = arith.addf %737, %743 : vector<2x32xf32>
    %745 = vector.broadcast %741 : vector<2x1xf32> to vector<2x32xf32>
    %746 = arith.mulf %745, %682 : vector<2x32xf32>
    %747 = arith.addf %738, %746 : vector<2x32xf32>
    %748 = arith.mulf %715, %736 : vector<2x4xf32>
    %cst_329 = arith.constant dense<0.000000e+00> : vector<2xf32>
    %749 = vector.multi_reduction <add>, %748, %cst_329 [1] : vector<2x4xf32> to vector<2xf32>
    %750 = vector.shape_cast %749 : vector<2xf32> to vector<2x1xf32>
    %751 = vector.broadcast %750 : vector<2x1xf32> to vector<2x32xf32>
    %752 = arith.mulf %751, %149 : vector<2x32xf32>
    %753 = arith.addf %744, %752 : vector<2x32xf32>
    %754 = vector.broadcast %750 : vector<2x1xf32> to vector<2x32xf32>
    %755 = arith.mulf %754, %600 : vector<2x32xf32>
    %756 = arith.addf %747, %755 : vector<2x32xf32>
    %757 = arith.mulf %717, %736 : vector<2x4xf32>
    %cst_330 = arith.constant dense<0.000000e+00> : vector<2xf32>
    %758 = vector.multi_reduction <add>, %757, %cst_330 [1] : vector<2x4xf32> to vector<2xf32>
    %759 = vector.shape_cast %758 : vector<2xf32> to vector<2x1xf32>
    %760 = vector.broadcast %759 : vector<2x1xf32> to vector<2x32xf32>
    %761 = arith.mulf %760, %231 : vector<2x32xf32>
    %762 = arith.addf %753, %761 : vector<2x32xf32>
    %763 = vector.broadcast %759 : vector<2x1xf32> to vector<2x32xf32>
    %764 = arith.mulf %763, %518 : vector<2x32xf32>
    %765 = arith.addf %756, %764 : vector<2x32xf32>
    %766 = arith.mulf %719, %736 : vector<2x4xf32>
    %cst_331 = arith.constant dense<0.000000e+00> : vector<2xf32>
    %767 = vector.multi_reduction <add>, %766, %cst_331 [1] : vector<2x4xf32> to vector<2xf32>
    %768 = vector.shape_cast %767 : vector<2xf32> to vector<2x1xf32>
    %769 = vector.broadcast %768 : vector<2x1xf32> to vector<2x32xf32>
    %770 = arith.mulf %769, %313 : vector<2x32xf32>
    %771 = arith.addf %762, %770 : vector<2x32xf32>
    %772 = vector.broadcast %768 : vector<2x1xf32> to vector<2x32xf32>
    %773 = arith.mulf %772, %436 : vector<2x32xf32>
    %774 = arith.addf %765, %773 : vector<2x32xf32>
    %775 = arith.mulf %721, %736 : vector<2x4xf32>
    %cst_332 = arith.constant dense<0.000000e+00> : vector<2xf32>
    %776 = vector.multi_reduction <add>, %775, %cst_332 [1] : vector<2x4xf32> to vector<2xf32>
    %777 = vector.shape_cast %776 : vector<2xf32> to vector<2x1xf32>
    %778 = vector.broadcast %777 : vector<2x1xf32> to vector<2x32xf32>
    %779 = arith.mulf %778, %395 : vector<2x32xf32>
    %780 = arith.addf %771, %779 : vector<2x32xf32>
    %781 = vector.broadcast %777 : vector<2x1xf32> to vector<2x32xf32>
    %782 = arith.mulf %781, %354 : vector<2x32xf32>
    %783 = arith.addf %774, %782 : vector<2x32xf32>
    %784 = arith.mulf %723, %736 : vector<2x4xf32>
    %cst_333 = arith.constant dense<0.000000e+00> : vector<2xf32>
    %785 = vector.multi_reduction <add>, %784, %cst_333 [1] : vector<2x4xf32> to vector<2xf32>
    %786 = vector.shape_cast %785 : vector<2xf32> to vector<2x1xf32>
    %787 = vector.broadcast %786 : vector<2x1xf32> to vector<2x32xf32>
    %788 = arith.mulf %787, %477 : vector<2x32xf32>
    %789 = arith.addf %780, %788 : vector<2x32xf32>
    %790 = vector.broadcast %786 : vector<2x1xf32> to vector<2x32xf32>
    %791 = arith.mulf %790, %272 : vector<2x32xf32>
    %792 = arith.addf %783, %791 : vector<2x32xf32>
    %793 = arith.mulf %725, %736 : vector<2x4xf32>
    %cst_334 = arith.constant dense<0.000000e+00> : vector<2xf32>
    %794 = vector.multi_reduction <add>, %793, %cst_334 [1] : vector<2x4xf32> to vector<2xf32>
    %795 = vector.shape_cast %794 : vector<2xf32> to vector<2x1xf32>
    %796 = vector.broadcast %795 : vector<2x1xf32> to vector<2x32xf32>
    %797 = arith.mulf %796, %559 : vector<2x32xf32>
    %798 = arith.addf %789, %797 : vector<2x32xf32>
    %799 = vector.broadcast %795 : vector<2x1xf32> to vector<2x32xf32>
    %800 = arith.mulf %799, %190 : vector<2x32xf32>
    %801 = arith.addf %792, %800 : vector<2x32xf32>
    %802 = arith.mulf %727, %736 : vector<2x4xf32>
    %cst_335 = arith.constant dense<0.000000e+00> : vector<2xf32>
    %803 = vector.multi_reduction <add>, %802, %cst_335 [1] : vector<2x4xf32> to vector<2xf32>
    %804 = vector.shape_cast %803 : vector<2xf32> to vector<2x1xf32>
    %805 = vector.broadcast %804 : vector<2x1xf32> to vector<2x32xf32>
    %806 = arith.mulf %805, %641 : vector<2x32xf32>
    %807 = arith.addf %798, %806 : vector<2x32xf32>
    %808 = vector.broadcast %804 : vector<2x1xf32> to vector<2x32xf32>
    %809 = arith.mulf %808, %108 : vector<2x32xf32>
    %810 = arith.addf %801, %809 : vector<2x32xf32>
    %811 = tpu.concatenate %807, %810 in 1 : vector<2x32xf32>, vector<2x32xf32> -> vector<2x64xf32>
    %c0_336 = arith.constant 0 : index
    %c0_337 = arith.constant 0 : index
    %812 = vector.load %arg12[%c0_336, %c0_337] : memref<2x64xf32, #tpu.memory_space<vmem>>, vector<2x64xf32>
    tpu.vector_store %arg12[%c0_336, %c0_337], %811 {strides = array<i32>} : memref<2x64xf32, #tpu.memory_space<vmem>>, vector<2x64xf32>,
    return
  }
}

</mosaic_0001>

<bundles_post_ra>
// kernel: self_attention_forward.1
= control target key start
LH: loop header
LB: loop body
LE: loop exit
PB: predicated region body
PF: predicated region fallthrough
CT: control target
= control target key end

     0   :  { %v8282_v2 = vmov 0   ;;  %s9372_s0 = inlined_call_operand.vmem [shape: s32[16,1], index: 0, kind: input, shape index: {}]   ;;  %s9373_s1 = inlined_call_operand.vmem [shape: f32[32,16], index: 1, kind: input, shape index: {}]   ;;  %s9374_s2 = inlined_call_operand.vmem [shape: f32[16,128], index: 2, kind: input, shape index: {}]   ;;  %s9375_s3 = inlined_call_operand.vmem [shape: f32[4,32,32], index: 3, kind: input, shape index: {}]   ;;  %s9376_s4 = inlined_call_operand.vmem [shape: f32[1,128], index: 4, kind: input, shape index: {}]   ;;  %s9377_s5 = inlined_call_operand.vmem [shape: f32[16,128], index: 5, kind: input, shape index: {}]   ;;  %s9378_s6 = inlined_call_operand.vmem [shape: f32[4,32,32], index: 6, kind: input, shape index: {}]   ;;  %s9379_s7 = inlined_call_operand.vmem [shape: f32[1,128], index: 7, kind: input, shape index: {}]   ;;  %s9380_s8 = inlined_call_operand.vmem [shape: f32[64,16], index: 8, kind: input, shape index: {}]   ;;  %s9381_s9 = inlined_call_operand.vmem [shape: f32[1,16], index: 9, kind: input, shape index: {}]   ;;  %s9382_s10 = inlined_call_operand.vmem [shape: f32[16,4], index: 10, kind: input, shape index: {}]   ;;  %s9383_s11 = inlined_call_operand.vmem [shape: f32[1,4], index: 11, kind: input, shape index: {}]   ;;  %s9384_s12 = inlined_call_operand.hbm [shape: f32[2,64], index: 12, kind: output, shape index: {}]  }
   0x1   :  { %v42_v0 = vld [vmem:[%s9372_s0] sm:$0xff]  ;;  %7979 = vset.pattern.permute.xlu0 %v8282_v2  ;;  %v59_v3 = vld [vmem:[%s9373_s1 + $0x8] sm:$0xff]  ;;  %v60_v4 = vld [vmem:[%s9373_s1 + $0x10] sm:$0xff] }
   0x2   :  { %v58_v1 = vld [vmem:[%s9373_s1] sm:$0xff]  ;;  %v61_v5 = vld [vmem:[%s9373_s1 + $0x18] sm:$0xff]  ;;  %47 = vperm.xlu0 %7979, %v42_v0  }
   0x3   :  { %v7551_v6 = vpack.c.bf16 %v59_v3, %v58_v1  ;;  %v7555_v7 = vpack.c.bf16 %v61_v5, %v60_v4 }
   0x4   :  { %17 = vsyncpa [#allocation3], 0  ;;  %v43_v8 = vld [vmem:[%s9372_s0 + $0x8] sm:$0xff]  ;;  %v319_v9 = vld [vmem:[%s9375_s3] sm:$0xff]  ;;  %v8283_v12 = vmov 0.0|0.0   ;;  %vm8284_vm0 = vmmov 0   ;;  %v44_v38 = vlaneseq }
   0x5   :  { %7552 = vmatprep.subr.bf16.mxu1 %v7551_v6  ;;  %v320_v10 = vld [vmem:[%s9375_s3 + $0x8] sm:$0xff]  ;;  %v321_v11 = vld [vmem:[%s9375_s3 + $0x10] sm:$0xff]  ;;  %7567 = vmatprep.subr.bf16.mxu0 %v8283_v12  ;;  %v322_v14 = vld [vmem:[%s9375_s3 + $0x18] sm:$0xff]  ;;  %v8285_v15 = vmov 0.0   ;;  %vm62_vm1 = vcmask 261120   ;;  %s8286_s14 = smov 64  }
   0x6   :  { %7554 = vmatpush3.bf16.msra.mxu1 %v7551_v6  ;;  %50 = vperm.xlu0 %7979, %v43_v8   ;;  %v8383_v13 = vpack.c.bf16 %v320_v10, %v319_v9  ;;  %v8391_v16 = vpack.c.bf16 %v322_v14, %v321_v11  ;;  %v6318_v17 = vld [vmem:[%s9375_s3 + $0x40] sm:$0xff]  ;;  %v6319_v18 = vld [vmem:[%s9375_s3 + $0x48] sm:$0xff]  ;;  %v6320_v23 = vld [vmem:[%s9375_s3 + $0x50] sm:$0xff]  ;;  %v45_v39 = vand.u32 127, %v44_v38  ;;  %vm153_vm4 = vcmask 130048  }
   0x7   :  { %7556 = vmatprep.subr.bf16.mxu1 %v7555_v7  ;;  %6829 = vmatprep.mubr.msk.f32.mxu0 %vm8284_vm0, %v8285_v15  ;;  %v144_v19 = vld [vmem:[%s9374_s2] sm:$0xff]  ;;  %v145_v20 = vld [vmem:[%s9374_s2 + $0x8] sm:$0xff]  ;;  %v8407_v22 = vpack.c.bf16 %v6319_v18, %v6318_v17  ;;  %v6321_v24 = vld [vmem:[%s9375_s3 + $0x58] sm:$0xff]  ;;  %vm5867_vm5 = vcmask 1041408   ;;  %vm5869_vm6 = vcmask 1043456   ;;  %vm5871_vm7 = vcmask 1045504  }
   0x8   :  { %7569 = vmatpush3.bf16.msra.mxu0 %v8383_v13  ;;  %v7559_v21 = vpack.c.bf16 %v145_v20, %v144_v19  ;;  %v8418_v25 = vpack.c.bf16 %v6321_v24, %v6320_v23  ;;  %v673_v26 = vld [vmem:[%s9378_s6] sm:$0xff]  ;;  %v674_v27 = vld [vmem:[%s9378_s6 + $0x8] sm:$0xff]  ;;  %v675_v29 = vld [vmem:[%s9378_s6 + $0x10] sm:$0xff]  ;;  %vm5915_vm8 = vcmask 523264   ;;  %vm6169_vm9 = vcmask 25600  }
   0x9   :  { %7570 = vmatprep.subr.bf16.mxu0 %v8283_v12  ;;  %v8430_v28 = vpack.c.bf16 %v674_v27, %v673_v26  ;;  %v676_v30 = vld [vmem:[%s9378_s6 + $0x18] sm:$0xff]  ;;  %v6333_v32 = vld [vmem:[%s9378_s6 + $0x40] sm:$0xff]  ;;  %v6334_v33 = vld [vmem:[%s9378_s6 + $0x48] sm:$0xff]  ;;  %vm6181_vm10 = vcmask 27650   ;;  %vm6198_vm11 = vcmask 29700   ;;  %vm6215_vm12 = vcmask 31750  }
   0xa   :  { %7558 = vmatpush3.bf16.msra.mxu1 %v7555_v7  ;;  %v8441_v31 = vpack.c.bf16 %v676_v30, %v675_v29  ;;  %v8453_v34 = vpack.c.bf16 %v6334_v33, %v6333_v32  ;;  %v6335_v35 = vld [vmem:[%s9378_s6 + $0x50] sm:$0xff]  ;;  %v6336_v36 = vld [vmem:[%s9378_s6 + $0x58] sm:$0xff]  ;;  %v235_v44 = vld [vmem:[%s9377_s5] sm:$0xff]  ;;  %vm6288_vm13 = vcmask 517120  }
   0xb   :  { %7560 = vmatprep.subr.bf16.mxu1 %v7559_v21  ;;  %v8464_v37 = vpack.c.bf16 %v6336_v36, %v6335_v35  ;;  %v236_v45 = vld [vmem:[%s9377_s5 + $0x8] sm:$0xff]  ;;  %v6314_v58 = vld [vmem:[%s9375_s3 + $0x20] sm:$0xff]  ;;  %v6316_v61 = vld [vmem:[%s9375_s3 + $0x30] sm:$0xff] }
   0xc   :  { %7572 = vmatpush3.bf16.msra.mxu0 %v8391_v16  ;;  %v7563_v46 = vpack.c.bf16 %v236_v45, %v235_v44  ;;  %v6315_v59 = vld [vmem:[%s9375_s3 + $0x28] sm:$0xff]  ;;  %v6317_v62 = vld [vmem:[%s9375_s3 + $0x38] sm:$0xff]  ;;  %v6322_v0 = vld [vmem:[%s9375_s3 + $0x60] sm:$0xff] }
   0xd   :  { %7579 = vmatprep.subr.bf16.mxu0 %v8283_v12  ;;  %v8503_v60 = vpack.c.bf16 %v6315_v59, %v6314_v58  ;;  %v8514_v63 = vpack.c.bf16 %v6317_v62, %v6316_v61  ;;  %v6323_v1 = vld [vmem:[%s9375_s3 + $0x68] sm:$0xff]  ;;  %v6324_v3 = vld [vmem:[%s9375_s3 + $0x70] sm:$0xff]  ;;  %v6325_v4 = vld [vmem:[%s9375_s3 + $0x78] sm:$0xff] }
   0xe   :  { %v8526_v2 = vpack.c.bf16 %v6323_v1, %v6322_v0  ;;  %v8537_v5 = vpack.c.bf16 %v6325_v4, %v6324_v3  ;;  %v6329_v6 = vld [vmem:[%s9378_s6 + $0x20] sm:$0xff]  ;;  %v6330_v7 = vld [vmem:[%s9378_s6 + $0x28] sm:$0xff]  ;;  %v6331_v9 = vld [vmem:[%s9378_s6 + $0x30] sm:$0xff] }
   0xf   :  { %6830 = vmatmul.mubr.f32.vlgmr.msra.gmra.mrb[0].mxu0 %v8285_v15  ;;  %v8549_v8 = vpack.c.bf16 %v6330_v7, %v6329_v6  ;;  %v6332_v10 = vld [vmem:[%s9378_s6 + $0x38] sm:$0xff]  ;;  %v6337_v14 = vld [vmem:[%s9378_s6 + $0x60] sm:$0xff]  ;;  %v6338_v17 = vld [vmem:[%s9378_s6 + $0x68] sm:$0xff] }
  0x10   :  { %7581 = vmatpush3.bf16.msra.mxu0 %v8407_v22  ;;  %6851 = vmatprep.mubr.msk.f32.mxu0 %vm8284_vm0, %v8285_v15  ;;  %v8560_v11 = vpack.c.bf16 %v6332_v10, %v6331_v9  ;;  %v8572_v18 = vpack.c.bf16 %v6338_v17, %v6337_v14  ;;  %v6339_v19 = vld [vmem:[%s9378_s6 + $0x70] sm:$0xff]  ;;  %v6340_v20 = vld [vmem:[%s9378_s6 + $0x78] sm:$0xff]  ;;  %v6308_v23 = vld [vmem:[%s9376_s4] ss:$0 sm:$0xff]  ;;  %s8287_s4 = smov 32  }
  0x11   :  { %7582 = vmatprep.subr.bf16.mxu0 %v8283_v12  ;;  %v6311_v32 = vld [vmem:[%s9379_s7] ss:$0 sm:$0xff]  ;;  %s8288_s7 = smov 96  }
  0x14   :  { %7584 = vmatpush3.bf16.msra.mxu0 %v8418_v25 }
  0x15   :  { %7591 = vmatprep.subr.bf16.mxu0 %v8283_v12 }
  0x17   :  { %6852 = vmatmul.mubr.f32.vlgmr.msra.gmra.mrb[2].mxu0 %v8285_v15 }
  0x18   :  { %7593 = vmatpush3.bf16.msra.mxu0 %v8430_v28  ;;  %6873 = vmatprep.mubr.msk.f32.mxu0 %vm8284_vm0, %v8285_v15 }
  0x19   :  { %7594 = vmatprep.subr.bf16.mxu0 %v8283_v12 }
  0x1c   :  { %7596 = vmatpush3.bf16.msra.mxu0 %v8441_v31 }
  0x1d   :  { %7603 = vmatprep.subr.bf16.mxu0 %v8283_v12 }
  0x1f   :  { %6874 = vmatmul.mubr.f32.vlgmr.msra.gmra.mrb[4].mxu0 %v8285_v15 }
  0x20   :  { %7605 = vmatpush3.bf16.msra.mxu0 %v8453_v34  ;;  %6895 = vmatprep.mubr.msk.f32.mxu0 %vm8284_vm0, %v8285_v15 }
  0x21   :  { %7606 = vmatprep.subr.bf16.mxu0 %v8283_v12 }
  0x24   :  { %7608 = vmatpush3.bf16.msra.mxu0 %v8464_v37 }
  0x25   :  { %7615 = vmatprep.subr.bf16.mxu0 %v8283_v12 }
  0x27   :  { %6896 = vmatmul.mubr.f32.vlgmr.msra.gmra.mrb[6].mxu0 %v8285_v15 }
  0x28   :  { %7617 = vmatpush3.bf16.msra.mxu0 %v8383_v13  ;;  %6917 = vmatprep.mubr.msk.f32.mxu0 %vm8284_vm0, %v8285_v15 }
  0x29   :  { %7618 = vmatprep.subr.bf16.mxu0 %v8283_v12 }
  0x2c   :  { %7620 = vmatpush3.bf16.msra.mxu0 %v8391_v16 }
  0x2d   :  { %7627 = vmatprep.subr.bf16.mxu0 %v8283_v12 }
  0x81   :  { %v48_v40 = vpop.permute.xlu0 %47 }
  0x82   :  { %vm52_vm2 = vcmp.eq.s32.totalorder %v45_v39, %v48_v40 }
  0x83   :  { %v6304_v41 = vsel %vm52_vm2, 1.0, %v8285_v15 }
  0x84   :  { %6804 = vmatprep.mubr.msk.f32.mxu1 %vm62_vm1, %v6304_v41 }
  0x85   :  { %v51_v42 = vpop.permute.xlu0 %50 }
  0x86   :  { %vm53_vm3 = vcmp.eq.s32.totalorder %v45_v39, %v51_v42 }
  0x87   :  { %v6305_v43 = vsel %vm53_vm3, 1.0, %v8285_v15 }
  0x88   :  { %6805 = vmatmul.mubr.msk.f32.vlgmr.msra.gmra.mrb[0].mxu1 %vm62_vm1, %v6305_v43 }
  0x89   :  { %7562 = vmatpush3.bf16.msra.mxu1 %v7559_v21  ;;  %v8583_v21 = vpack.c.bf16 %v6340_v20, %v6339_v19 }
  0x8a   :  { %7564 = vmatprep.subr.bf16.mxu1 %v7563_v46 }
  0xe2   :  { %v8488_v47 = vpop.f32.mrb[0].mxu0 }
  0xe3   :  { %v6831_v48 = vpop.f32.mrb[1].mxu0 }
  0xea   :  { %v548_v49 = vpop.f32.mrb[2].mxu0 }
  0xeb   :  { %v6853_v50 = vpop.f32.mrb[3].mxu0  ;;  %553 = vrot.lane.b32.xlu1 %v548_v49, %s8286_s14 }
  0xf2   :  { %v8491_v51 = vpop.f32.mrb[4].mxu0 }
  0xf3   :  { %v6875_v52 = vpop.f32.mrb[5].mxu0 }
  0xfa   :  { %v903_v53 = vpop.f32.mrb[6].mxu0 }
  0xfb   :  { %v908_v54 = vrot.slane %v903_v53, 2  ;;  %v6897_v55 = vpop.f32.mrb[7].mxu0 }
  0xfd   :  { %909 = vrot.lane.b32.xlu1 %v908_v54, %s8286_s14 }
 0x15b   :  { %v6806_v56 = vpop.f32.mrb[0].mxu1 }
 0x15c   :  { %v135_v57 = vpop.f32.mrb[1].mxu1 }
 0x15d   :  { %6811 = vmatprep.mubr.msk.f32.mxu1 %vm153_vm4, %v135_v57  ;;  %v554_v24 = vpop.permute.xlu1 %553 }
 0x15e   :  { %6812 = vmatmul.mubr.msk.f32.vlgmr.msra.gmra.mrb[2].mxu1 %vm153_vm4, %v6806_v56 }
 0x15f   :  { %7566 = vmatpush3.bf16.msra.mxu1 %v7563_v46  ;;  %6818 = vmatprep.mubr.msk.f32.mxu1 %vm153_vm4, %v135_v57 }
 0x160   :  { %7573 = vmatprep.subr.bf16.mxu1 %v8283_v12 }
 0x162   :  { %6819 = vmatmul.mubr.msk.f32.vlgmr.msra.gmra.mrb[4].mxu1 %vm153_vm4, %v6806_v56  ;;  %v748_v56 = vrot.slane %v8491_v51, 2 }
 0x163   :  { %7575 = vmatpush3.bf16.msra.mxu1 %v8503_v60  ;;  %6840 = vmatprep.mubr.msk.f32.mxu1 %vm8284_vm0, %v8285_v15 }
 0x164   :  { %7576 = vmatprep.subr.bf16.mxu1 %v8283_v12 }
 0x167   :  { %7578 = vmatpush3.bf16.msra.mxu1 %v8514_v63 }
 0x168   :  { %7585 = vmatprep.subr.bf16.mxu1 %v8283_v12 }
 0x16a   :  { %6841 = vmatmul.mubr.f32.vlgmr.msra.gmra.mrb[6].mxu1 %v8285_v15 }
 0x16b   :  { %7587 = vmatpush3.bf16.msra.mxu1 %v8526_v2  ;;  %6862 = vmatprep.mubr.msk.f32.mxu1 %vm8284_vm0, %v8285_v15 }
 0x16c   :  { %7588 = vmatprep.subr.bf16.mxu1 %v8283_v12 }
 0x16f   :  { %7590 = vmatpush3.bf16.msra.mxu1 %v8537_v5  ;;  %v910_v36 = vpop.permute.xlu1 %909 }
 0x170   :  { %7597 = vmatprep.subr.bf16.mxu1 %v8283_v12 }
 0x172   :  { %6863 = vmatmul.mubr.f32.vlgmr.msra.gmra.mrb[8].mxu1 %v8285_v15 }
 0x173   :  { %7599 = vmatpush3.bf16.msra.mxu1 %v8549_v8  ;;  %6884 = vmatprep.mubr.msk.f32.mxu1 %vm8284_vm0, %v8285_v15 }
 0x174   :  { %7600 = vmatprep.subr.bf16.mxu1 %v8283_v12 }
 0x177   :  { %7602 = vmatpush3.bf16.msra.mxu1 %v8560_v11 }
 0x178   :  { %7609 = vmatprep.subr.bf16.mxu1 %v8283_v12 }
 0x17a   :  { %6885 = vmatmul.mubr.f32.vlgmr.msra.gmra.mrb[10].mxu1 %v8285_v15 }
 0x17b   :  { %7611 = vmatpush3.bf16.msra.mxu1 %v8572_v18  ;;  %6906 = vmatprep.mubr.msk.f32.mxu1 %vm8284_vm0, %v8285_v15 }
 0x17c   :  { %7612 = vmatprep.subr.bf16.mxu1 %v8283_v12 }
 0x17f   :  { %7614 = vmatpush3.bf16.msra.mxu1 %v8583_v21 }
 0x180   :  { %7621 = vmatprep.subr.bf16.mxu1 %v8283_v12 }
 0x182   :  { %6907 = vmatmul.mubr.f32.vlgmr.msra.gmra.mrb[12].mxu1 %v8285_v15 }
 0x183   :  { %7623 = vmatpush3.bf16.msra.mxu1 %v8503_v60  ;;  %6928 = vmatprep.mubr.msk.f32.mxu1 %vm8284_vm0, %v8285_v15 }
 0x184   :  { %7624 = vmatprep.subr.bf16.mxu1 %v8283_v12 }
 0x187   :  { %7626 = vmatpush3.bf16.msra.mxu1 %v8514_v63 }
 0x188   :  { %7633 = vmatprep.subr.bf16.mxu1 %v8283_v12 }
 0x231   :  { %v6813_v26 = vpop.f32.mrb[2].mxu1 }
 0x232   :  { %v8600_v27 = vadd.f32 %v6813_v26, %v6308_v23  ;;  %v226_v29 = vpop.f32.mrb[3].mxu1 }
 0x233   :  { %v8602_v30 = vadd.f32 %v6308_v23, %v226_v29 }
 0x235   :  { %v556_v33 = vadd.f32 %v554_v24, %v8602_v30  ;;  %v6820_v35 = vpop.f32.mrb[4].mxu1  ;;  %v396_v55 = vadd.f32 %v8488_v47, %v8602_v30 }
 0x236   :  { %v8608_v38 = vadd.f32 %v6820_v35, %v6311_v32  ;;  %v310_v39 = vpop.f32.mrb[5].mxu1 }
 0x237   :  { %7980 = vtanh.f32 %v556_v33  ;;  %v8610_v40 = vadd.f32 %v6311_v32, %v310_v39  ;;  %v6327_v58 = vmul.f32 -1.442695, %v396_v55 }
 0x238   :  { %v912_v41 = vadd.f32 %v910_v36, %v8608_v38  ;;  %v750_v57 = vadd.f32 %v748_v56, %v8608_v38 }
 0x23a   :  { %7982 = vtanh.f32 %v912_v41  ;;  %v6342_v59 = vmul.f32 -1.442695, %v750_v57 }
 0x23b   :  { %7984 = vpow2.f32 %v6327_v58 }
 0x23c   :  { %7986 = vpow2.f32 %v6342_v59 }
 0x23d   :  { %v468_v42 = vpop.f32.mrb[6].mxu1 }
 0x23e   :  { %v6842_v43 = vpop.f32.mrb[7].mxu1 }
 0x241   :  { %v7981_v44 = vpop.eup %7980 }
 0x242   :  { %652 = vrot.lane.b32.xlu0 %v7981_v44, %s8286_s14 }
 0x244   :  { %v7983_v45 = vpop.eup %7982 }
 0x245   :  { %1009 = vrot.lane.b32.xlu1 %v7983_v45, %s8286_s14  ;;  %v628_v46 = vpop.f32.mrb[8].mxu1  ;;  %v7985_v61 = vpop.eup %7984 }
 0x246   :  { %473 = vrot.lane.b32.xlu0 %v468_v42, %s8287_s4  ;;  %v6864_v48 = vpop.f32.mrb[9].mxu1  ;;  %v7987_v62 = vpop.eup %7986  ;;  %v647_v0 = vadd.f32 1.0, %v7985_v61 }
 0x247   :  { %v1004_v1 = vadd.f32 1.0, %v7987_v62 }
 0x248   :  { %7988 = vrcp.f32 %v647_v0 }
 0x249   :  { %7990 = vrcp.f32 %v1004_v1 }
 0x24d   :  { %v822_v49 = vpop.f32.mrb[10].mxu1 }
 0x24e   :  { %v827_v50 = vrot.slane %v822_v49, 2  ;;  %v6886_v52 = vpop.f32.mrb[11].mxu1 }
 0x250   :  { %828 = vrot.lane.b32.xlu1 %v827_v50, %s8287_s4 }
 0x252   :  { %v7989_v3 = vpop.eup %7988 }
 0x253   :  { %v7991_v7 = vpop.eup %7990 }
 0x255   :  { %v984_v53 = vpop.f32.mrb[12].mxu1 }
 0x256   :  { %v6908_v54 = vpop.f32.mrb[13].mxu1  ;;  %v989_v51 = vrot.slane %v984_v53, 2 }
 0x2b4   :  { %v653_v4 = vpop.permute.xlu0 %652 }
 0x2b5   :  { %v655_v6 = vmul.f32 %v7989_v3, %v653_v4 }
 0x2b7   :  { %v1010_v9 = vpop.permute.xlu1 %1009  ;;  %657 = vrot.lane.b32.xlu0 %v655_v6, %s8287_s4 }
 0x2b8   :  { %v1012_v47 = vmul.f32 %v7991_v7, %v1010_v9  ;;  %v474_v10 = vpop.permute.xlu0 %473 }
 0x2b9   :  { %v476_v14 = vadd.f32 %v474_v10, %v8602_v30 }
 0x2ba   :  { %1014 = vrot.lane.b32.xlu1 %v1012_v47, %s8287_s4 }
 0x2bb   :  { %633 = vrot.lane.b32.xlu0 %v628_v46, %s8288_s7  ;;  %v6326_v20 = vmul.f32 -1.442695, %v476_v14 }
 0x2bd   :  { %7992 = vpow2.f32 %v6326_v20 }
 0x2be   :  { %990 = vrot.lane.b32.xlu1 %v989_v51, %s8288_s7 }
 0x2c2   :  { %v829_v17 = vpop.permute.xlu1 %828 }
 0x2c3   :  { %v831_v19 = vadd.f32 %v829_v17, %v8608_v38 }
 0x2c5   :  { %v6341_v23 = vmul.f32 -1.442695, %v831_v19 }
 0x2c7   :  { %7994 = vpow2.f32 %v6341_v23  ;;  %v7993_v24 = vpop.eup %7992 }
 0x2c8   :  { %v640_v29 = vadd.f32 1.0, %v7993_v24 }
 0x2ca   :  { %7996 = vrcp.f32 %v640_v29 }
 0x2d1   :  { %v7995_v26 = vpop.eup %7994 }
 0x2d2   :  { %v997_v32 = vadd.f32 1.0, %v7995_v26 }
 0x2d4   :  { %7998 = vrcp.f32 %v997_v32  ;;  %v7997_v33 = vpop.eup %7996 }
 0x2d5   :  { %v643_v36 = vmul.f32 0.0, %v7997_v33 }
 0x2de   :  { %v7999_v35 = vpop.eup %7998 }
 0x2df   :  { %v1000_v42 = vmul.f32 0.0, %v7999_v35 }
 0x329   :  { %v658_v39 = vpop.permute.xlu0 %657 }
 0x32a   :  { %v8627_v41 = vadd.f32 %v658_v39, %v643_v36 }
 0x32c   :  { %8000 = vtanh.f32 %v8627_v41  ;;  %v1015_v43 = vpop.permute.xlu1 %1014 }
 0x32d   :  { %v8630_v44 = vadd.f32 %v1015_v43, %v1000_v42  ;;  %v634_v48 = vpop.permute.xlu0 %633 }
 0x32e   :  { %v636_v49 = vadd.f32 %v634_v48, %v8602_v30 }
 0x32f   :  { %8002 = vtanh.f32 %v8630_v44 }
 0x330   :  { %v991_v50 = vpop.permute.xlu1 %990  ;;  %v6328_v53 = vmul.f32 -1.442695, %v636_v49 }
 0x331   :  { %v993_v52 = vadd.f32 %v991_v50, %v8608_v38 }
 0x332   :  { %8004 = vpow2.f32 %v6328_v53 }
 0x333   :  { %v6343_v54 = vmul.f32 -1.442695, %v993_v52 }
 0x335   :  { %8006 = vpow2.f32 %v6343_v54 }
 0x336   :  { %v8001_v45 = vpop.eup %8000 }
 0x337   :  { %669 = vrot.lane.b32.xlu0 %v8001_v45, %s8286_s14 }
 0x339   :  { %v8003_v46 = vpop.eup %8002 }
 0x33a   :  { %1026 = vrot.lane.b32.xlu1 %v8003_v46, %s8286_s14 }
 0x33c   :  { %v8005_v55 = vpop.eup %8004 }
 0x33d   :  { %v664_v57 = vadd.f32 1.0, %v8005_v55 }
 0x33f   :  { %v8007_v56 = vpop.eup %8006  ;;  %8008 = vrcp.f32 %v664_v57 }
 0x340   :  { %v1021_v58 = vadd.f32 1.0, %v8007_v56 }
 0x342   :  { %8010 = vrcp.f32 %v1021_v58 }
 0x349   :  { %v8009_v59 = vpop.eup %8008 }
 0x34c   :  { %v8011_v0 = vpop.eup %8010 }
 0x3a9   :  { %v670_v61 = vpop.permute.xlu0 %669 }
 0x3aa   :  { %v8637_v62 = vmul.f32 %v8009_v59, %v670_v61 }
 0x3ac   :  { %v1027_v1 = vpop.permute.xlu1 %1026  ;;  %1031 = vrot.lane.b32.xlu0 %v8637_v62, %s8287_s4 }
 0x3ad   :  { %v8641_v3 = vmul.f32 %v8011_v0, %v1027_v1 }
 0x3af   :  { %v1377_v4 = vrot.slane %v8641_v3, 6 }
 0x3b1   :  { %1378 = vrot.lane.b32.xlu1 %v1377_v4, %s8287_s4 }
 0x41e   :  { %v1032_v6 = vpop.permute.xlu0 %1031 }
 0x41f   :  { %6918 = vmatmul.mubr.msk.f32.vlgmr.msra.gmra.mrb[8].mxu0 %vm62_vm1, %v1032_v6  ;;  %6929 = vmatmul.mubr.msk.f32.vlgmr.msra.gmra.mrb[14].mxu1 %vm62_vm1, %v1032_v6 }
 0x420   :  { %7629 = vmatpush3.bf16.msra.mxu0 %v8407_v22  ;;  %7635 = vmatpush3.bf16.msra.mxu1 %v8526_v2 }
 0x421   :  { %7630 = vmatprep.subr.bf16.mxu0 %v8283_v12  ;;  %7636 = vmatprep.subr.bf16.mxu1 %v8283_v12 }
 0x422   :  { %6939 = vmatprep.mubr.msk.f32.mxu0 %vm8284_vm0, %v8285_v15  ;;  %6950 = vmatprep.mubr.msk.f32.mxu1 %vm8284_vm0, %v8285_v15 }
 0x423   :  { %v1379_v7 = vpop.permute.xlu1 %1378 }
 0x424   :  { %7632 = vmatpush3.bf16.msra.mxu0 %v8418_v25  ;;  %7638 = vmatpush3.bf16.msra.mxu1 %v8537_v5 }
 0x425   :  { %7639 = vmatprep.subr.bf16.mxu0 %v8283_v12  ;;  %7645 = vmatprep.subr.bf16.mxu1 %v8283_v12 }
 0x427   :  { %6940 = vmatmul.mubr.msk.f32.vlgmr.msra.gmra.mrb[10].mxu0 %vm62_vm1, %v1032_v6  ;;  %6951 = vmatmul.mubr.msk.f32.vlgmr.msra.gmra.mrb[16].mxu1 %vm62_vm1, %v1032_v6 }
 0x428   :  { %7641 = vmatpush3.bf16.msra.mxu0 %v8430_v28  ;;  %7647 = vmatpush3.bf16.msra.mxu1 %v8549_v8 }
 0x429   :  { %7642 = vmatprep.subr.bf16.mxu0 %v8283_v12  ;;  %7648 = vmatprep.subr.bf16.mxu1 %v8283_v12 }
 0x42a   :  { %6961 = vmatprep.mubr.msk.f32.mxu0 %vm8284_vm0, %v8285_v15  ;;  %6972 = vmatprep.mubr.msk.f32.mxu1 %vm8284_vm0, %v8285_v15 }
 0x42c   :  { %7644 = vmatpush3.bf16.msra.mxu0 %v8441_v31  ;;  %7650 = vmatpush3.bf16.msra.mxu1 %v8560_v11 }
 0x42d   :  { %7651 = vmatprep.subr.bf16.mxu0 %v8283_v12  ;;  %7657 = vmatprep.subr.bf16.mxu1 %v8283_v12 }
 0x42f   :  { %6962 = vmatmul.mubr.msk.f32.vlgmr.msra.gmra.mrb[12].mxu0 %vm62_vm1, %v1379_v7  ;;  %6973 = vmatmul.mubr.msk.f32.vlgmr.msra.gmra.mrb[18].mxu1 %vm62_vm1, %v1379_v7 }
 0x430   :  { %7653 = vmatpush3.bf16.msra.mxu0 %v8453_v34  ;;  %7659 = vmatpush3.bf16.msra.mxu1 %v8572_v18 }
 0x431   :  { %7654 = vmatprep.subr.bf16.mxu0 %v8283_v12  ;;  %7660 = vmatprep.subr.bf16.mxu1 %v8283_v12 }
 0x432   :  { %6983 = vmatprep.mubr.msk.f32.mxu0 %vm8284_vm0, %v8285_v15  ;;  %6994 = vmatprep.mubr.msk.f32.mxu1 %vm8284_vm0, %v8285_v15 }
 0x434   :  { %7656 = vmatpush3.bf16.msra.mxu0 %v8464_v37  ;;  %7662 = vmatpush3.bf16.msra.mxu1 %v8583_v21 }
 0x435   :  { %7663 = vmatprep.subr.bf16.mxu0 %v8283_v12  ;;  %7669 = vmatprep.subr.bf16.mxu1 %v8283_v12 }
 0x437   :  { %6984 = vmatmul.mubr.msk.f32.vlgmr.msra.gmra.mrb[14].mxu0 %vm62_vm1, %v1379_v7  ;;  %6995 = vmatmul.mubr.msk.f32.vlgmr.msra.gmra.mrb[20].mxu1 %vm62_vm1, %v1379_v7 }
 0x438   :  { %7665 = vmatpush3.bf16.msra.mxu0 %v8383_v13  ;;  %7671 = vmatpush3.bf16.msra.mxu1 %v8503_v60 }
 0x439   :  { %7666 = vmatprep.subr.bf16.mxu0 %v8283_v12  ;;  %7672 = vmatprep.subr.bf16.mxu1 %v8283_v12 }
 0x43a   :  { %7005 = vmatprep.mubr.msk.f32.mxu0 %vm8284_vm0, %v8285_v15  ;;  %7016 = vmatprep.mubr.msk.f32.mxu1 %vm8284_vm0, %v8285_v15 }
 0x43c   :  { %7668 = vmatpush3.bf16.msra.mxu0 %v8391_v16  ;;  %7674 = vmatpush3.bf16.msra.mxu1 %v8514_v63 }
 0x43d   :  { %7675 = vmatprep.subr.bf16.mxu0 %v8283_v12  ;;  %7681 = vmatprep.subr.bf16.mxu1 %v8283_v12 }
 0x4f2   :  { %v1101_v9 = vpop.f32.mrb[8].mxu0  ;;  %v1175_v47 = vpop.f32.mrb[14].mxu1 }
 0x4f3   :  { %v6919_v51 = vpop.f32.mrb[9].mxu0  ;;  %v6930_v10 = vpop.f32.mrb[15].mxu1  ;;  %v1180_v48 = vrot.slane %v1175_v47, 6  ;;  %v1106_v54 = vrot.slane %v1101_v9, 6 }
 0x4f5   :  { %v1108_v55 = vadd.f32 %v1106_v54, %v8602_v30 }
 0x4f7   :  { %v6349_v56 = vmul.f32 -1.442695, %v1108_v55 }
 0x4fa   :  { %v1251_v14 = vpop.f32.mrb[10].mxu0  ;;  %v1327_v17 = vpop.f32.mrb[16].mxu1 }
 0x4fb   :  { %v1256_v19 = vrot.slane %v1251_v14, 6  ;;  %v6941_v20 = vpop.f32.mrb[11].mxu0  ;;  %v6952_v23 = vpop.f32.mrb[17].mxu1  ;;  %v1332_v9 = vrot.slane %v1327_v17, 6 }
 0x4fd   :  { %1257 = vrot.lane.b32.xlu0 %v1256_v19, %s8286_s14 }
 0x502   :  { %v1448_v24 = vpop.f32.mrb[12].mxu0  ;;  %v1522_v26 = vpop.f32.mrb[18].mxu1 }
 0x503   :  { %v6963_v29 = vpop.f32.mrb[13].mxu0  ;;  %v6974_v32 = vpop.f32.mrb[19].mxu1  ;;  %v1527_v53 = vrot.slane %v1522_v26, 4  ;;  %v1453_v57 = vrot.slane %v1448_v24, 4 }
 0x505   :  { %v1455_v58 = vadd.f32 %v1453_v57, %v8608_v38 }
 0x507   :  { %v6356_v61 = vmul.f32 -1.442695, %v1455_v58 }
 0x50a   :  { %v1598_v33 = vpop.f32.mrb[14].mxu0  ;;  %v1674_v35 = vpop.f32.mrb[20].mxu1 }
 0x50b   :  { %v1603_v36 = vrot.slane %v1598_v33, 4  ;;  %v6985_v39 = vpop.f32.mrb[15].mxu0  ;;  %v6996_v42 = vpop.f32.mrb[21].mxu1  ;;  %v1679_v19 = vrot.slane %v1674_v35, 4 }
 0x50c   :  { %v1344_v42 = vrot.slane %v8627_v41, 6 }
 0x50d   :  { %1604 = vrot.lane.b32.xlu1 %v1603_v36, %s8286_s14 }
 0x56f   :  { %v1258_v43 = vpop.permute.xlu0 %1257 }
 0x570   :  { %v1260_v45 = vadd.f32 %v1258_v43, %v8602_v30 }
 0x572   :  { %8012 = vtanh.f32 %v1260_v45 }
 0x57c   :  { %v8013_v46 = vpop.eup %8012 }
 0x57d   :  { %1355 = vrot.lane.b32.xlu0 %v8013_v46, %s8286_s14 }
 0x57f   :  { %v1605_v49 = vpop.permute.xlu1 %1604 }
 0x580   :  { %v1607_v50 = vadd.f32 %v1605_v49, %v8608_v38 }
 0x581   :  { %1181 = vrot.lane.b32.xlu0 %v1180_v48, %s8287_s4 }
 0x582   :  { %8014 = vtanh.f32 %v1607_v50  ;;  %v1691_v50 = vrot.slane %v8630_v44, 2 }
 0x583   :  { %8016 = vpow2.f32 %v6349_v56 }
 0x584   :  { %8018 = vpow2.f32 %v6356_v61 }
 0x58c   :  { %v8015_v52 = vpop.eup %8014 }
 0x58d   :  { %1702 = vrot.lane.b32.xlu1 %v8015_v52, %s8286_s14  ;;  %v8017_v59 = vpop.eup %8016 }
 0x58e   :  { %v1350_v0 = vadd.f32 1.0, %v8017_v59  ;;  %v8019_v1 = vpop.eup %8018 }
 0x58f   :  { %v1697_v47 = vadd.f32 1.0, %v8019_v1 }
 0x590   :  { %8020 = vrcp.f32 %v1350_v0 }
 0x591   :  { %1528 = vrot.lane.b32.xlu1 %v1527_v53, %s8287_s4  ;;  %8022 = vrcp.f32 %v1697_v47 }
 0x59a   :  { %v8021_v4 = vpop.eup %8020 }
 0x59b   :  { %v8023_v51 = vpop.eup %8022 }
 0x5ef   :  { %v1356_v6 = vpop.permute.xlu0 %1355 }
 0x5f0   :  { %v1358_v7 = vmul.f32 %v8021_v4, %v1356_v6 }
 0x5f2   :  { %1360 = vrot.lane.b32.xlu0 %v1358_v7, %s8287_s4 }
 0x5f3   :  { %v1182_v20 = vpop.permute.xlu0 %1181 }
 0x5f4   :  { %v1184_v23 = vadd.f32 %v1182_v20, %v8602_v30 }
 0x5f6   :  { %1333 = vrot.lane.b32.xlu0 %v1332_v9, %s8288_s7  ;;  %v6348_v24 = vmul.f32 -1.442695, %v1184_v23 }
 0x5f8   :  { %8024 = vpow2.f32 %v6348_v24 }
 0x5ff   :  { %v1703_v10 = vpop.permute.xlu1 %1702 }
 0x600   :  { %v1705_v14 = vmul.f32 %v8023_v51, %v1703_v10 }
 0x602   :  { %1707 = vrot.lane.b32.xlu1 %v1705_v14, %s8287_s4  ;;  %v8025_v17 = vpop.eup %8024 }
 0x603   :  { %v1529_v26 = vpop.permute.xlu1 %1528  ;;  %v1340_v33 = vadd.f32 1.0, %v8025_v17 }
 0x604   :  { %v1531_v29 = vadd.f32 %v1529_v26, %v8608_v38 }
 0x606   :  { %1680 = vrot.lane.b32.xlu1 %v1679_v19, %s8288_s7  ;;  %v6355_v32 = vmul.f32 -1.442695, %v1531_v29 }
 0x608   :  { %8026 = vpow2.f32 %v6355_v32 }
 0x609   :  { %8028 = vrcp.f32 %v1340_v33 }
 0x612   :  { %v8027_v36 = vpop.eup %8026 }
 0x613   :  { %v8029_v39 = vpop.eup %8028  ;;  %v1687_v35 = vadd.f32 1.0, %v8027_v36 }
 0x614   :  { %v1346_v43 = vmul.f32 %v8029_v39, %v1344_v42 }
 0x615   :  { %8030 = vrcp.f32 %v1687_v35 }
 0x61f   :  { %v8031_v48 = vpop.eup %8030 }
 0x620   :  { %v1693_v52 = vmul.f32 %v8031_v48, %v1691_v50 }
 0x664   :  { %v1361_v45 = vpop.permute.xlu0 %1360 }
 0x665   :  { %v8718_v46 = vadd.f32 %v1361_v45, %v1346_v43 }
 0x667   :  { %8032 = vtanh.f32 %v8718_v46 }
 0x668   :  { %v1334_v55 = vpop.permute.xlu0 %1333 }
 0x669   :  { %v1336_v56 = vadd.f32 %v1334_v55, %v8602_v30 }
 0x66b   :  { %v6350_v57 = vmul.f32 -1.442695, %v1336_v56 }
 0x671   :  { %v8033_v49 = vpop.eup %8032 }
 0x672   :  { %1372 = vrot.lane.b32.xlu0 %v8033_v49, %s8286_s14 }
 0x674   :  { %v1708_v53 = vpop.permute.xlu1 %1707 }
 0x675   :  { %v8723_v54 = vadd.f32 %v1708_v53, %v1693_v52 }
 0x677   :  { %8034 = vtanh.f32 %v8723_v54 }
 0x678   :  { %8036 = vpow2.f32 %v6350_v57  ;;  %v1681_v58 = vpop.permute.xlu1 %1680 }
 0x679   :  { %v1683_v59 = vadd.f32 %v1681_v58, %v8608_v38 }
 0x67b   :  { %v6357_v61 = vmul.f32 -1.442695, %v1683_v59 }
 0x67d   :  { %8038 = vpow2.f32 %v6357_v61 }
 0x681   :  { %v8035_v41 = vpop.eup %8034 }
 0x682   :  { %1719 = vrot.lane.b32.xlu1 %v8035_v41, %s8286_s14  ;;  %v8037_v44 = vpop.eup %8036 }
 0x683   :  { %v1367_v0 = vadd.f32 1.0, %v8037_v44 }
 0x685   :  { %8040 = vrcp.f32 %v1367_v0 }
 0x687   :  { %v8039_v1 = vpop.eup %8038 }
 0x688   :  { %v1714_v47 = vadd.f32 1.0, %v8039_v1 }
 0x68a   :  { %8042 = vrcp.f32 %v1714_v47 }
 0x68f   :  { %v8041_v4 = vpop.eup %8040 }
 0x694   :  { %v8043_v51 = vpop.eup %8042 }
 0x6e4   :  { %v1373_v6 = vpop.permute.xlu0 %1372 }
 0x6e5   :  { %v8729_v7 = vmul.f32 %v8041_v4, %v1373_v6 }
 0x6e7   :  { %v1724_v9 = vrot.slane %v8729_v7, 2 }
 0x6e9   :  { %1725 = vrot.lane.b32.xlu0 %v1724_v9, %s8287_s4 }
 0x6f4   :  { %v1720_v10 = vpop.permute.xlu1 %1719 }
 0x6f5   :  { %v8733_v14 = vmul.f32 %v8043_v51, %v1720_v10 }
 0x6f7   :  { %v2071_v19 = vrot.slane %v8733_v14, 4 }
 0x6f9   :  { %2072 = vrot.lane.b32.xlu1 %v2071_v19, %s8287_s4 }
 0x75b   :  { %v1726_v20 = vpop.permute.xlu0 %1725 }
 0x75c   :  { %7006 = vmatmul.mubr.msk.f32.vlgmr.msra.gmra.mrb[16].mxu0 %vm62_vm1, %v1726_v20  ;;  %7017 = vmatmul.mubr.msk.f32.vlgmr.msra.gmra.mrb[22].mxu1 %vm62_vm1, %v1726_v20 }
 0x75d   :  { %7677 = vmatpush3.bf16.msra.mxu0 %v8407_v22  ;;  %7683 = vmatpush3.bf16.msra.mxu1 %v8526_v2 }
 0x75e   :  { %7678 = vmatprep.subr.bf16.mxu0 %v8283_v12  ;;  %7684 = vmatprep.subr.bf16.mxu1 %v8283_v12 }
 0x75f   :  { %7027 = vmatprep.mubr.msk.f32.mxu0 %vm8284_vm0, %v8285_v15  ;;  %7038 = vmatprep.mubr.msk.f32.mxu1 %vm8284_vm0, %v8285_v15 }
 0x761   :  { %7680 = vmatpush3.bf16.msra.mxu0 %v8418_v25  ;;  %7686 = vmatpush3.bf16.msra.mxu1 %v8537_v5 }
 0x762   :  { %7687 = vmatprep.subr.bf16.mxu0 %v8283_v12  ;;  %7693 = vmatprep.subr.bf16.mxu1 %v8283_v12 }
 0x764   :  { %7028 = vmatmul.mubr.msk.f32.vlgmr.msra.gmra.mrb[18].mxu0 %vm62_vm1, %v1726_v20  ;;  %7039 = vmatmul.mubr.msk.f32.vlgmr.msra.gmra.mrb[24].mxu1 %vm62_vm1, %v1726_v20 }
 0x765   :  { %7689 = vmatpush3.bf16.msra.mxu0 %v8430_v28  ;;  %7695 = vmatpush3.bf16.msra.mxu1 %v8549_v8 }
 0x766   :  { %7690 = vmatprep.subr.bf16.mxu0 %v8283_v12  ;;  %7696 = vmatprep.subr.bf16.mxu1 %v8283_v12 }
 0x767   :  { %7049 = vmatprep.mubr.msk.f32.mxu0 %vm8284_vm0, %v8285_v15  ;;  %7060 = vmatprep.mubr.msk.f32.mxu1 %vm8284_vm0, %v8285_v15 }
 0x769   :  { %7692 = vmatpush3.bf16.msra.mxu0 %v8441_v31  ;;  %7698 = vmatpush3.bf16.msra.mxu1 %v8560_v11 }
 0x76a   :  { %7699 = vmatprep.subr.bf16.mxu0 %v8283_v12  ;;  %7705 = vmatprep.subr.bf16.mxu1 %v8283_v12 }
 0x76b   :  { %v2073_v23 = vpop.permute.xlu1 %2072 }
 0x76c   :  { %7050 = vmatmul.mubr.msk.f32.vlgmr.msra.gmra.mrb[20].mxu0 %vm62_vm1, %v2073_v23  ;;  %7061 = vmatmul.mubr.msk.f32.vlgmr.msra.gmra.mrb[26].mxu1 %vm62_vm1, %v2073_v23 }
 0x76d   :  { %7701 = vmatpush3.bf16.msra.mxu0 %v8453_v34  ;;  %7707 = vmatpush3.bf16.msra.mxu1 %v8572_v18 }
 0x76e   :  { %7702 = vmatprep.subr.bf16.mxu0 %v8283_v12  ;;  %7708 = vmatprep.subr.bf16.mxu1 %v8283_v12 }
 0x76f   :  { %7071 = vmatprep.mubr.msk.f32.mxu0 %vm8284_vm0, %v8285_v15  ;;  %7082 = vmatprep.mubr.msk.f32.mxu1 %vm8284_vm0, %v8285_v15 }
 0x771   :  { %7704 = vmatpush3.bf16.msra.mxu0 %v8464_v37  ;;  %7710 = vmatpush3.bf16.msra.mxu1 %v8583_v21 }
 0x772   :  { %7711 = vmatprep.subr.bf16.mxu0 %v8283_v12  ;;  %7717 = vmatprep.subr.bf16.mxu1 %v8283_v12 }
 0x774   :  { %7072 = vmatmul.mubr.msk.f32.vlgmr.msra.gmra.mrb[22].mxu0 %vm62_vm1, %v2073_v23  ;;  %7083 = vmatmul.mubr.msk.f32.vlgmr.msra.gmra.mrb[28].mxu1 %vm62_vm1, %v2073_v23 }
 0x775   :  { %7713 = vmatpush3.bf16.msra.mxu0 %v8383_v13  ;;  %7719 = vmatpush3.bf16.msra.mxu1 %v8503_v60 }
 0x776   :  { %7714 = vmatprep.subr.bf16.mxu0 %v8283_v12  ;;  %7720 = vmatprep.subr.bf16.mxu1 %v8283_v12 }
 0x777   :  { %7093 = vmatprep.mubr.msk.f32.mxu0 %vm8284_vm0, %v8285_v15  ;;  %7104 = vmatprep.mubr.msk.f32.mxu1 %vm8284_vm0, %v8285_v15 }
 0x779   :  { %7716 = vmatpush3.bf16.msra.mxu0 %v8391_v16  ;;  %7722 = vmatpush3.bf16.msra.mxu1 %v8514_v63 }
 0x77a   :  { %7723 = vmatprep.subr.bf16.mxu0 %v8283_v12  ;;  %7729 = vmatprep.subr.bf16.mxu1 %v8283_v12 }
 0x82f   :  { %v1795_v24 = vpop.f32.mrb[16].mxu0  ;;  %v1869_v26 = vpop.f32.mrb[22].mxu1 }
 0x830   :  { %v7007_v29 = vpop.f32.mrb[17].mxu0  ;;  %v7018_v17 = vpop.f32.mrb[23].mxu1  ;;  %v1874_v58 = vrot.slane %v1869_v26, 4  ;;  %v1800_v1 = vrot.slane %v1795_v24, 4 }
 0x832   :  { %v1802_v4 = vadd.f32 %v1800_v1, %v8602_v30 }
 0x834   :  { %v6363_v6 = vmul.f32 -1.442695, %v1802_v4 }
 0x837   :  { %v1945_v32 = vpop.f32.mrb[18].mxu0  ;;  %v2021_v33 = vpop.f32.mrb[24].mxu1 }
 0x838   :  { %v1950_v36 = vrot.slane %v1945_v32, 4  ;;  %v7029_v39 = vpop.f32.mrb[19].mxu0  ;;  %v7040_v42 = vpop.f32.mrb[25].mxu1  ;;  %v2026_v24 = vrot.slane %v2021_v33, 4 }
 0x83a   :  { %1951 = vrot.lane.b32.xlu0 %v1950_v36, %s8286_s14 }
 0x83f   :  { %v2142_v35 = vpop.f32.mrb[20].mxu0  ;;  %v2216_v43 = vpop.f32.mrb[26].mxu1 }
 0x840   :  { %v7051_v45 = vpop.f32.mrb[21].mxu0  ;;  %v7062_v48 = vpop.f32.mrb[27].mxu1  ;;  %v2221_v0 = vrot.slane %v2216_v43, 6  ;;  %v2147_v47 = vrot.slane %v2142_v35, 6 }
 0x842   :  { %v2149_v9 = vadd.f32 %v2147_v47, %v8608_v38 }
 0x844   :  { %v6370_v10 = vmul.f32 -1.442695, %v2149_v9 }
 0x847   :  { %v2292_v49 = vpop.f32.mrb[22].mxu0  ;;  %v2368_v50 = vpop.f32.mrb[28].mxu1 }
 0x848   :  { %v2297_v52 = vrot.slane %v2292_v49, 6  ;;  %v7073_v53 = vpop.f32.mrb[23].mxu0  ;;  %v7084_v41 = vpop.f32.mrb[29].mxu1  ;;  %v2373_v42 = vrot.slane %v2368_v50, 6 }
 0x84a   :  { %2298 = vrot.lane.b32.xlu1 %v2297_v52, %s8286_s14 }
 0x8ac   :  { %v1952_v55 = vpop.permute.xlu0 %1951 }
 0x8ad   :  { %v1954_v56 = vadd.f32 %v1952_v55, %v8602_v30 }
 0x8af   :  { %8044 = vtanh.f32 %v1954_v56  ;;  %v2038_v56 = vrot.slane %v8718_v46, 6 }
 0x8b9   :  { %v8045_v57 = vpop.eup %8044 }
 0x8ba   :  { %2049 = vrot.lane.b32.xlu0 %v8045_v57, %s8286_s14 }
 0x8bc   :  { %v2299_v59 = vpop.permute.xlu1 %2298 }
 0x8bd   :  { %v2301_v44 = vadd.f32 %v2299_v59, %v8608_v38 }
 0x8be   :  { %1875 = vrot.lane.b32.xlu0 %v1874_v58, %s8287_s4 }
 0x8bf   :  { %8046 = vtanh.f32 %v2301_v44 }
 0x8c0   :  { %8048 = vpow2.f32 %v6363_v6 }
 0x8c1   :  { %8050 = vpow2.f32 %v6370_v10 }
 0x8c9   :  { %v8047_v61 = vpop.eup %8046 }
 0x8ca   :  { %2396 = vrot.lane.b32.xlu1 %v8047_v61, %s8286_s14  ;;  %v8049_v51 = vpop.eup %8048 }
 0x8cb   :  { %v2044_v19 = vadd.f32 1.0, %v8049_v51  ;;  %v8051_v20 = vpop.eup %8050 }
 0x8cc   :  { %v2391_v17 = vadd.f32 1.0, %v8051_v20 }
 0x8cd   :  { %8052 = vrcp.f32 %v2044_v19 }
 0x8ce   :  { %2222 = vrot.lane.b32.xlu1 %v2221_v0, %s8287_s4  ;;  %8054 = vrcp.f32 %v2391_v17  ;;  %v2385_v0 = vrot.slane %v8723_v54, 2 }
 0x8d7   :  { %v8053_v23 = vpop.eup %8052 }
 0x8d8   :  { %v8055_v32 = vpop.eup %8054 }
 0x92c   :  { %v2050_v26 = vpop.permute.xlu0 %2049 }
 0x92d   :  { %v2052_v29 = vmul.f32 %v8053_v23, %v2050_v26 }
 0x92f   :  { %2054 = vrot.lane.b32.xlu0 %v2052_v29, %s8287_s4 }
 0x930   :  { %v1876_v35 = vpop.permute.xlu0 %1875 }
 0x931   :  { %v1878_v43 = vadd.f32 %v1876_v35, %v8602_v30 }
 0x933   :  { %2027 = vrot.lane.b32.xlu0 %v2026_v24, %s8288_s7  ;;  %v6362_v45 = vmul.f32 -1.442695, %v1878_v43 }
 0x935   :  { %8056 = vpow2.f32 %v6362_v45 }
 0x93c   :  { %v2397_v36 = vpop.permute.xlu1 %2396 }
 0x93d   :  { %v2399_v39 = vmul.f32 %v8055_v32, %v2397_v36 }
 0x93f   :  { %2401 = vrot.lane.b32.xlu1 %v2399_v39, %s8287_s4  ;;  %v8057_v33 = vpop.eup %8056 }
 0x940   :  { %v2223_v48 = vpop.permute.xlu1 %2222  ;;  %v2034_v53 = vadd.f32 1.0, %v8057_v33 }
 0x941   :  { %v2225_v49 = vadd.f32 %v2223_v48, %v8608_v38 }
 0x943   :  { %2374 = vrot.lane.b32.xlu1 %v2373_v42, %s8288_s7  ;;  %v6369_v52 = vmul.f32 -1.442695, %v2225_v49 }
 0x945   :  { %8058 = vpow2.f32 %v6369_v52 }
 0x946   :  { %8060 = vrcp.f32 %v2034_v53 }
 0x94f   :  { %v8059_v41 = vpop.eup %8058 }
 0x950   :  { %v8061_v55 = vpop.eup %8060  ;;  %v2381_v50 = vadd.f32 1.0, %v8059_v41 }
 0x951   :  { %v2040_v57 = vmul.f32 %v8061_v55, %v2038_v56 }
 0x952   :  { %8062 = vrcp.f32 %v2381_v50 }
 0x95c   :  { %v8063_v44 = vpop.eup %8062 }
 0x95d   :  { %v2387_v1 = vmul.f32 %v8063_v44, %v2385_v0 }
 0x9a1   :  { %v2055_v58 = vpop.permute.xlu0 %2054 }
 0x9a2   :  { %v8810_v59 = vadd.f32 %v2055_v58, %v2040_v57 }
 0x9a4   :  { %8064 = vtanh.f32 %v8810_v59 }
 0x9a5   :  { %v2028_v47 = vpop.permute.xlu0 %2027 }
 0x9a6   :  { %v2030_v9 = vadd.f32 %v2028_v47, %v8602_v30 }
 0x9a8   :  { %v6364_v51 = vmul.f32 -1.442695, %v2030_v9 }
 0x9ae   :  { %v8065_v61 = vpop.eup %8064 }
 0x9af   :  { %2066 = vrot.lane.b32.xlu0 %v8065_v61, %s8286_s14 }
 0x9b1   :  { %v2402_v4 = vpop.permute.xlu1 %2401 }
 0x9b2   :  { %v8815_v6 = vadd.f32 %v2402_v4, %v2387_v1 }
 0x9b4   :  { %8066 = vtanh.f32 %v8815_v6 }
 0x9b5   :  { %8068 = vpow2.f32 %v6364_v51  ;;  %v2375_v10 = vpop.permute.xlu1 %2374 }
 0x9b6   :  { %v2377_v19 = vadd.f32 %v2375_v10, %v8608_v38 }
 0x9b8   :  { %v6371_v20 = vmul.f32 -1.442695, %v2377_v19 }
 0x9ba   :  { %8070 = vpow2.f32 %v6371_v20 }
 0x9be   :  { %v8067_v46 = vpop.eup %8066 }
 0x9bf   :  { %2413 = vrot.lane.b32.xlu1 %v8067_v46, %s8286_s14  ;;  %v8069_v54 = vpop.eup %8068 }
 0x9c0   :  { %v2061_v23 = vadd.f32 1.0, %v8069_v54 }
 0x9c2   :  { %8072 = vrcp.f32 %v2061_v23 }
 0x9c4   :  { %v8071_v26 = vpop.eup %8070 }
 0x9c5   :  { %v2408_v32 = vadd.f32 1.0, %v8071_v26 }
 0x9c7   :  { %8074 = vrcp.f32 %v2408_v32 }
 0x9cc   :  { %v8073_v29 = vpop.eup %8072 }
 0x9d1   :  { %v8075_v39 = vpop.eup %8074 }
 0xa21   :  { %v2067_v17 = vpop.permute.xlu0 %2066 }
 0xa22   :  { %v8821_v24 = vmul.f32 %v8073_v29, %v2067_v17 }
 0xa24   :  { %v2418_v36 = vrot.slane %v8821_v24, 4 }
 0xa26   :  { %2419 = vrot.lane.b32.xlu0 %v2418_v36, %s8287_s4 }
 0xa31   :  { %v2414_v42 = vpop.permute.xlu1 %2413 }
 0xa32   :  { %v8825_v35 = vmul.f32 %v8075_v39, %v2414_v42 }
 0xa34   :  { %v2765_v43 = vrot.slane %v8825_v35, 2 }
 0xa36   :  { %2766 = vrot.lane.b32.xlu1 %v2765_v43, %s8287_s4 }
 0xa98   :  { %v2420_v45 = vpop.permute.xlu0 %2419 }
 0xa99   :  { %7094 = vmatmul.mubr.msk.f32.vlgmr.msra.gmra.mrb[24].mxu0 %vm62_vm1, %v2420_v45  ;;  %7105 = vmatmul.mubr.msk.f32.vlgmr.msra.gmra.mrb[30].mxu1 %vm62_vm1, %v2420_v45 }
 0xa9a   :  { %7725 = vmatpush3.bf16.msra.mxu0 %v8407_v22  ;;  %7731 = vmatpush3.bf16.msra.mxu1 %v8526_v2 }
 0xa9b   :  { %7726 = vmatprep.subr.bf16.mxu0 %v8283_v12  ;;  %7732 = vmatprep.subr.bf16.mxu1 %v8283_v12 }
 0xa9c   :  { %7115 = vmatprep.mubr.msk.f32.mxu0 %vm8284_vm0, %v8285_v15  ;;  %7126 = vmatprep.mubr.msk.f32.mxu1 %vm8284_vm0, %v8285_v15 }
 0xa9e   :  { %7728 = vmatpush3.bf16.msra.mxu0 %v8418_v25  ;;  %7734 = vmatpush3.bf16.msra.mxu1 %v8537_v5 }
 0xa9f   :  { %7735 = vmatprep.subr.bf16.mxu0 %v8283_v12  ;;  %7741 = vmatprep.subr.bf16.mxu1 %v8283_v12 }
 0xaa1   :  { %7116 = vmatmul.mubr.msk.f32.vlgmr.msra.gmra.mrb[26].mxu0 %vm62_vm1, %v2420_v45  ;;  %7127 = vmatmul.mubr.msk.f32.vlgmr.msra.gmra.mrb[32].mxu1 %vm62_vm1, %v2420_v45 }
 0xaa2   :  { %7737 = vmatpush3.bf16.msra.mxu0 %v8430_v28  ;;  %7743 = vmatpush3.bf16.msra.mxu1 %v8549_v8 }
 0xaa3   :  { %7738 = vmatprep.subr.bf16.mxu0 %v8283_v12  ;;  %7744 = vmatprep.subr.bf16.mxu1 %v8283_v12 }
 0xaa4   :  { %7137 = vmatprep.mubr.msk.f32.mxu0 %vm8284_vm0, %v8285_v15  ;;  %7148 = vmatprep.mubr.msk.f32.mxu1 %vm8284_vm0, %v8285_v15 }
 0xaa6   :  { %7740 = vmatpush3.bf16.msra.mxu0 %v8441_v31  ;;  %7746 = vmatpush3.bf16.msra.mxu1 %v8560_v11 }
 0xaa7   :  { %7747 = vmatprep.subr.bf16.mxu0 %v8283_v12  ;;  %7753 = vmatprep.subr.bf16.mxu1 %v8283_v12 }
 0xaa8   :  { %v2767_v48 = vpop.permute.xlu1 %2766 }
 0xaa9   :  { %7138 = vmatmul.mubr.msk.f32.vlgmr.msra.gmra.mrb[28].mxu0 %vm62_vm1, %v2767_v48  ;;  %7149 = vmatmul.mubr.msk.f32.vlgmr.msra.gmra.mrb[34].mxu1 %vm62_vm1, %v2767_v48 }
 0xaaa   :  { %7749 = vmatpush3.bf16.msra.mxu0 %v8453_v34  ;;  %7755 = vmatpush3.bf16.msra.mxu1 %v8572_v18 }
 0xaab   :  { %7750 = vmatprep.subr.bf16.mxu0 %v8283_v12  ;;  %7756 = vmatprep.subr.bf16.mxu1 %v8283_v12 }
 0xaac   :  { %7159 = vmatprep.mubr.msk.f32.mxu0 %vm8284_vm0, %v8285_v15  ;;  %7170 = vmatprep.mubr.msk.f32.mxu1 %vm8284_vm0, %v8285_v15 }
 0xaae   :  { %7752 = vmatpush3.bf16.msra.mxu0 %v8464_v37  ;;  %7758 = vmatpush3.bf16.msra.mxu1 %v8583_v21 }
 0xaaf   :  { %7759 = vmatprep.subr.bf16.mxu0 %v8283_v12  ;;  %7765 = vmatprep.subr.bf16.mxu1 %v8283_v12 }
 0xab1   :  { %7160 = vmatmul.mubr.msk.f32.vlgmr.msra.gmra.mrb[30].mxu0 %vm62_vm1, %v2767_v48  ;;  %7171 = vmatmul.mubr.msk.f32.vlgmr.msra.gmra.mrb[36].mxu1 %vm62_vm1, %v2767_v48 }
 0xab2   :  { %7761 = vmatpush3.bf16.msra.mxu0 %v8383_v13  ;;  %7767 = vmatpush3.bf16.msra.mxu1 %v8503_v60 }
 0xab3   :  { %7762 = vmatprep.subr.bf16.mxu0 %v8283_v12  ;;  %7768 = vmatprep.subr.bf16.mxu1 %v8283_v12 }
 0xab4   :  { %7181 = vmatprep.mubr.msk.f32.mxu0 %vm8284_vm0, %v8285_v15  ;;  %7192 = vmatprep.mubr.msk.f32.mxu1 %vm8284_vm0, %v8285_v15 }
 0xab6   :  { %7764 = vmatpush3.bf16.msra.mxu0 %v8391_v16  ;;  %7770 = vmatpush3.bf16.msra.mxu1 %v8514_v63 }
 0xab7   :  { %7771 = vmatprep.subr.bf16.mxu0 %v8283_v12  ;;  %7777 = vmatprep.subr.bf16.mxu1 %v8283_v12 }
 0xb6c   :  { %v2489_v49 = vpop.f32.mrb[24].mxu0  ;;  %v2563_v33 = vpop.f32.mrb[30].mxu1 }
 0xb6d   :  { %v7095_v52 = vpop.f32.mrb[25].mxu0  ;;  %v7106_v53 = vpop.f32.mrb[31].mxu1  ;;  %v2568_v20 = vrot.slane %v2563_v33, 2  ;;  %v2494_v26 = vrot.slane %v2489_v49, 2 }
 0xb6f   :  { %v2496_v29 = vadd.f32 %v2494_v26, %v8602_v30 }
 0xb71   :  { %v6377_v17 = vmul.f32 -1.442695, %v2496_v29 }
 0xb74   :  { %v2639_v41 = vpop.f32.mrb[26].mxu0  ;;  %v2715_v55 = vpop.f32.mrb[32].mxu1 }
 0xb75   :  { %v2644_v56 = vrot.slane %v2639_v41, 2  ;;  %v7117_v50 = vpop.f32.mrb[27].mxu0  ;;  %v7128_v57 = vpop.f32.mrb[33].mxu1  ;;  %v2720_v49 = vrot.slane %v2715_v55, 2 }
 0xb77   :  { %2645 = vrot.lane.b32.xlu0 %v2644_v56, %s8286_s14 }
 0xb7c   :  { %v2836_v58 = vpop.f32.mrb[28].mxu0  ;;  %v2907_v44 = vpop.f32.mrb[34].mxu1 }
 0xb7d   :  { %v7139_v61 = vpop.f32.mrb[29].mxu0  ;;  %v7150_v0 = vpop.f32.mrb[35].mxu1  ;;  %v2840_v32 = vadd.f32 %v2836_v58, %v8608_v38 }
 0xb7f   :  { %v6384_v39 = vmul.f32 -1.442695, %v2840_v32 }
 0xb84   :  { %v2982_v1 = vpop.f32.mrb[30].mxu0  ;;  %v3057_v4 = vpop.f32.mrb[36].mxu1 }
 0xb85   :  { %v7172_v46 = vpop.f32.mrb[37].mxu1  ;;  %2987 = vrot.lane.b32.xlu1 %v2982_v1, %s8286_s14  ;;  %v7161_v47 = vpop.f32.mrb[31].mxu0 }
 0xbe9   :  { %v2646_v9 = vpop.permute.xlu0 %2645 }
 0xbea   :  { %v2648_v51 = vadd.f32 %v2646_v9, %v8602_v30 }
 0xbec   :  { %8076 = vtanh.f32 %v2648_v51  ;;  %v2732_v51 = vrot.slane %v8810_v59, 6 }
 0xbf6   :  { %v8077_v10 = vpop.eup %8076 }
 0xbf7   :  { %2743 = vrot.lane.b32.xlu0 %v8077_v10, %s8286_s14  ;;  %v2988_v19 = vpop.permute.xlu1 %2987 }
 0xbf8   :  { %v2990_v54 = vadd.f32 %v2988_v19, %v8608_v38 }
 0xbfa   :  { %8078 = vtanh.f32 %v2990_v54 }
 0xbfb   :  { %2569 = vrot.lane.b32.xlu0 %v2568_v20, %s8287_s4  ;;  %8080 = vpow2.f32 %v6377_v17  ;;  %v3073_v20 = vrot.slane %v8815_v6, 2 }
 0xbfc   :  { %8082 = vpow2.f32 %v6384_v39 }
 0xc04   :  { %v8079_v23 = vpop.eup %8078 }
 0xc05   :  { %3084 = vrot.lane.b32.xlu1 %v8079_v23, %s8286_s14  ;;  %v8081_v36 = vpop.eup %8080 }
 0xc06   :  { %v2738_v42 = vadd.f32 1.0, %v8081_v36  ;;  %v8083_v43 = vpop.eup %8082 }
 0xc07   :  { %v3079_v48 = vadd.f32 1.0, %v8083_v43 }
 0xc08   :  { %8084 = vrcp.f32 %v2738_v42 }
 0xc09   :  { %2912 = vrot.lane.b32.xlu1 %v2907_v44, %s8287_s4  ;;  %8086 = vrcp.f32 %v3079_v48 }
 0xc12   :  { %v8085_v45 = vpop.eup %8084 }
 0xc13   :  { %v8087_v53 = vpop.eup %8086 }
 0xc69   :  { %v2744_v33 = vpop.permute.xlu0 %2743 }
 0xc6a   :  { %v2746_v52 = vmul.f32 %v8085_v45, %v2744_v33 }
 0xc6c   :  { %2748 = vrot.lane.b32.xlu0 %v2746_v52, %s8287_s4 }
 0xc6d   :  { %v2570_v50 = vpop.permute.xlu0 %2569 }
 0xc6e   :  { %v2572_v57 = vadd.f32 %v2570_v50, %v8602_v30 }
 0xc70   :  { %2721 = vrot.lane.b32.xlu0 %v2720_v49, %s8288_s7  ;;  %v6376_v58 = vmul.f32 -1.442695, %v2572_v57 }
 0xc72   :  { %8088 = vpow2.f32 %v6376_v58 }
 0xc77   :  { %v3085_v41 = vpop.permute.xlu1 %3084 }
 0xc78   :  { %v3087_v56 = vmul.f32 %v8087_v53, %v3085_v41 }
 0xc7a   :  { %3089 = vrot.lane.b32.xlu1 %v3087_v56, %s8287_s4 }
 0xc7b   :  { %v2913_v44 = vpop.permute.xlu1 %2912 }
 0xc7c   :  { %v2915_v61 = vadd.f32 %v2913_v44, %v8608_v38  ;;  %v8089_v0 = vpop.eup %8088 }
 0xc7d   :  { %v2728_v55 = vadd.f32 1.0, %v8089_v0 }
 0xc7e   :  { %3062 = vrot.lane.b32.xlu1 %v3057_v4, %s8288_s7  ;;  %v6383_v1 = vmul.f32 -1.442695, %v2915_v61 }
 0xc80   :  { %8090 = vpow2.f32 %v6383_v1 }
 0xc81   :  { %8092 = vrcp.f32 %v2728_v55 }
 0xc8a   :  { %v8091_v46 = vpop.eup %8090 }
 0xc8b   :  { %v8093_v47 = vpop.eup %8092  ;;  %v3069_v9 = vadd.f32 1.0, %v8091_v46 }
 0xc8c   :  { %v2734_v10 = vmul.f32 %v8093_v47, %v2732_v51 }
 0xc8d   :  { %8094 = vrcp.f32 %v3069_v9 }
 0xc97   :  { %v8095_v54 = vpop.eup %8094 }
 0xc98   :  { %v3075_v26 = vmul.f32 %v8095_v54, %v3073_v20 }
 0xcde   :  { %v2749_v4 = vpop.permute.xlu0 %2748 }
 0xcdf   :  { %v8902_v19 = vadd.f32 %v2749_v4, %v2734_v10 }
 0xce1   :  { %8096 = vtanh.f32 %v8902_v19 }
 0xce2   :  { %v2722_v32 = vpop.permute.xlu0 %2721 }
 0xce3   :  { %v2724_v36 = vadd.f32 %v2722_v32, %v8602_v30 }
 0xce5   :  { %v6378_v39 = vmul.f32 -1.442695, %v2724_v36 }
 0xceb   :  { %v8097_v23 = vpop.eup %8096 }
 0xcec   :  { %2760 = vrot.lane.b32.xlu0 %v8097_v23, %s8286_s14  ;;  %v3090_v29 = vpop.permute.xlu1 %3089 }
 0xced   :  { %v8907_v17 = vadd.f32 %v3090_v29, %v3075_v26 }
 0xcef   :  { %8098 = vtanh.f32 %v8907_v17 }
 0xcf0   :  { %8100 = vpow2.f32 %v6378_v39  ;;  %v3063_v42 = vpop.permute.xlu1 %3062 }
 0xcf1   :  { %v3065_v6 = vadd.f32 %v3063_v42, %v8608_v38 }
 0xcf3   :  { %v6385_v45 = vmul.f32 -1.442695, %v3065_v6 }
 0xcf5   :  { %8102 = vpow2.f32 %v6385_v45 }
 0xcf9   :  { %v8099_v59 = vpop.eup %8098 }
 0xcfa   :  { %3101 = vrot.lane.b32.xlu1 %v8099_v59, %s8286_s14  ;;  %v8101_v43 = vpop.eup %8100 }
 0xcfb   :  { %v2755_v48 = vadd.f32 1.0, %v8101_v43 }
 0xcfd   :  { %8104 = vrcp.f32 %v2755_v48 }
 0xcff   :  { %v8103_v33 = vpop.eup %8102 }
 0xd00   :  { %v3096_v49 = vadd.f32 1.0, %v8103_v33 }
 0xd02   :  { %8106 = vrcp.f32 %v3096_v49 }
 0xd07   :  { %v8105_v52 = vpop.eup %8104 }
 0xd0c   :  { %v8107_v30 = vpop.eup %8106 }
 0xd5e   :  { %v2761_v53 = vpop.permute.xlu0 %2760 }
 0xd5f   :  { %v8913_v41 = vmul.f32 %v8105_v52, %v2761_v53 }
 0xd61   :  { %v3106_v56 = vrot.slane %v8913_v41, 6 }
 0xd63   :  { %3107 = vrot.lane.b32.xlu0 %v3106_v56, %s8287_s4 }
 0xd6c   :  { %v3102_v50 = vpop.permute.xlu1 %3101 }
 0xd6d   :  { %v8917_v57 = vmul.f32 %v8107_v30, %v3102_v50 }
 0xd6f   :  { %3447 = vrot.lane.b32.xlu1 %v8917_v57, %s8287_s4 }
 0xdd5   :  { %v3108_v38 = vpop.permute.xlu0 %3107 }
 0xdd6   :  { %7182 = vmatmul.mubr.msk.f32.vlgmr.msra.gmra.mrb[32].mxu0 %vm62_vm1, %v3108_v38  ;;  %7193 = vmatmul.mubr.msk.f32.vlgmr.msra.gmra.mrb[38].mxu1 %vm62_vm1, %v3108_v38 }
 0xdd7   :  { %7773 = vmatpush3.bf16.msra.mxu0 %v8407_v22  ;;  %7779 = vmatpush3.bf16.msra.mxu1 %v8526_v2 }
 0xdd8   :  { %7774 = vmatprep.subr.bf16.mxu0 %v8283_v12  ;;  %7780 = vmatprep.subr.bf16.mxu1 %v8283_v12 }
 0xdd9   :  { %7203 = vmatprep.mubr.msk.f32.mxu0 %vm8284_vm0, %v8285_v15  ;;  %7214 = vmatprep.mubr.msk.f32.mxu1 %vm8284_vm0, %v8285_v15 }
 0xddb   :  { %7776 = vmatpush3.bf16.msra.mxu0 %v8418_v25  ;;  %7782 = vmatpush3.bf16.msra.mxu1 %v8537_v5 }
 0xddc   :  { %7783 = vmatprep.subr.bf16.mxu0 %v8283_v12  ;;  %7789 = vmatprep.subr.bf16.mxu1 %v8283_v12 }
 0xdde   :  { %7204 = vmatmul.mubr.msk.f32.vlgmr.msra.gmra.mrb[34].mxu0 %vm62_vm1, %v3108_v38  ;;  %7215 = vmatmul.mubr.msk.f32.vlgmr.msra.gmra.mrb[40].mxu1 %vm62_vm1, %v3108_v38 }
 0xddf   :  { %7785 = vmatpush3.bf16.msra.mxu0 %v8430_v28  ;;  %7791 = vmatpush3.bf16.msra.mxu1 %v8549_v8 }
 0xde0   :  { %7786 = vmatprep.subr.bf16.mxu0 %v8283_v12  ;;  %7792 = vmatprep.subr.bf16.mxu1 %v8283_v12 }
 0xde1   :  { %7225 = vmatprep.mubr.msk.f32.mxu0 %vm8284_vm0, %v8285_v15  ;;  %7236 = vmatprep.mubr.msk.f32.mxu1 %vm8284_vm0, %v8285_v15  ;;  %v3448_v58 = vpop.permute.xlu1 %3447 }
 0xde3   :  { %7788 = vmatpush3.bf16.msra.mxu0 %v8441_v31  ;;  %7794 = vmatpush3.bf16.msra.mxu1 %v8560_v11 }
 0xde4   :  { %7795 = vmatprep.subr.bf16.mxu0 %v8283_v12  ;;  %7801 = vmatprep.subr.bf16.mxu1 %v8283_v12 }
 0xde6   :  { %7226 = vmatmul.mubr.msk.f32.vlgmr.msra.gmra.mrb[36].mxu0 %vm62_vm1, %v3448_v58  ;;  %7237 = vmatmul.mubr.msk.f32.vlgmr.msra.gmra.mrb[42].mxu1 %vm62_vm1, %v3448_v58 }
 0xde7   :  { %7797 = vmatpush3.bf16.msra.mxu0 %v8453_v34  ;;  %7803 = vmatpush3.bf16.msra.mxu1 %v8572_v18 }
 0xde8   :  { %7798 = vmatprep.subr.bf16.mxu0 %v8283_v12  ;;  %7804 = vmatprep.subr.bf16.mxu1 %v8283_v12 }
 0xde9   :  { %7247 = vmatprep.mubr.msk.f32.mxu0 %vm8284_vm0, %v8285_v15  ;;  %7258 = vmatprep.mubr.msk.f32.mxu1 %vm8284_vm0, %v8285_v15 }
 0xdeb   :  { %7800 = vmatpush3.bf16.msra.mxu0 %v8464_v37  ;;  %7806 = vmatpush3.bf16.msra.mxu1 %v8583_v21 }
 0xdec   :  { %7807 = vmatprep.subr.bf16.mxu0 %v8283_v12  ;;  %7813 = vmatprep.subr.bf16.mxu1 %v8283_v12 }
 0xdee   :  { %7248 = vmatmul.mubr.msk.f32.vlgmr.msra.gmra.mrb[38].mxu0 %vm62_vm1, %v3448_v58  ;;  %7259 = vmatmul.mubr.msk.f32.vlgmr.msra.gmra.mrb[44].mxu1 %vm62_vm1, %v3448_v58 }
 0xdef   :  { %7809 = vmatpush3.bf16.msra.mxu0 %v8383_v13  ;;  %7815 = vmatpush3.bf16.msra.mxu1 %v8503_v60 }
 0xdf0   :  { %7810 = vmatprep.subr.bf16.mxu0 %v8283_v12  ;;  %7816 = vmatprep.subr.bf16.mxu1 %v8283_v12 }
 0xdf1   :  { %7269 = vmatprep.mubr.msk.f32.mxu0 %vm8284_vm0, %v8285_v15  ;;  %7280 = vmatprep.mubr.msk.f32.mxu1 %vm8284_vm0, %v8285_v15 }
 0xdf3   :  { %7812 = vmatpush3.bf16.msra.mxu0 %v8391_v16  ;;  %7818 = vmatpush3.bf16.msra.mxu1 %v8514_v63 }
 0xdf4   :  { %7819 = vmatprep.subr.bf16.mxu0 %v8283_v12  ;;  %7825 = vmatprep.subr.bf16.mxu1 %v8283_v12 }
 0xea9   :  { %v3177_v44 = vpop.f32.mrb[32].mxu0  ;;  %v3248_v61 = vpop.f32.mrb[38].mxu1 }
 0xeaa   :  { %v7183_v0 = vpop.f32.mrb[33].mxu0  ;;  %v7194_v1 = vpop.f32.mrb[39].mxu1  ;;  %v3181_v48 = vadd.f32 %v3177_v44, %v8600_v27 }
 0xeac   :  { %v6391_v33 = vmul.f32 -1.442695, %v3181_v48 }
 0xeb1   :  { %v3323_v55 = vpop.f32.mrb[34].mxu0  ;;  %v3398_v46 = vpop.f32.mrb[40].mxu1 }
 0xeb2   :  { %v7216_v47 = vpop.f32.mrb[41].mxu1  ;;  %3328 = vrot.lane.b32.xlu0 %v3323_v55, %s8286_s14  ;;  %v7205_v9 = vpop.f32.mrb[35].mxu0 }
 0xeb9   :  { %v3517_v51 = vpop.f32.mrb[36].mxu0  ;;  %v3591_v10 = vpop.f32.mrb[42].mxu1 }
 0xeba   :  { %v7227_v4 = vpop.f32.mrb[37].mxu0  ;;  %v7238_v54 = vpop.f32.mrb[43].mxu1  ;;  %v3596_v45 = vrot.slane %v3591_v10, 2  ;;  %v3522_v52 = vrot.slane %v3517_v51, 2 }
 0xebc   :  { %v3524_v53 = vadd.f32 %v3522_v52, %v8610_v40 }
 0xebe   :  { %v6398_v30 = vmul.f32 -1.442695, %v3524_v53 }
 0xec1   :  { %v3667_v20 = vpop.f32.mrb[38].mxu0  ;;  %v3743_v23 = vpop.f32.mrb[44].mxu1 }
 0xec2   :  { %v3672_v26 = vrot.slane %v3667_v20, 2  ;;  %v7249_v29 = vpop.f32.mrb[39].mxu0  ;;  %v7260_v59 = vpop.f32.mrb[45].mxu1  ;;  %v3748_v47 = vrot.slane %v3743_v23, 2 }
 0xec4   :  { %3673 = vrot.lane.b32.xlu1 %v3672_v26, %s8286_s14 }
 0xf24   :  { %v3329_v32 = vpop.permute.xlu0 %3328 }
 0xf25   :  { %v3331_v36 = vadd.f32 %v3329_v32, %v8600_v27  ;;  %v3414_v32 = vrot.slane %v8902_v19, 6 }
 0xf27   :  { %8108 = vtanh.f32 %v3331_v36 }
 0xf31   :  { %v8109_v39 = vpop.eup %8108 }
 0xf32   :  { %3425 = vrot.lane.b32.xlu0 %v8109_v39, %s8286_s14 }
 0xf36   :  { %3253 = vrot.lane.b32.xlu0 %v3248_v61, %s8287_s4  ;;  %v3674_v42 = vpop.permute.xlu1 %3673 }
 0xf37   :  { %v3676_v6 = vadd.f32 %v3674_v42, %v8610_v40 }
 0xf39   :  { %8110 = vtanh.f32 %v3676_v6 }
 0xf3a   :  { %8112 = vpow2.f32 %v6391_v33 }
 0xf43   :  { %v8111_v43 = vpop.eup %8110 }
 0xf44   :  { %3771 = vrot.lane.b32.xlu1 %v8111_v43, %s8286_s14  ;;  %v8113_v49 = vpop.eup %8112 }
 0xf45   :  { %v3420_v56 = vadd.f32 1.0, %v8113_v49 }
 0xf47   :  { %8114 = vrcp.f32 %v3420_v56 }
 0xf48   :  { %3597 = vrot.lane.b32.xlu1 %v3596_v45, %s8287_s4  ;;  %8116 = vpow2.f32 %v6398_v30  ;;  %v3760_v45 = vrot.slane %v8907_v17, 2 }
 0xf51   :  { %v8115_v50 = vpop.eup %8114 }
 0xf52   :  { %v8117_v58 = vpop.eup %8116 }
 0xf53   :  { %v3766_v0 = vadd.f32 1.0, %v8117_v58 }
 0xf55   :  { %8118 = vrcp.f32 %v3766_v0 }
 0xf5f   :  { %v8119_v44 = vpop.eup %8118 }
 0xfa4   :  { %v3426_v38 = vpop.permute.xlu0 %3425 }
 0xfa5   :  { %v3428_v61 = vmul.f32 %v8115_v50, %v3426_v38 }
 0xfa7   :  { %3430 = vrot.lane.b32.xlu0 %v3428_v61, %s8287_s4 }
 0xfa8   :  { %v3254_v9 = vpop.permute.xlu0 %3253 }
 0xfa9   :  { %v3256_v51 = vadd.f32 %v3254_v9, %v8600_v27 }
 0xfab   :  { %3403 = vrot.lane.b32.xlu0 %v3398_v46, %s8288_s7  ;;  %v6390_v10 = vmul.f32 -1.442695, %v3256_v51 }
 0xfad   :  { %8120 = vpow2.f32 %v6390_v10 }
 0xfb6   :  { %v3772_v1 = vpop.permute.xlu1 %3771 }
 0xfb7   :  { %v3774_v55 = vmul.f32 %v8119_v44, %v3772_v1  ;;  %v8121_v54 = vpop.eup %8120 }
 0xfb8   :  { %v3410_v26 = vadd.f32 1.0, %v8121_v54 }
 0xfb9   :  { %3776 = vrot.lane.b32.xlu1 %v3774_v55, %s8287_s4 }
 0xfba   :  { %v3598_v4 = vpop.permute.xlu1 %3597  ;;  %8122 = vrcp.f32 %v3410_v26 }
 0xfbb   :  { %v3600_v20 = vadd.f32 %v3598_v4, %v8610_v40 }
 0xfbd   :  { %3749 = vrot.lane.b32.xlu1 %v3748_v47, %s8288_s7  ;;  %v6397_v46 = vmul.f32 -1.442695, %v3600_v20 }
 0xfbf   :  { %8124 = vpow2.f32 %v6397_v46 }
 0xfc4   :  { %v8123_v29 = vpop.eup %8122 }
 0xfc5   :  { %v3416_v23 = vmul.f32 %v8123_v29, %v3414_v32 }
 0xfc9   :  { %v8125_v59 = vpop.eup %8124 }
 0xfca   :  { %v3756_v36 = vadd.f32 1.0, %v8125_v59 }
0x1019   :  { %v3431_v39 = vpop.permute.xlu0 %3430 }
0x101a   :  { %v8994_v42 = vadd.f32 %v3431_v39, %v3416_v23 }
0x101c   :  { %8126 = vtanh.f32 %v8994_v42 }
0x101d   :  { %8128 = vrcp.f32 %v3756_v36  ;;  %v3404_v49 = vpop.permute.xlu0 %3403 }
0x101e   :  { %v3406_v53 = vadd.f32 %v3404_v49, %v8600_v27 }
0x1020   :  { %v6392_v56 = vmul.f32 -1.442695, %v3406_v53 }
0x1026   :  { %v8127_v6 = vpop.eup %8126 }
0x1027   :  { %v8129_v43 = vpop.eup %8128  ;;  %3442 = vrot.lane.b32.xlu0 %v8127_v6, %s8286_s14 }
0x1028   :  { %v3762_v48 = vmul.f32 %v8129_v43, %v3760_v45 }
0x102b   :  { %v3777_v33 = vpop.permute.xlu1 %3776 }
0x102c   :  { %v8999_v52 = vadd.f32 %v3777_v33, %v3762_v48 }
0x102e   :  { %8130 = vtanh.f32 %v8999_v52 }
0x102f   :  { %8132 = vpow2.f32 %v6392_v56  ;;  %v3750_v30 = vpop.permute.xlu1 %3749 }
0x1030   :  { %v3752_v38 = vadd.f32 %v3750_v30, %v8610_v40 }
0x1032   :  { %v6399_v17 = vmul.f32 -1.442695, %v3752_v38 }
0x1038   :  { %v8131_v19 = vpop.eup %8130 }
0x1039   :  { %3788 = vrot.lane.b32.xlu1 %v8131_v19, %s8286_s14  ;;  %v8133_v50 = vpop.eup %8132 }
0x103a   :  { %v3437_v58 = vadd.f32 1.0, %v8133_v50 }
0x103c   :  { %8134 = vrcp.f32 %v3437_v58 }
0x103d   :  { %8136 = vpow2.f32 %v6399_v17 }
0x1046   :  { %v8135_v61 = vpop.eup %8134 }
0x1047   :  { %v8137_v44 = vpop.eup %8136 }
0x1048   :  { %v3783_v55 = vadd.f32 1.0, %v8137_v44 }
0x104a   :  { %8138 = vrcp.f32 %v3783_v55 }
0x1054   :  { %v8139_v47 = vpop.eup %8138 }
0x1099   :  { %v3443_v0 = vpop.permute.xlu0 %3442 }
0x109a   :  { %v9005_v1 = vmul.f32 %v8135_v61, %v3443_v0 }
0x109c   :  { %3793 = vrot.lane.b32.xlu0 %v9005_v1, %s8287_s4 }
0x10ab   :  { %v3789_v9 = vpop.permute.xlu1 %3788 }
0x10ac   :  { %v9009_v51 = vmul.f32 %v8139_v47, %v3789_v9 }
0x10ae   :  { %v4139_v10 = vrot.slane %v9009_v51, 6 }
0x10b0   :  { %4140 = vrot.lane.b32.xlu1 %v4139_v10, %s8287_s4 }
0x110e   :  { %v3794_v4 = vpop.permute.xlu0 %3793 }
0x110f   :  { %7270 = vmatmul.mubr.msk.f32.vlgmr.msra.gmra.mrb[40].mxu0 %vm62_vm1, %v3794_v4  ;;  %7281 = vmatmul.mubr.msk.f32.vlgmr.msra.gmra.mrb[46].mxu1 %vm62_vm1, %v3794_v4 }
0x1110   :  { %7821 = vmatpush3.bf16.msra.mxu0 %v8407_v22  ;;  %7827 = vmatpush3.bf16.msra.mxu1 %v8526_v2 }
0x1111   :  { %7822 = vmatprep.subr.bf16.mxu0 %v8283_v12  ;;  %7828 = vmatprep.subr.bf16.mxu1 %v8283_v12 }
0x1112   :  { %7291 = vmatprep.mubr.msk.f32.mxu0 %vm8284_vm0, %v8285_v15  ;;  %7302 = vmatprep.mubr.msk.f32.mxu1 %vm8284_vm0, %v8285_v15 }
0x1114   :  { %7824 = vmatpush3.bf16.msra.mxu0 %v8418_v25  ;;  %7830 = vmatpush3.bf16.msra.mxu1 %v8537_v5 }
0x1115   :  { %7831 = vmatprep.subr.bf16.mxu0 %v8283_v12  ;;  %7837 = vmatprep.subr.bf16.mxu1 %v8283_v12 }
0x1117   :  { %7292 = vmatmul.mubr.msk.f32.vlgmr.msra.gmra.mrb[42].mxu0 %vm62_vm1, %v3794_v4  ;;  %7303 = vmatmul.mubr.msk.f32.vlgmr.msra.gmra.mrb[48].mxu1 %vm62_vm1, %v3794_v4 }
0x1118   :  { %7833 = vmatpush3.bf16.msra.mxu0 %v8430_v28  ;;  %7839 = vmatpush3.bf16.msra.mxu1 %v8549_v8 }
0x1119   :  { %7834 = vmatprep.subr.bf16.mxu0 %v8283_v12  ;;  %7840 = vmatprep.subr.bf16.mxu1 %v8283_v12 }
0x111a   :  { %7313 = vmatprep.mubr.msk.f32.mxu0 %vm8284_vm0, %v8285_v15  ;;  %7324 = vmatprep.mubr.msk.f32.mxu1 %vm8284_vm0, %v8285_v15 }
0x111c   :  { %7836 = vmatpush3.bf16.msra.mxu0 %v8441_v31  ;;  %7842 = vmatpush3.bf16.msra.mxu1 %v8560_v11 }
0x111d   :  { %7843 = vmatprep.subr.bf16.mxu0 %v8283_v12  ;;  %7849 = vmatprep.subr.bf16.mxu1 %v8283_v12 }
0x1122   :  { %v4141_v54 = vpop.permute.xlu1 %4140 }
0x1123   :  { %7314 = vmatmul.mubr.msk.f32.vlgmr.msra.gmra.mrb[44].mxu0 %vm62_vm1, %v4141_v54  ;;  %7325 = vmatmul.mubr.msk.f32.vlgmr.msra.gmra.mrb[50].mxu1 %vm62_vm1, %v4141_v54 }
0x1124   :  { %7845 = vmatpush3.bf16.msra.mxu0 %v8453_v34  ;;  %7851 = vmatpush3.bf16.msra.mxu1 %v8572_v18 }
0x1125   :  { %7846 = vmatprep.subr.bf16.mxu0 %v8283_v12  ;;  %7852 = vmatprep.subr.bf16.mxu1 %v8283_v12 }
0x1126   :  { %7335 = vmatprep.mubr.msk.f32.mxu0 %vm8284_vm0, %v8285_v15  ;;  %7346 = vmatprep.mubr.msk.f32.mxu1 %vm8284_vm0, %v8285_v15 }
0x1128   :  { %7848 = vmatpush3.bf16.msra.mxu0 %v8464_v37  ;;  %7854 = vmatpush3.bf16.msra.mxu1 %v8583_v21 }
0x1129   :  { %7855 = vmatprep.subr.bf16.mxu0 %v8283_v12  ;;  %7861 = vmatprep.subr.bf16.mxu1 %v8283_v12 }
0x112b   :  { %7336 = vmatmul.mubr.msk.f32.vlgmr.msra.gmra.mrb[46].mxu0 %vm62_vm1, %v4141_v54  ;;  %7347 = vmatmul.mubr.msk.f32.vlgmr.msra.gmra.mrb[52].mxu1 %vm62_vm1, %v4141_v54 }
0x112c   :  { %7857 = vmatpush3.bf16.msra.mxu0 %v8383_v13  ;;  %7863 = vmatpush3.bf16.msra.mxu1 %v8503_v60 }
0x112d   :  { %7858 = vmatprep.subr.bf16.mxu0 %v8283_v12  ;;  %7864 = vmatprep.subr.bf16.mxu1 %v8283_v12 }
0x112e   :  { %7357 = vmatprep.mubr.msk.f32.mxu0 %vm8284_vm0, %v8285_v15  ;;  %7368 = vmatprep.mubr.msk.f32.mxu1 %vm8284_vm0, %v8285_v15 }
0x1130   :  { %7860 = vmatpush3.bf16.msra.mxu0 %v8391_v16  ;;  %7866 = vmatpush3.bf16.msra.mxu1 %v8514_v63 }
0x1131   :  { %7867 = vmatprep.subr.bf16.mxu0 %v8283_v12  ;;  %7873 = vmatprep.subr.bf16.mxu1 %v8283_v12 }
0x11e2   :  { %v3863_v20 = vpop.f32.mrb[40].mxu0  ;;  %v3937_v26 = vpop.f32.mrb[46].mxu1 }
0x11e3   :  { %v7271_v46 = vpop.f32.mrb[41].mxu0  ;;  %v7282_v29 = vpop.f32.mrb[47].mxu1  ;;  %v3942_v58 = vrot.slane %v3937_v26, 6  ;;  %v3868_v55 = vrot.slane %v3863_v20, 6 }
0x11e5   :  { %v3870_v47 = vadd.f32 %v3868_v55, %v8600_v27 }
0x11e7   :  { %v6405_v9 = vmul.f32 -1.442695, %v3870_v47 }
0x11ea   :  { %v4013_v59 = vpop.f32.mrb[42].mxu0  ;;  %v4089_v32 = vpop.f32.mrb[48].mxu1 }
0x11eb   :  { %v4018_v23 = vrot.slane %v4013_v59, 6  ;;  %v7293_v36 = vpop.f32.mrb[43].mxu0  ;;  %v7304_v39 = vpop.f32.mrb[49].mxu1 }
0x11ec   :  { %v4094_v39 = vrot.slane %v4089_v32, 6 }
0x11ed   :  { %4019 = vrot.lane.b32.xlu0 %v4018_v23, %s8286_s14 }
0x11f6   :  { %v4210_v6 = vpop.f32.mrb[44].mxu0  ;;  %v4284_v43 = vpop.f32.mrb[50].mxu1 }
0x11f7   :  { %v7315_v45 = vpop.f32.mrb[45].mxu0  ;;  %v7326_v48 = vpop.f32.mrb[51].mxu1  ;;  %v4289_v44 = vrot.slane %v4284_v43, 4  ;;  %v4215_v10 = vrot.slane %v4210_v6, 4 }
0x11f9   :  { %v4217_v54 = vadd.f32 %v4215_v10, %v8610_v40  ;;  %v4453_v10 = vrot.slane %v8999_v52, 2 }
0x11fb   :  { %v6412_v46 = vmul.f32 -1.442695, %v4217_v54 }
0x11fe   :  { %v4360_v33 = vpop.f32.mrb[46].mxu0  ;;  %v4436_v19 = vpop.f32.mrb[52].mxu1 }
0x11ff   :  { %v4365_v49 = vrot.slane %v4360_v33, 4  ;;  %v7337_v53 = vpop.f32.mrb[47].mxu0  ;;  %v7348_v56 = vpop.f32.mrb[53].mxu1  ;;  %v4441_v48 = vrot.slane %v4436_v19, 4 }
0x1201   :  { %4366 = vrot.lane.b32.xlu1 %v4365_v49, %s8286_s14 }
0x125f   :  { %v4020_v30 = vpop.permute.xlu0 %4019 }
0x1260   :  { %v4022_v50 = vadd.f32 %v4020_v30, %v8600_v27 }
0x1262   :  { %8140 = vtanh.f32 %v4022_v50 }
0x126c   :  { %v8141_v38 = vpop.eup %8140 }
0x126d   :  { %4117 = vrot.lane.b32.xlu0 %v8141_v38, %s8286_s14 }
0x1271   :  { %3943 = vrot.lane.b32.xlu0 %v3942_v58, %s8287_s4 }
0x1273   :  { %v4367_v17 = vpop.permute.xlu1 %4366 }
0x1274   :  { %v4369_v61 = vadd.f32 %v4367_v17, %v8610_v40  ;;  %v4106_v17 = vrot.slane %v8994_v42, 6 }
0x1276   :  { %8142 = vtanh.f32 %v4369_v61 }
0x1277   :  { %8144 = vpow2.f32 %v6405_v9 }
0x1280   :  { %v8143_v0 = vpop.eup %8142 }
0x1281   :  { %4464 = vrot.lane.b32.xlu1 %v8143_v0, %s8286_s14  ;;  %v8145_v4 = vpop.eup %8144 }
0x1282   :  { %v4112_v26 = vadd.f32 1.0, %v8145_v4 }
0x1284   :  { %8146 = vrcp.f32 %v4112_v26 }
0x1285   :  { %4290 = vrot.lane.b32.xlu1 %v4289_v44, %s8287_s4  ;;  %8148 = vpow2.f32 %v6412_v46 }
0x128e   :  { %v8147_v29 = vpop.eup %8146 }
0x128f   :  { %v8149_v36 = vpop.eup %8148 }
0x1290   :  { %v4459_v20 = vadd.f32 1.0, %v8149_v36 }
0x1292   :  { %8150 = vrcp.f32 %v4459_v20 }
0x129c   :  { %v8151_v43 = vpop.eup %8150 }
0x12df   :  { %v4118_v59 = vpop.permute.xlu0 %4117 }
0x12e0   :  { %v4120_v23 = vmul.f32 %v8147_v29, %v4118_v59 }
0x12e2   :  { %4122 = vrot.lane.b32.xlu0 %v4120_v23, %s8287_s4 }
0x12e3   :  { %v3944_v33 = vpop.permute.xlu0 %3943 }
0x12e4   :  { %v3946_v49 = vadd.f32 %v3944_v33, %v8600_v27 }
0x12e6   :  { %4095 = vrot.lane.b32.xlu0 %v4094_v39, %s8288_s7  ;;  %v6404_v53 = vmul.f32 -1.442695, %v3946_v49 }
0x12e8   :  { %8152 = vpow2.f32 %v6404_v53 }
0x12f2   :  { %v8153_v30 = vpop.eup %8152 }
0x12f3   :  { %v4465_v6 = vpop.permute.xlu1 %4464  ;;  %v4102_v50 = vadd.f32 1.0, %v8153_v30 }
0x12f4   :  { %v4467_v45 = vmul.f32 %v8151_v43, %v4465_v6 }
0x12f5   :  { %8154 = vrcp.f32 %v4102_v50 }
0x12f6   :  { %4469 = vrot.lane.b32.xlu1 %v4467_v45, %s8287_s4 }
0x12f7   :  { %v4291_v56 = vpop.permute.xlu1 %4290 }
0x12f8   :  { %v4293_v32 = vadd.f32 %v4291_v56, %v8610_v40 }
0x12fa   :  { %4442 = vrot.lane.b32.xlu1 %v4441_v48, %s8288_s7  ;;  %v6411_v38 = vmul.f32 -1.442695, %v4293_v32 }
0x12fc   :  { %8156 = vpow2.f32 %v6411_v38 }
0x12ff   :  { %v8155_v58 = vpop.eup %8154 }
0x1300   :  { %v4108_v19 = vmul.f32 %v8155_v58, %v4106_v17 }
0x1306   :  { %v8157_v61 = vpop.eup %8156 }
0x1307   :  { %v4449_v55 = vadd.f32 1.0, %v8157_v61 }
0x1354   :  { %v4123_v0 = vpop.permute.xlu0 %4122 }
0x1355   :  { %v9086_v44 = vadd.f32 %v4123_v0, %v4108_v19 }
0x1357   :  { %8158 = vtanh.f32 %v9086_v44 }
0x1358   :  { %8160 = vrcp.f32 %v4449_v55  ;;  %v4096_v46 = vpop.permute.xlu0 %4095 }
0x1359   :  { %v4098_v29 = vadd.f32 %v4096_v46, %v8600_v27 }
0x135b   :  { %v6406_v59 = vmul.f32 -1.442695, %v4098_v29 }
0x1361   :  { %v8159_v47 = vpop.eup %8158 }
0x1362   :  { %4134 = vrot.lane.b32.xlu0 %v8159_v47, %s8286_s14  ;;  %v8161_v9 = vpop.eup %8160 }
0x1363   :  { %v4455_v4 = vmul.f32 %v8161_v9, %v4453_v10 }
0x1368   :  { %v4470_v54 = vpop.permute.xlu1 %4469 }
0x1369   :  { %v9091_v26 = vadd.f32 %v4470_v54, %v4455_v4 }
0x136b   :  { %8162 = vtanh.f32 %v9091_v26 }
0x136c   :  { %8164 = vpow2.f32 %v6406_v59  ;;  %v4443_v23 = vpop.permute.xlu1 %4442 }
0x136d   :  { %v4445_v39 = vadd.f32 %v4443_v23, %v8610_v40 }
0x136f   :  { %v6413_v52 = vmul.f32 -1.442695, %v4445_v39 }
0x1375   :  { %v8163_v42 = vpop.eup %8162 }
0x1376   :  { %4481 = vrot.lane.b32.xlu1 %v8163_v42, %s8286_s14  ;;  %v8165_v36 = vpop.eup %8164 }
0x1377   :  { %v4129_v20 = vadd.f32 1.0, %v8165_v36 }
0x1379   :  { %8166 = vrcp.f32 %v4129_v20 }
0x137a   :  { %8168 = vpow2.f32 %v6413_v52 }
0x1383   :  { %v8167_v43 = vpop.eup %8166 }
0x1384   :  { %v8169_v48 = vpop.eup %8168 }
0x1385   :  { %v4476_v49 = vadd.f32 1.0, %v8169_v48 }
0x1387   :  { %8170 = vrcp.f32 %v4476_v49 }
0x1391   :  { %v8171_v53 = vpop.eup %8170 }
0x13d4   :  { %v4135_v6 = vpop.permute.xlu0 %4134 }
0x13d5   :  { %v9097_v45 = vmul.f32 %v8167_v43, %v4135_v6 }
0x13d7   :  { %v4486_v33 = vrot.slane %v9097_v45, 2 }
0x13d9   :  { %4487 = vrot.lane.b32.xlu0 %v4486_v33, %s8287_s4 }
0x13e8   :  { %v4482_v56 = vpop.permute.xlu1 %4481 }
0x13e9   :  { %v9101_v30 = vmul.f32 %v8171_v53, %v4482_v56 }
0x13eb   :  { %v4833_v32 = vrot.slane %v9101_v30, 4 }
0x13ed   :  { %4834 = vrot.lane.b32.xlu1 %v4833_v32, %s8287_s4 }
0x144b   :  { %v4488_v50 = vpop.permute.xlu0 %4487 }
0x144c   :  { %7358 = vmatmul.mubr.msk.f32.vlgmr.msra.gmra.mrb[48].mxu0 %vm62_vm1, %v4488_v50  ;;  %7369 = vmatmul.mubr.msk.f32.vlgmr.msra.gmra.mrb[54].mxu1 %vm62_vm1, %v4488_v50 }
0x144d   :  { %7869 = vmatpush3.bf16.msra.mxu0 %v8407_v22  ;;  %7875 = vmatpush3.bf16.msra.mxu1 %v8526_v2 }
0x144e   :  { %7870 = vmatprep.subr.bf16.mxu0 %v8283_v12  ;;  %7876 = vmatprep.subr.bf16.mxu1 %v8283_v12 }
0x144f   :  { %7379 = vmatprep.mubr.msk.f32.mxu0 %vm8284_vm0, %v8285_v15  ;;  %7390 = vmatprep.mubr.msk.f32.mxu1 %vm8284_vm0, %v8285_v15 }
0x1451   :  { %7872 = vmatpush3.bf16.msra.mxu0 %v8418_v25  ;;  %7878 = vmatpush3.bf16.msra.mxu1 %v8537_v5 }
0x1452   :  { %7879 = vmatprep.subr.bf16.mxu0 %v8283_v12  ;;  %7885 = vmatprep.subr.bf16.mxu1 %v8283_v12 }
0x1454   :  { %7380 = vmatmul.mubr.msk.f32.vlgmr.msra.gmra.mrb[50].mxu0 %vm62_vm1, %v4488_v50  ;;  %7391 = vmatmul.mubr.msk.f32.vlgmr.msra.gmra.mrb[56].mxu1 %vm62_vm1, %v4488_v50 }
0x1455   :  { %7881 = vmatpush3.bf16.msra.mxu0 %v8430_v28  ;;  %7887 = vmatpush3.bf16.msra.mxu1 %v8549_v8 }
0x1456   :  { %7882 = vmatprep.subr.bf16.mxu0 %v8283_v12  ;;  %7888 = vmatprep.subr.bf16.mxu1 %v8283_v12 }
0x1457   :  { %7401 = vmatprep.mubr.msk.f32.mxu0 %vm8284_vm0, %v8285_v15  ;;  %7412 = vmatprep.mubr.msk.f32.mxu1 %vm8284_vm0, %v8285_v15 }
0x1459   :  { %7884 = vmatpush3.bf16.msra.mxu0 %v8441_v31  ;;  %7890 = vmatpush3.bf16.msra.mxu1 %v8560_v11 }
0x145a   :  { %7891 = vmatprep.subr.bf16.mxu0 %v8283_v12  ;;  %7897 = vmatprep.subr.bf16.mxu1 %v8283_v12 }
0x145f   :  { %v4835_v38 = vpop.permute.xlu1 %4834 }
0x1460   :  { %7402 = vmatmul.mubr.msk.f32.vlgmr.msra.gmra.mrb[52].mxu0 %vm62_vm1, %v4835_v38  ;;  %7413 = vmatmul.mubr.msk.f32.vlgmr.msra.gmra.mrb[58].mxu1 %vm62_vm1, %v4835_v38 }
0x1461   :  { %7893 = vmatpush3.bf16.msra.mxu0 %v8453_v34  ;;  %7899 = vmatpush3.bf16.msra.mxu1 %v8572_v18 }
0x1462   :  { %7894 = vmatprep.subr.bf16.mxu0 %v8283_v12  ;;  %7900 = vmatprep.subr.bf16.mxu1 %v8283_v12 }
0x1463   :  { %7423 = vmatprep.mubr.msk.f32.mxu0 %vm8284_vm0, %v8285_v15  ;;  %7434 = vmatprep.mubr.msk.f32.mxu1 %vm8284_vm0, %v8285_v15 }
0x1465   :  { %7896 = vmatpush3.bf16.msra.mxu0 %v8464_v37  ;;  %7902 = vmatpush3.bf16.msra.mxu1 %v8583_v21 }
0x1466   :  { %7903 = vmatprep.subr.bf16.mxu0 %v8283_v12  ;;  %7909 = vmatprep.subr.bf16.mxu1 %v8283_v12 }
0x1468   :  { %7424 = vmatmul.mubr.msk.f32.vlgmr.msra.gmra.mrb[54].mxu0 %vm62_vm1, %v4835_v38  ;;  %7435 = vmatmul.mubr.msk.f32.vlgmr.msra.gmra.mrb[60].mxu1 %vm62_vm1, %v4835_v38 }
0x1469   :  { %7905 = vmatpush3.bf16.msra.mxu0 %v8383_v13  ;;  %7911 = vmatpush3.bf16.msra.mxu1 %v8503_v60 }
0x146a   :  { %7906 = vmatprep.subr.bf16.mxu0 %v8283_v12  ;;  %7912 = vmatprep.subr.bf16.mxu1 %v8283_v12 }
0x146b   :  { %7445 = vmatprep.mubr.msk.f32.mxu0 %vm8284_vm0, %v8285_v15  ;;  %7456 = vmatprep.mubr.msk.f32.mxu1 %vm8284_vm0, %v8285_v15 }
0x146d   :  { %7908 = vmatpush3.bf16.msra.mxu0 %v8391_v16  ;;  %7914 = vmatpush3.bf16.msra.mxu1 %v8514_v63 }
0x146e   :  { %7915 = vmatprep.subr.bf16.mxu0 %v8283_v12  ;;  %7921 = vmatprep.subr.bf16.mxu1 %v8283_v12 }
0x151f   :  { %v4557_v13 = vpop.f32.mrb[48].mxu0  ;;  %v4631_v60 = vpop.f32.mrb[54].mxu1 }
0x1520   :  { %v7359_v58 = vpop.f32.mrb[49].mxu0  ;;  %v7370_v17 = vpop.f32.mrb[55].mxu1  ;;  %v4636_v39 = vrot.slane %v4631_v60, 4  ;;  %v4562_v48 = vrot.slane %v4557_v13, 4 }
0x1522   :  { %v4564_v33 = vadd.f32 %v4562_v48, %v8600_v27 }
0x1524   :  { %v6419_v49 = vmul.f32 -1.442695, %v4564_v33  ;;  %v5147_v33 = vrot.slane %v9091_v26, 2 }
0x1527   :  { %v4707_v61 = vpop.f32.mrb[50].mxu0  ;;  %v4783_v19 = vpop.f32.mrb[56].mxu1 }
0x1528   :  { %v4712_v0 = vrot.slane %v4707_v61, 4  ;;  %v7381_v55 = vpop.f32.mrb[51].mxu0  ;;  %v7392_v47 = vpop.f32.mrb[57].mxu1 }
0x152a   :  { %4713 = vrot.lane.b32.xlu0 %v4712_v0, %s8286_s14  ;;  %v4788_v0 = vrot.slane %v4783_v19, 4 }
0x1533   :  { %v4904_v9 = vpop.f32.mrb[52].mxu0  ;;  %v4978_v10 = vpop.f32.mrb[58].mxu1 }
0x1534   :  { %v7403_v16 = vpop.f32.mrb[53].mxu0  ;;  %v7414_v4 = vpop.f32.mrb[59].mxu1  ;;  %v4983_v6 = vrot.slane %v4978_v10, 6  ;;  %v4909_v53 = vrot.slane %v4904_v9, 6 }
0x1536   :  { %v4911_v32 = vadd.f32 %v4909_v53, %v8610_v40 }
0x1538   :  { %v6426_v38 = vmul.f32 -1.442695, %v4911_v32 }
0x153b   :  { %v5054_v63 = vpop.f32.mrb[54].mxu0  ;;  %v5130_v54 = vpop.f32.mrb[60].mxu1 }
0x153c   :  { %v5059_v42 = vrot.slane %v5054_v63, 6  ;;  %v7425_v46 = vpop.f32.mrb[55].mxu0  ;;  %v7436_v29 = vpop.f32.mrb[61].mxu1  ;;  %v5135_v10 = vrot.slane %v5130_v54, 6 }
0x153e   :  { %5060 = vrot.lane.b32.xlu1 %v5059_v42, %s8286_s14 }
0x159c   :  { %v4714_v59 = vpop.permute.xlu0 %4713 }
0x159d   :  { %v4716_v23 = vadd.f32 %v4714_v59, %v8600_v27 }
0x159f   :  { %8172 = vtanh.f32 %v4716_v23 }
0x15a9   :  { %v8173_v36 = vpop.eup %8172 }
0x15aa   :  { %4811 = vrot.lane.b32.xlu0 %v8173_v36, %s8286_s14  ;;  %v4800_v36 = vrot.slane %v9086_v44, 6 }
0x15ae   :  { %4637 = vrot.lane.b32.xlu0 %v4636_v39, %s8287_s4 }
0x15b0   :  { %v5061_v20 = vpop.permute.xlu1 %5060 }
0x15b1   :  { %v5063_v52 = vadd.f32 %v5061_v20, %v8610_v40 }
0x15b3   :  { %8174 = vtanh.f32 %v5063_v52 }
0x15b4   :  { %8176 = vpow2.f32 %v6419_v49 }
0x15bd   :  { %v8175_v43 = vpop.eup %8174 }
0x15be   :  { %5158 = vrot.lane.b32.xlu1 %v8175_v43, %s8286_s14  ;;  %v8177_v56 = vpop.eup %8176 }
0x15bf   :  { %v4806_v50 = vadd.f32 1.0, %v8177_v56 }
0x15c1   :  { %8178 = vrcp.f32 %v4806_v50 }
0x15c2   :  { %4984 = vrot.lane.b32.xlu1 %v4983_v6, %s8287_s4  ;;  %8180 = vpow2.f32 %v6426_v38 }
0x15cb   :  { %v8179_v60 = vpop.eup %8178 }
0x15cc   :  { %v8181_v61 = vpop.eup %8180 }
0x15cd   :  { %v5153_v13 = vadd.f32 1.0, %v8181_v61 }
0x15cf   :  { %8182 = vrcp.f32 %v5153_v13 }
0x15d9   :  { %v8183_v55 = vpop.eup %8182 }
0x161c   :  { %v4812_v58 = vpop.permute.xlu0 %4811 }
0x161d   :  { %v4814_v17 = vmul.f32 %v8179_v60, %v4812_v58 }
0x161f   :  { %4816 = vrot.lane.b32.xlu0 %v4814_v17, %s8287_s4 }
0x1620   :  { %v4638_v16 = vpop.permute.xlu0 %4637 }
0x1621   :  { %v4640_v4 = vadd.f32 %v4638_v16, %v8600_v27 }
0x1623   :  { %4789 = vrot.lane.b32.xlu0 %v4788_v0, %s8288_s7  ;;  %v6418_v63 = vmul.f32 -1.442695, %v4640_v4 }
0x1625   :  { %8184 = vpow2.f32 %v6418_v63 }
0x162f   :  { %v8185_v46 = vpop.eup %8184 }
0x1630   :  { %v5159_v47 = vpop.permute.xlu1 %5158  ;;  %v4796_v29 = vadd.f32 1.0, %v8185_v46 }
0x1631   :  { %v5161_v9 = vmul.f32 %v8183_v55, %v5159_v47 }
0x1632   :  { %8186 = vrcp.f32 %v4796_v29 }
0x1633   :  { %5163 = vrot.lane.b32.xlu1 %v5161_v9, %s8287_s4 }
0x1634   :  { %v4985_v42 = vpop.permute.xlu1 %4984 }
0x1635   :  { %v4987_v19 = vadd.f32 %v4985_v42, %v8610_v40 }
0x1637   :  { %5136 = vrot.lane.b32.xlu1 %v5135_v10, %s8288_s7  ;;  %v6425_v59 = vmul.f32 -1.442695, %v4987_v19 }
0x1639   :  { %8188 = vpow2.f32 %v6425_v59 }
0x163c   :  { %v8187_v23 = vpop.eup %8186 }
0x163d   :  { %v4802_v54 = vmul.f32 %v8187_v23, %v4800_v36 }
0x1643   :  { %v8189_v39 = vpop.eup %8188 }
0x1644   :  { %v5143_v43 = vadd.f32 1.0, %v8189_v39 }
0x1691   :  { %v4817_v20 = vpop.permute.xlu0 %4816 }
0x1692   :  { %v9178_v52 = vadd.f32 %v4817_v20, %v4802_v54 }
0x1694   :  { %8190 = vtanh.f32 %v9178_v52 }
0x1695   :  { %8192 = vrcp.f32 %v5143_v43  ;;  %v4790_v32 = vpop.permute.xlu0 %4789 }
0x1696   :  { %v4792_v50 = vadd.f32 %v4790_v32, %v8600_v27 }
0x1698   :  { %v6420_v38 = vmul.f32 -1.442695, %v4792_v50 }
0x169e   :  { %v8191_v6 = vpop.eup %8190 }
0x169f   :  { %4828 = vrot.lane.b32.xlu0 %v8191_v6, %s8286_s14  ;;  %v8193_v48 = vpop.eup %8192 }
0x16a0   :  { %v5149_v49 = vmul.f32 %v8193_v48, %v5147_v33 }
0x16a5   :  { %v5164_v53 = vpop.permute.xlu1 %5163 }
0x16a6   :  { %v9183_v56 = vadd.f32 %v5164_v53, %v5149_v49 }
0x16a8   :  { %8194 = vtanh.f32 %v9183_v56 }
0x16a9   :  { %8196 = vpow2.f32 %v6420_v38  ;;  %v5137_v60 = vpop.permute.xlu1 %5136 }
0x16aa   :  { %v5139_v17 = vadd.f32 %v5137_v60, %v8610_v40 }
0x16ac   :  { %v6427_v26 = vmul.f32 -1.442695, %v5139_v17 }
0x16b2   :  { %v8195_v44 = vpop.eup %8194 }
0x16b3   :  { %5175 = vrot.lane.b32.xlu1 %v8195_v44, %s8286_s14  ;;  %v8197_v58 = vpop.eup %8196 }
0x16b4   :  { %v4823_v61 = vadd.f32 1.0, %v8197_v58 }
0x16b6   :  { %8198 = vrcp.f32 %v4823_v61 }
0x16b7   :  { %8200 = vpow2.f32 %v6427_v26 }
0x16c0   :  { %v8199_v0 = vpop.eup %8198 }
0x16c1   :  { %v8201_v47 = vpop.eup %8200 }
0x16c2   :  { %v5170_v10 = vadd.f32 1.0, %v8201_v47 }
0x16c4   :  { %8202 = vrcp.f32 %v5170_v10 }
0x16ce   :  { %v8203_v16 = vpop.eup %8202 }
0x1711   :  { %v4829_v13 = vpop.permute.xlu0 %4828 }
0x1712   :  { %v9189_v55 = vmul.f32 %v8199_v0, %v4829_v13 }
0x1714   :  { %v5180_v9 = vrot.slane %v9189_v55, 4 }
0x1716   :  { %5181 = vrot.lane.b32.xlu0 %v5180_v9, %s8287_s4 }
0x1725   :  { %v5176_v4 = vpop.permute.xlu1 %5175 }
0x1726   :  { %v9193_v63 = vmul.f32 %v8203_v16, %v5176_v4 }
0x1728   :  { %v5527_v42 = vrot.slane %v9193_v63, 2 }
0x172a   :  { %5528 = vrot.lane.b32.xlu1 %v5527_v42, %s8287_s4 }
0x1788   :  { %v5182_v46 = vpop.permute.xlu0 %5181 }
0x1789   :  { %7446 = vmatmul.mubr.msk.f32.vlgmr.msra.gmra.mrb[56].mxu0 %vm62_vm1, %v5182_v46  ;;  %7457 = vmatmul.mubr.msk.f32.vlgmr.msra.gmra.mrb[62].mxu1 %vm62_vm1, %v5182_v46 }
0x178a   :  { %7917 = vmatpush3.bf16.msra.mxu0 %v8407_v22  ;;  %7923 = vmatpush3.bf16.msra.mxu1 %v8526_v2 }
0x178b   :  { %7918 = vmatprep.subr.bf16.mxu0 %v8283_v12  ;;  %7924 = vmatprep.subr.bf16.mxu1 %v8283_v12 }
0x178c   :  { %7467 = vmatprep.mubr.msk.f32.mxu0 %vm8284_vm0, %v8285_v15  ;;  %7478 = vmatprep.mubr.msk.f32.mxu1 %vm8284_vm0, %v8285_v15 }
0x178e   :  { %7920 = vmatpush3.bf16.msra.mxu0 %v8418_v25  ;;  %7926 = vmatpush3.bf16.msra.mxu1 %v8537_v5 }
0x178f   :  { %7927 = vmatprep.subr.bf16.mxu0 %v8283_v12  ;;  %7933 = vmatprep.subr.bf16.mxu1 %v8283_v12 }
0x1791   :  { %7468 = vmatmul.mubr.msk.f32.vlgmr.msra.gmra.mrb[58].mxu0 %vm62_vm1, %v5182_v46  ;;  %7479 = vmatmul.mubr.msk.f32.vlgmr.msra.gmra.mrb[64].mxu1 %vm62_vm1, %v5182_v46 }
0x1792   :  { %7929 = vmatpush3.bf16.msra.mxu0 %v8430_v28  ;;  %7935 = vmatpush3.bf16.msra.mxu1 %v8549_v8 }
0x1793   :  { %7930 = vmatprep.subr.bf16.mxu0 %v8283_v12  ;;  %7936 = vmatprep.subr.bf16.mxu1 %v8283_v12 }
0x1794   :  { %7489 = vmatprep.mubr.msk.f32.mxu0 %vm8284_vm0, %v8285_v15  ;;  %7500 = vmatprep.mubr.msk.f32.mxu1 %vm8284_vm0, %v8285_v15 }
0x1796   :  { %7932 = vmatpush3.bf16.msra.mxu0 %v8441_v31  ;;  %7938 = vmatpush3.bf16.msra.mxu1 %v8560_v11 }
0x1797   :  { %7939 = vmatprep.subr.bf16.mxu0 %v8283_v12  ;;  %7945 = vmatprep.subr.bf16.mxu1 %v8283_v12 }
0x179c   :  { %v5529_v22 = vpop.permute.xlu1 %5528 }
0x179d   :  { %7490 = vmatmul.mubr.msk.f32.vlgmr.msra.gmra.mrb[60].mxu0 %vm62_vm1, %v5529_v22  ;;  %7501 = vmatmul.mubr.msk.f32.vlgmr.msra.gmra.mrb[66].mxu1 %vm62_vm1, %v5529_v22 }
0x179e   :  { %7941 = vmatpush3.bf16.msra.mxu0 %v8453_v34  ;;  %7947 = vmatpush3.bf16.msra.mxu1 %v8572_v18 }
0x179f   :  { %7942 = vmatprep.subr.bf16.mxu0 %v8283_v12  ;;  %7948 = vmatprep.subr.bf16.mxu1 %v8283_v12 }
0x17a0   :  { %7511 = vmatprep.mubr.msk.f32.mxu0 %vm8284_vm0, %v8285_v15  ;;  %7522 = vmatprep.mubr.msk.f32.mxu1 %vm8284_vm0, %v8285_v15 }
0x17a2   :  { %7944 = vmatpush3.bf16.msra.mxu0 %v8464_v37  ;;  %7950 = vmatpush3.bf16.msra.mxu1 %v8583_v21 }
0x17a5   :  { %7512 = vmatmul.mubr.msk.f32.vlgmr.msra.gmra.mrb[62].mxu0 %vm62_vm1, %v5529_v22  ;;  %7523 = vmatmul.mubr.msk.f32.vlgmr.msra.gmra.mrb[68].mxu1 %vm62_vm1, %v5529_v22 }
0x185c   :  { %v5251_v25 = vpop.f32.mrb[56].mxu0  ;;  %v5325_v28 = vpop.f32.mrb[62].mxu1 }
0x185d   :  { %v7447_v31 = vpop.f32.mrb[57].mxu0  ;;  %v7458_v34 = vpop.f32.mrb[63].mxu1  ;;  %v5330_v20 = vrot.slane %v5325_v28, 2  ;;  %v5256_v33 = vrot.slane %v5251_v25, 2 }
0x185f   :  { %v5258_v49 = vadd.f32 %v5256_v33, %v8600_v27 }
0x1861   :  { %v6433_v53 = vmul.f32 -1.442695, %v5258_v49  ;;  %v5900_v49 = vld [vmem:[%s9380_s8] sm:$0xff] }
0x1864   :  { %v5401_v2 = vpop.f32.mrb[58].mxu0  ;;  %v5477_v12 = vpop.f32.mrb[64].mxu1 }
0x1865   :  { %v5406_v5 = vrot.slane %v5401_v2, 2  ;;  %v7469_v8 = vpop.f32.mrb[59].mxu0  ;;  %v7480_v11 = vpop.f32.mrb[65].mxu1  ;;  %v5482_v0 = vrot.slane %v5477_v12, 2  ;;  %v5494_v2 = vrot.slane %v9178_v52, 6  ;;  %v5868_v52 = vsel %vm5867_vm5, %v8637_v62, %v8729_v7 }
0x1867   :  { %5407 = vrot.lane.b32.xlu1 %v5406_v5, %s8286_s14 }
0x1870   :  { %v5598_v15 = vpop.f32.mrb[60].mxu0  ;;  %v5669_v18 = vpop.f32.mrb[66].mxu1 }
0x1871   :  { %v7491_v37 = vpop.f32.mrb[61].mxu0  ;;  %v7502_v19 = vpop.f32.mrb[67].mxu1  ;;  %v5602_v32 = vadd.f32 %v5598_v15, %v8610_v40 }
0x1872   :  { %v5835_v37 = vrot.slane %v9183_v56, 2 }
0x1873   :  { %v6440_v38 = vmul.f32 -1.442695, %v5602_v32 }
0x1878   :  { %v5744_v21 = vpop.f32.mrb[62].mxu0  ;;  %v5819_v29 = vpop.f32.mrb[68].mxu1 }
0x1879   :  { %v7524_v59 = vpop.f32.mrb[69].mxu1  ;;  %5749 = vrot.lane.b32.xlu0 %v5744_v21, %s8286_s14  ;;  %v7513_v23 = vpop.f32.mrb[63].mxu0 }
0x187a   :  { %v5870_v23 = vsel %vm5869_vm6, %v5868_v52, %v8821_v24 }
0x187b   :  { %v5872_v56 = vsel %vm5871_vm7, %v5870_v23, %v8913_v41 }
0x18d9   :  { %v5408_v36 = vpop.permute.xlu1 %5407 }
0x18da   :  { %v5410_v39 = vadd.f32 %v5408_v36, %v8600_v27 }
0x18dc   :  { %8204 = vtanh.f32 %v5410_v39 }
0x18e6   :  { %v8205_v54 = vpop.eup %8204 }
0x18e7   :  { %5505 = vrot.lane.b32.xlu1 %v8205_v54, %s8286_s14 }
0x18eb   :  { %5331 = vrot.lane.b32.xlu1 %v5330_v20, %s8287_s4  ;;  %v5750_v43 = vpop.permute.xlu0 %5749 }
0x18ec   :  { %v5752_v6 = vadd.f32 %v5750_v43, %v8610_v40 }
0x18ee   :  { %8206 = vtanh.f32 %v5752_v6 }
0x18ef   :  { %8208 = vpow2.f32 %v6433_v53  ;;  %v5901_v53 = vld [vmem:[%s9380_s8 + $0x8] sm:$0xff] }
0x18f8   :  { %v8207_v48 = vpop.eup %8206 }
0x18f9   :  { %5846 = vrot.lane.b32.xlu0 %v8207_v48, %s8286_s14  ;;  %v8209_v44 = vpop.eup %8208 }
0x18fa   :  { %v5500_v50 = vadd.f32 1.0, %v8209_v44  ;;  %v7951_v44 = vpack.c.bf16 %v5901_v53, %v5900_v49 }
0x18fc   :  { %8210 = vrcp.f32 %v5500_v50  ;;  %v5904_v50 = vld [vmem:[%s9380_s8 + $0x20] sm:$0xff]  ;;  %7952 = vmatprep.subr.bf16.mxu0 %v7951_v44 }
0x18fd   :  { %5674 = vrot.lane.b32.xlu0 %v5669_v18, %s8287_s4  ;;  %8212 = vpow2.f32 %v6440_v38  ;;  %v5905_v38 = vld [vmem:[%s9380_s8 + $0x28] sm:$0xff]  ;;  %7954 = vmatpush3.bf16.msra.mxu0 %v7951_v44 }
0x1906   :  { %v8211_v60 = vpop.eup %8210 }
0x1907   :  { %v8213_v17 = vpop.eup %8212 }
0x1908   :  { %v5841_v26 = vadd.f32 1.0, %v8213_v17 }
0x190a   :  { %8214 = vrcp.f32 %v5841_v26  ;;  %v5873_v26 = vsel %vm5867_vm5, %v9005_v1, %v9097_v45 }
0x1914   :  { %v8215_v13 = vpop.eup %8214 }
0x1959   :  { %v5506_v58 = vpop.permute.xlu1 %5505 }
0x195a   :  { %v5508_v61 = vmul.f32 %v8211_v60, %v5506_v58  ;;  %v7959_v60 = vpack.c.bf16 %v5905_v38, %v5904_v50 }
0x195c   :  { %5510 = vrot.lane.b32.xlu1 %v5508_v61, %s8287_s4 }
0x195d   :  { %v5332_v10 = vpop.permute.xlu1 %5331 }
0x195e   :  { %v5334_v16 = vadd.f32 %v5332_v10, %v8600_v27  ;;  %v5906_v10 = vld [vmem:[%s9380_s8 + $0x30] sm:$0xff] }
0x1960   :  { %5483 = vrot.lane.b32.xlu1 %v5482_v0, %s8288_s7  ;;  %v6432_v4 = vmul.f32 -1.442695, %v5334_v16  ;;  %v5907_v16 = vld [vmem:[%s9380_s8 + $0x38] sm:$0xff] }
0x1962   :  { %8216 = vpow2.f32 %v6432_v4  ;;  %v7963_v4 = vpack.c.bf16 %v5907_v16, %v5906_v10 }
0x196b   :  { %v5847_v47 = vpop.permute.xlu0 %5846 }
0x196c   :  { %v5849_v9 = vmul.f32 %v8215_v13, %v5847_v47  ;;  %v8217_v46 = vpop.eup %8216  ;;  %v5874_v13 = vsel %vm5869_vm6, %v5873_v26, %v9189_v55 }
0x196d   :  { %v5490_v25 = vadd.f32 1.0, %v8217_v46 }
0x196e   :  { %5851 = vrot.lane.b32.xlu0 %v5849_v9, %s8287_s4 }
0x196f   :  { %v5675_v42 = vpop.permute.xlu0 %5674  ;;  %8218 = vrcp.f32 %v5490_v25  ;;  %v5879_v25 = vsel %vm5867_vm5, %v8917_v57, %v8825_v35 }
0x1970   :  { %v5677_v22 = vadd.f32 %v5675_v42, %v8610_v40 }
0x1972   :  { %5824 = vrot.lane.b32.xlu0 %v5819_v29, %s8288_s7  ;;  %v6439_v28 = vmul.f32 -1.442695, %v5677_v22 }
0x1974   :  { %8220 = vpow2.f32 %v6439_v28 }
0x1979   :  { %v8219_v31 = vpop.eup %8218 }
0x197a   :  { %v5496_v12 = vmul.f32 %v8219_v31, %v5494_v2  ;;  %v5880_v2 = vsel %vm5869_vm6, %v5879_v25, %v8733_v14 }
0x197e   :  { %v8221_v34 = vpop.eup %8220 }
0x197f   :  { %v5831_v5 = vadd.f32 1.0, %v8221_v34 }
0x19ce   :  { %v5511_v8 = vpop.permute.xlu1 %5510 }
0x19cf   :  { %v5513_v11 = vadd.f32 %v5511_v8, %v5496_v12  ;;  %v5881_v12 = vsel %vm5871_vm7, %v5880_v2, %v8641_v3 }
0x19d1   :  { %8222 = vtanh.f32 %v5513_v11 }
0x19d2   :  { %8224 = vrcp.f32 %v5831_v5  ;;  %v5484_v36 = vpop.permute.xlu1 %5483 }
0x19d3   :  { %v5486_v39 = vadd.f32 %v5484_v36, %v8600_v27  ;;  %v5902_v27 = vld [vmem:[%s9380_s8 + $0x10] sm:$0xff] }
0x19d5   :  { %v6434_v54 = vmul.f32 -1.442695, %v5486_v39 }
0x19db   :  { %v8223_v15 = vpop.eup %8222 }
0x19dc   :  { %v8225_v18 = vpop.eup %8224  ;;  %5522 = vrot.lane.b32.xlu1 %v8223_v15, %s8286_s14 }
0x19dd   :  { %v5837_v19 = vmul.f32 %v8225_v18, %v5835_v37 }
0x19e0   :  { %v5852_v21 = vpop.permute.xlu0 %5851 }
0x19e1   :  { %v5854_v29 = vadd.f32 %v5852_v21, %v5837_v19  ;;  %v5999_v19 = vld [vmem:[%s9382_s10] sm:$0xff]  ;;  %v6000_v21 = vld [vmem:[%s9382_s10 + $0x8] sm:$0xff] }
0x19e3   :  { %8226 = vtanh.f32 %v5854_v29  ;;  %v7967_v29 = vpack.c.bf16 %v6000_v21, %v5999_v19 }
0x19e4   :  { %8228 = vpow2.f32 %v6434_v54  ;;  %v5825_v20 = vpop.permute.xlu0 %5824 }
0x19e5   :  { %v5827_v6 = vadd.f32 %v5825_v20, %v8610_v40  ;;  %v5903_v40 = vld [vmem:[%s9380_s8 + $0x18] sm:$0xff]  ;;  %7968 = vmatprep.subr.bf16.mxu1 %v7967_v29  ;;  %v6445_v20 = vld [vmem:[%s9383_s11] ss:$0 sm:$0xff] }
0x19e6   :  { %v7955_v32 = vpack.c.bf16 %v5903_v40, %v5902_v27  ;;  %7970 = vmatpush3.bf16.msra.mxu1 %v7967_v29 }
0x19e7   :  { %v6441_v33 = vmul.f32 -1.442695, %v5827_v6 }
0x19e8   :  { %7956 = vmatprep.subr.bf16.mxu0 %v7955_v32 }
0x19e9   :  { %7958 = vmatpush3.bf16.msra.mxu0 %v7955_v32 }
0x19ea   :  { %7960 = vmatprep.subr.bf16.mxu0 %v7959_v60 }
0x19ed   :  { %v8227_v59 = vpop.eup %8226  ;;  %7962 = vmatpush3.bf16.msra.mxu0 %v7959_v60 }
0x19ee   :  { %5863 = vrot.lane.b32.xlu0 %v8227_v59, %s8286_s14  ;;  %v8229_v43 = vpop.eup %8228  ;;  %7964 = vmatprep.subr.bf16.mxu0 %v7963_v4  ;;  %v6442_v59 = vld [vmem:[%s9381_s9] ss:$0 sm:$0xff]  ;;  %s8289_s9 = smov [#allocation2]  }
0x19ef   :  { %v5517_v48 = vadd.f32 1.0, %v8229_v43  ;;  %s6296_s11 = sshll.u32 %s8289_s9, 4  ;;  %s6297_s11 = int_to_ptr.vmem [resolvable:$true] %s6296_s11 }
0x19f0   :  { %s8258_s23 = scalar_lea.vmem %s6297_s11, 32  ;;  %p8263_p1 = scmp.lt.s32.totalorder %s6297_s11, %s6297_s11 }
0x19f1   :  { %8230 = vrcp.f32 %v5517_v48  ;;  %7966 = vmatpush3.bf16.msra.mxu0 %v7963_v4  ;;  %p8259_p0 = scmp.ne.s32.totalorder %s6297_s11, %s8258_s23  ;;  %p8264_p2 = scmp.lt.s32.totalorder %s8258_s23, %s8258_s23 }
0x19f2   :  { %5884 = vrot.lane.b32.xlu0 %v5872_v56, %s8287_s4  ;;  %8232 = vpow2.f32 %v6441_v33 }
0x19f3   :  { %p8265_p3 = por %p8264_p2, %p8263_p1 }
0x19f5   :  { %p8266_p4 = pnand %p8265_p3, %p8259_p0 }
0x19fb   :  { %v8231_v58 = vpop.eup %8230 }
0x19fc   :  { %v8233_v61 = vpop.eup %8232 }
0x19fd   :  { %v5858_v9 = vadd.f32 1.0, %v8233_v61 }
0x19ff   :  { %8234 = vrcp.f32 %v5858_v9 }
0x1a09   :  { %v8235_v42 = vpop.eup %8234 }
0x1a4e   :  { %v5523_v17 = vpop.permute.xlu1 %5522 }
0x1a4f   :  { %v9290_v0 = vmul.f32 %v8231_v58, %v5523_v17 }
0x1a51   :  { %v5875_v47 = vsel %vm5871_vm7, %v5874_v13, %v9290_v0 }
0x1a52   :  { %5886 = vrot.lane.b32.xlu0 %v5875_v47, %s8287_s4 }
0x1a60   :  { %v5864_v46 = vpop.permute.xlu0 %5863 }
0x1a61   :  { %v9303_v22 = vmul.f32 %v8235_v42, %v5864_v46 }
0x1a63   :  { %v5876_v28 = vsel %vm5867_vm5, %v9303_v22, %v9193_v63 }
0x1a64   :  { %v5877_v31 = vsel %vm5869_vm6, %v5876_v28, %v9101_v30  ;;  %v5885_v5 = vpop.permute.xlu0 %5884 }
0x1a65   :  { %v5878_v34 = vsel %vm5871_vm7, %v5877_v31, %v9009_v51 }
0x1a66   :  { %5892 = vrot.lane.b32.xlu1 %v5878_v34, %s8286_s14 }
0x1a6a   :  { %5894 = vrot.lane.b32.xlu1 %v5881_v12, %s8286_s14 }
0x1ac4   :  { %v5887_v15 = vpop.permute.xlu0 %5886 }
0x1ad8   :  { %v5893_v8 = vpop.permute.xlu1 %5892 }
0x1ad9   :  { %v5898_v11 = vsel %vm62_vm1, %v5885_v5, %v5893_v8 }
0x1ada   :  { %7541 = vmatprep.mubr.msk.f32.mxu0 %vm5915_vm8, %v5898_v11 }
0x1adc   :  { %v5895_v18 = vpop.permute.xlu1 %5894 }
0x1add   :  { %v5899_v37 = vsel %vm62_vm1, %v5887_v15, %v5895_v18 }
0x1ade   :  { %7542 = vmatmul.mubr.msk.f32.vlgmr.msra.gmra.mrb[64].mxu0 %vm5915_vm8, %v5899_v37 }
0x1bb1   :  { %v7543_v52 = vpop.f32.mrb[64].mxu0 }
0x1bb2   :  { %v5994_v23 = vadd.f32 %v7543_v52, %v6442_v59  ;;  %v5988_v56 = vpop.f32.mrb[65].mxu0 }
0x1bb3   :  { %v5989_v36 = vadd.f32 %v6442_v59, %v5988_v56 }
0x1bb5   :  { %8236 = vtanh.f32 %v5989_v36 }
0x1bb6   :  { %8238 = vtanh.f32 %v5994_v23 }
0x1bbf   :  { %v8237_v39 = vpop.eup %8236 }
0x1bc0   :  { %v8239_v54 = vpop.eup %8238  ;;  %7548 = vmatprep.mubr.msk.f32.mxu1 %vm153_vm4, %v8237_v39 }
0x1bc1   :  { %7549 = vmatmul.mubr.msk.f32.vlgmr.msra.gmra.mrb[70].mxu1 %vm153_vm4, %v8239_v54 }
0x1c94   :  { %v7550_v43 = vpop.f32.mrb[70].mxu1 }
0x1c95   :  { %v6080_v6 = vpop.f32.mrb[71].mxu1  ;;  %v6086_v27 = vadd.f32 %v7550_v43, %v6445_v20 }
0x1c96   :  { %v6081_v48 = vadd.f32 %v6445_v20, %v6080_v6 }
0x1c97   :  { %v6101_v50 = vrot.slane %v6086_v27, 2  ;;  %v6104_v58 = vrot.slane %v6086_v27, 4  ;;  %v6107_v61 = vrot.slane %v6086_v27, 6 }
0x1c98   :  { %v6090_v33 = vrot.slane %v6081_v48, 2  ;;  %v6093_v53 = vrot.slane %v6081_v48, 4  ;;  %v6096_v40 = vrot.slane %v6081_v48, 6 }
0x1c9a   :  { %v6092_v49 = vmax.f32 %v6081_v48, %v6090_v33 }
0x1c9c   :  { %v6095_v44 = vmax.f32 %v6092_v49, %v6093_v53 }
0x1c9e   :  { %v6098_v32 = vmax.f32 %v6095_v44, %v6096_v40 }
0x1ca0   :  { %v6099_v38 = vmax.f32 %v6098_v32, %v6086_v27 }
0x1ca2   :  { %v6103_v60 = vmax.f32 %v6099_v38, %v6101_v50 }
0x1ca4   :  { %v6106_v17 = vmax.f32 %v6103_v60, %v6104_v58 }
0x1ca6   :  { %v6109_v26 = vmax.f32 %v6106_v17, %v6107_v61 }
0x1ca8   :  { %v6110_v13 = vsub.f32 %v6081_v48, %v6109_v26  ;;  %v6114_v47 = vrot.slane %v6109_v26, 6  ;;  %v6119_v9 = vrot.slane %v6109_v26, 4  ;;  %v6124_v10 = vrot.slane %v6109_v26, 2 }
0x1ca9   :  { %v6129_v16 = vsub.f32 %v6086_v27, %v6109_v26 }
0x1caa   :  { %v6111_v4 = vmul.f32 1.442695, %v6110_v13  ;;  %v6116_v42 = vsub.f32 %v6081_v48, %v6114_v47  ;;  %v6121_v46 = vsub.f32 %v6081_v48, %v6119_v9  ;;  %v6126_v25 = vsub.f32 %v6081_v48, %v6124_v10 }
0x1cab   :  { %v6132_v28 = vsub.f32 %v6086_v27, %v6114_v47  ;;  %v6135_v31 = vsub.f32 %v6086_v27, %v6119_v9  ;;  %v6138_v34 = vsub.f32 %v6086_v27, %v6124_v10  ;;  %v6130_v11 = vmul.f32 1.442695, %v6129_v16 }
0x1cac   :  { %v6117_v2 = vmul.f32 1.442695, %v6116_v42  ;;  %v6122_v12 = vmul.f32 1.442695, %v6121_v46  ;;  %v6127_v5 = vmul.f32 1.442695, %v6126_v25  ;;  %8240 = vpow2.f32 %v6111_v4 }
0x1cad   :  { %v6133_v8 = vmul.f32 1.442695, %v6132_v28  ;;  %v6136_v15 = vmul.f32 1.442695, %v6135_v31  ;;  %v6139_v18 = vmul.f32 1.442695, %v6138_v34 }
0x1cae   :  { %8242 = vpow2.f32 %v6117_v2 }
0x1caf   :  { %8244 = vpow2.f32 %v6122_v12 }
0x1cb0   :  { %8246 = vpow2.f32 %v6127_v5 }
0x1cb1   :  { %8248 = vpow2.f32 %v6133_v8 }
0x1cb2   :  { %8250 = vpow2.f32 %v6130_v11 }
0x1cb3   :  { %8252 = vpow2.f32 %v6136_v15 }
0x1cb4   :  { %8254 = vpow2.f32 %v6139_v18 }
0x1cb6   :  { %v8241_v37 = vpop.eup %8240 }
0x1cb8   :  { %v8243_v19 = vpop.eup %8242 }
0x1cb9   :  { %v8245_v21 = vpop.eup %8244  ;;  %v6142_v29 = vrot.slane %v8243_v19, 2 }
0x1cba   :  { %v8247_v59 = vpop.eup %8246  ;;  %v6146_v23 = vrot.slane %v8245_v21, 4 }
0x1cbb   :  { %v6144_v52 = vadd.f32 %v8241_v37, %v6142_v29  ;;  %v6150_v36 = vrot.slane %v8247_v59, 6  ;;  %v8249_v39 = vpop.eup %8248 }
0x1cbc   :  { %v8251_v54 = vpop.eup %8250  ;;  %v6155_v48 = vrot.slane %v8249_v39, 2 }
0x1cbd   :  { %v6148_v56 = vadd.f32 %v6146_v23, %v6144_v52  ;;  %v8253_v43 = vpop.eup %8252 }
0x1cbe   :  { %v8255_v33 = vpop.eup %8254  ;;  %v6159_v53 = vrot.slane %v8253_v43, 4 }
0x1cbf   :  { %v6152_v20 = vadd.f32 %v6150_v36, %v6148_v56  ;;  %v6163_v44 = vrot.slane %v8255_v33, 6 }
0x1cc1   :  { %v6153_v6 = vadd.f32 %v8251_v54, %v6152_v20 }
0x1cc3   :  { %v6157_v49 = vadd.f32 %v6155_v48, %v6153_v6 }
0x1cc5   :  { %v6161_v27 = vadd.f32 %v6159_v53, %v6157_v49 }
0x1cc7   :  { %v6165_v40 = vadd.f32 %v6163_v44, %v6161_v27 }
0x1cc9   :  { %8256 = vrcp.f32 %v6165_v40 }
0x1cd3   :  { %v8257_v32 = vpop.eup %8256 }
0x1cd4   :  { %v6167_v50 = vmul.f32 0.25, %v8257_v32 }
0x1cd6   :  { %v6168_v38 = vmul.f32 %v8241_v37, %v6167_v50  ;;  %v6178_v60 = vrot.slane %v6167_v50, 6  ;;  %v6229_v58 = vmul.f32 %v8251_v54, %v6167_v50  ;;  %v6195_v17 = vrot.slane %v6167_v50, 4 }
0x1cd7   :  { %v6212_v61 = vrot.slane %v6167_v50, 2 }
0x1cd8   :  { %v6170_v26 = vsel %vm6169_vm9, %v6168_v38, 0.0  ;;  %v6180_v13 = vmul.f32 %v8243_v19, %v6178_v60  ;;  %v6197_v47 = vmul.f32 %v8245_v21, %v6195_v17  ;;  %v6251_v9 = vmul.f32 %v8253_v43, %v6195_v17 }
0x1cd9   :  { %6171 = vadd.xlane.f32.xlu1 %v6170_v26  ;;  %v6214_v10 = vmul.f32 %v8247_v59, %v6212_v61  ;;  %v6237_v16 = vmul.f32 %v8249_v39, %v6178_v60  ;;  %v6265_v4 = vmul.f32 %v8255_v33, %v6212_v61  ;;  %v6230_v46 = vsel %vm6169_vm9, %v6229_v58, 0.0 }
0x1cda   :  { %v6182_v42 = vsel %vm6181_vm10, %v6180_v13, 0.0  ;;  %v6199_v25 = vsel %vm6198_vm11, %v6197_v47, 0.0  ;;  %v6252_v28 = vsel %vm6198_vm11, %v6251_v9, 0.0 }
0x1cdb   :  { %6183 = vadd.xlane.f32.xlu0 %v6182_v42  ;;  %v6216_v31 = vsel %vm6215_vm12, %v6214_v10, 0.0  ;;  %v6238_v34 = vsel %vm6181_vm10, %v6237_v16, 0.0  ;;  %v6266_v2 = vsel %vm6215_vm12, %v6265_v4, 0.0 }
0x1cdd   :  { %6231 = vadd.xlane.f32.xlu1 %v6230_v46 }
0x1cdf   :  { %6200 = vadd.xlane.f32.xlu0 %v6199_v25 }
0x1ce1   :  { %6253 = vadd.xlane.f32.xlu1 %v6252_v28 }
0x1ce3   :  { %6217 = vadd.xlane.f32.xlu0 %v6216_v31 }
0x1ce7   :  { %6239 = vadd.xlane.f32.xlu0 %v6238_v34 }
0x1ceb   :  { %6267 = vadd.xlane.f32.xlu0 %v6266_v2 }
0x1d66   :  { %v6172_v12 = vpop.xlane.xlu1 %6171 }
0x1d67   :  { %v6173_v59 = vmul.f32 %v6172_v12, %v8637_v62  ;;  %v6175_v52 = vmul.f32 %v6172_v12, %v9303_v22 }
0x1d68   :  { %v6184_v5 = vpop.xlane.xlu0 %6183 }
0x1d69   :  { %v6185_v8 = vmul.f32 %v6184_v5, %v8729_v7  ;;  %v6190_v11 = vmul.f32 %v6184_v5, %v9193_v63 }
0x1d6a   :  { %v6232_v18 = vpop.xlane.xlu1 %6231 }
0x1d6b   :  { %v6187_v21 = vrot.slane %v6185_v8, 2  ;;  %v6192_v29 = vrot.slane %v6190_v11, 2  ;;  %v6233_v33 = vmul.f32 %v6232_v18, %v9005_v1  ;;  %v6235_v62 = vmul.f32 %v6232_v18, %v8917_v57 }
0x1d6c   :  { %v6201_v15 = vpop.xlane.xlu0 %6200 }
0x1d6d   :  { %v6202_v37 = vmul.f32 %v6201_v15, %v8821_v24  ;;  %v6207_v19 = vmul.f32 %v6201_v15, %v9101_v30  ;;  %v6189_v39 = vadd.f32 %v6187_v21, %v6173_v59  ;;  %v6194_v54 = vadd.f32 %v6192_v29, %v6175_v52 }
0x1d6e   :  { %v6254_v20 = vpop.xlane.xlu1 %6253 }
0x1d6f   :  { %v6204_v23 = vrot.slane %v6202_v37, 4  ;;  %v6209_v56 = vrot.slane %v6207_v19, 4  ;;  %v6255_v53 = vmul.f32 %v6254_v20, %v9189_v55 }
0x1d70   :  { %v6218_v36 = vpop.xlane.xlu0 %6217 }
0x1d71   :  { %v6219_v7 = vmul.f32 %v6218_v36, %v8913_v41  ;;  %v6224_v63 = vmul.f32 %v6218_v36, %v9009_v51  ;;  %v6206_v43 = vadd.f32 %v6204_v23, %v6189_v39  ;;  %v6211_v24 = vadd.f32 %v6209_v56, %v6194_v54 }
0x1d72   :  { %v6260_v41 = vmul.f32 %v6254_v20, %v8733_v14  ;;  %v6257_v57 = vrot.slane %v6255_v53, 4 }
0x1d73   :  { %v6221_v6 = vrot.slane %v6219_v7, 6  ;;  %v6226_v30 = vrot.slane %v6224_v63, 6 }
0x1d74   :  { %v6240_v48 = vpop.xlane.xlu0 %6239  ;;  %v6262_v58 = vrot.slane %v6260_v41, 4 }
0x1d75   :  { %v6241_v22 = vmul.f32 %v6240_v48, %v9097_v45  ;;  %v6246_v49 = vmul.f32 %v6240_v48, %v8825_v35  ;;  %v6223_v27 = vadd.f32 %v6221_v6, %v6206_v43  ;;  %v6228_v51 = vadd.f32 %v6226_v30, %v6211_v24 }
0x1d77   :  { %v6243_v44 = vrot.slane %v6241_v22, 2  ;;  %v6248_v40 = vrot.slane %v6246_v49, 2  ;;  %v6234_v32 = vadd.f32 %v6233_v33, %v6223_v27  ;;  %v6236_v50 = vadd.f32 %v6235_v62, %v6228_v51 }
0x1d78   :  { %v6268_v38 = vpop.xlane.xlu0 %6267 }
0x1d79   :  { %v6269_v60 = vmul.f32 %v6268_v38, %v9290_v0  ;;  %v6274_v1 = vmul.f32 %v6268_v38, %v8641_v3  ;;  %v6245_v45 = vadd.f32 %v6243_v44, %v6234_v32  ;;  %v6250_v17 = vadd.f32 %v6248_v40, %v6236_v50 }
0x1d7b   :  { %v6271_v35 = vrot.slane %v6269_v60, 6  ;;  %v6276_v61 = vrot.slane %v6274_v1, 6  ;;  %v6259_v55 = vadd.f32 %v6257_v57, %v6245_v45  ;;  %v6264_v26 = vadd.f32 %v6262_v58, %v6250_v17 }
0x1d7d   :  { %v6273_v14 = vadd.f32 %v6271_v35, %v6259_v55  ;;  %v6278_v13 = vadd.f32 %v6276_v61, %v6264_v26 }
0x1d7f   :  { %6284 = vrot.lane.b32.xlu0 %v6278_v13, %s8286_s14  ;;  %6280 = vrot.lane.b32.xlu1 %v6273_v14, %s8287_s4 }
0x1df1   :  { %v6285_v0 = vpop.permute.xlu0 %6284  ;;  %v6281_v47 = vpop.permute.xlu1 %6280 }
0x1df2   :  { %v6287_v3 = vsel %vm62_vm1, %v6281_v47, %v6285_v0 }
0x1df3   :  { %6289 = vst.msk [vmem:[#allocation2] sm:$0x3] %vm6288_vm13, %v6287_v3 }
0x1df4   :  { %8269 = shalt.err (!%p8266_p4)
}
0x1df5   :  { %s8270_s4 = scalar_lea.hbm %s9384_s12, 32 }
0x1df6   :  { %p8271_p5 = scmp.ne.s32.totalorder %s9384_s12, %s8270_s4  ;;  %p8274_p6 = scmp.lt.u32.totalorder %s8270_s4, %s9384_s12 }
0x1df8   :  { %p8276_p7 = pnand %p8274_p6, %p8271_p5 }
0x1dfa   :  { %8279 = shalt.err (!%p8276_p7)
}
0x1dfb   :  { %6299 = dma.vmem_to_hbm [thread:$0]  %s6297_s11, 32, %s9384_s12, [#allocation3]  }
0x1dfc   :  { %8280 = dma.done.wait [#allocation3], 32  }
0x1dfd   :  { %8281 = vsyncadd [#allocation3], 4294967264 }
0x1dfe   :  { %6303 = vsyncpa [#allocation3], 1 }

</bundles_post_ra>
